<compile_context>
chip_gen: v6e
topology: v6e:2x2x1
jax: 0.10.0
libtpu: 0.0.40
codegen_flags: <defaults>
</compile_context>

<pallas_src>
import math
import functools

import jax
import jax.numpy as jnp
from jax.experimental import pallas as pl
from jax.experimental.pallas import tpu as pltpu

EPS = 1e-5  # PyTorch LayerNorm default eps
_VMEM_LIMIT_BYTES = 32 * 1024 * 1024


def _cparams(*sems):
    return pltpu.CompilerParams(dimension_semantics=sems,
                                vmem_limit_bytes=_VMEM_LIMIT_BYTES)


def _row_tile(m):
    for t in (256, 128):
        if m % t == 0:
            return t
    return m


def _layernorm_f32(h, g, b):
    mu = jnp.mean(h, axis=-1, keepdims=True)
    var = jnp.mean((h - mu) ** 2, axis=-1, keepdims=True)
    return (h - mu) * jax.lax.rsqrt(var + EPS) * g + b


# ------------------------- fused attention sub-layer -------------------------

def _attn_block_kernel(*refs, nhead, causal, fused_qkv):
    if fused_qkv:
        (x_ref, wqkv_ref, bqkv_ref, wo_ref, bo_ref, g_ref, b_ref, o_ref) = refs
        xq = x_ref[0]                                     # (S, E) bf16
        Sq, E = xq.shape
        Sk = Sq
        qkv = jnp.dot(xq, wqkv_ref[...],
                      preferred_element_type=jnp.float32) + bqkv_ref[...]
        q, k, v = qkv[:, :E], qkv[:, E:2 * E], qkv[:, 2 * E:]
    else:
        (xq_ref, xkv_ref, wq_ref, bq_ref, wkv_ref, bkv_ref,
         wo_ref, bo_ref, g_ref, b_ref, o_ref) = refs
        xq = xq_ref[0]                                    # (Sq, E) bf16
        xkv = xkv_ref[0]                                  # (Sk, E) bf16
        Sq, E = xq.shape
        Sk = xkv.shape[0]
        q = jnp.dot(xq, wq_ref[...],
                    preferred_element_type=jnp.float32) + bq_ref[...]
        kv = jnp.dot(xkv, wkv_ref[...],
                     preferred_element_type=jnp.float32) + bkv_ref[...]
        k, v = kv[:, :E], kv[:, E:]

    Dh = E // nhead
    # Heads stacked along a leading batch axis (static lane slices + leading
    # dim concat) so scores / AV run as batched MXU einsums instead of a
    # per-head Python loop of K=Dh matmuls.
    qh = jnp.stack([q[:, h * Dh:(h + 1) * Dh] for h in range(nhead)],
                   axis=0).astype(jnp.bfloat16)           # (H, Sq, Dh)
    kh = jnp.stack([k[:, h * Dh:(h + 1) * Dh] for h in range(nhead)],
                   axis=0).astype(jnp.bfloat16)           # (H, Sk, Dh)
    vh = jnp.stack([v[:, h * Dh:(h + 1) * Dh] for h in range(nhead)],
                   axis=0).astype(jnp.bfloat16)           # (H, Sk, Dh)

    # NOTE: 1/sqrt(Dh) is already folded into the Q weights at init.
    s = jnp.einsum("hqd,hkd->hqk", qh, kh,
                   preferred_element_type=jnp.float32)    # (H, Sq, Sk)
    if causal:
        row = jax.lax.broadcasted_iota(jnp.int32, (Sq, Sk), 0)
        col = jax.lax.broadcasted_iota(jnp.int32, (Sq, Sk), 1)
        s = s + jnp.where(col > row, -1e30, 0.0)[None, :, :]

    mx = jnp.max(s, axis=-1, keepdims=True)
    p = jnp.exp(s - mx)
    p = p * pl.reciprocal(jnp.sum(p, axis=-1, keepdims=True), approx=True)
    oh = jnp.einsum("hqk,hkd->hqd", p.astype(jnp.bfloat16), vh,
                    preferred_element_type=jnp.float32)   # (H, Sq, Dh)

    # Concatenate heads and run ONE full-K output projection.
    o_cat = jnp.concatenate([oh[h] for h in range(nhead)], axis=-1)
    out = jnp.dot(o_cat.astype(jnp.bfloat16), wo_ref[...],
                  preferred_element_type=jnp.float32) + bo_ref[...]

    # residual + post-LayerNorm in f32, stored as bf16
    h_res = out + xq.astype(jnp.float32)
    o_ref[0] = _layernorm_f32(h_res, g_ref[...], b_ref[...]).astype(o_ref.dtype)


def self_attn_block(x, ap, ln_g, ln_b, *, nhead, causal):
    """out = LN(x + MHA(x, x, x)), fused (E,3E) QKV projection."""
    B, S, E = x.shape
    return pl.pallas_call(
        functools.partial(_attn_block_kernel, nhead=nhead, causal=causal,
                          fused_qkv=True),
        out_shape=jax.ShapeDtypeStruct((B, S, E), jnp.bfloat16),
        grid=(B,),
        in_specs=[pl.BlockSpec((1, S, E), lambda i: (i, 0, 0)),
                  pl.BlockSpec((E, 3 * E), lambda i: (0, 0)),
                  pl.BlockSpec((1, 3 * E), lambda i: (0, 0)),
                  pl.BlockSpec((E, E), lambda i: (0, 0)),
                  pl.BlockSpec((1, E), lambda i: (0, 0)),
                  pl.BlockSpec((1, E), lambda i: (0, 0)),
                  pl.BlockSpec((1, E), lambda i: (0, 0))],
        out_specs=pl.BlockSpec((1, S, E), lambda i: (i, 0, 0)),
        compiler_params=_cparams("parallel"),
    )(x, ap["wqkv"], ap["bqkv"].reshape(1, 3 * E),
      ap["wo"], ap["bo"].reshape(1, E),
      ln_g.reshape(1, E), ln_b.reshape(1, E))


def cross_attn_block(x_q, x_kv, ap, ln_g, ln_b, *, nhead):
    """out = LN(x_q + MHA(x_q, x_kv, x_kv)), unmasked."""
    B, Sq, E = x_q.shape
    Sk = x_kv.shape[1]
    return pl.pallas_call(
        functools.partial(_attn_block_kernel, nhead=nhead, causal=False,
                          fused_qkv=False),
        out_shape=jax.ShapeDtypeStruct((B, Sq, E), jnp.bfloat16),
        grid=(B,),
        in_specs=[pl.BlockSpec((1, Sq, E), lambda i: (i, 0, 0)),
                  pl.BlockSpec((1, Sk, E), lambda i: (i, 0, 0)),
                  pl.BlockSpec((E, E), lambda i: (0, 0)),
                  pl.BlockSpec((1, E), lambda i: (0, 0)),
                  pl.BlockSpec((E, 2 * E), lambda i: (0, 0)),
                  pl.BlockSpec((1, 2 * E), lambda i: (0, 0)),
                  pl.BlockSpec((E, E), lambda i: (0, 0)),
                  pl.BlockSpec((1, E), lambda i: (0, 0)),
                  pl.BlockSpec((1, E), lambda i: (0, 0)),
                  pl.BlockSpec((1, E), lambda i: (0, 0))],
        out_specs=pl.BlockSpec((1, Sq, E), lambda i: (i, 0, 0)),
        compiler_params=_cparams("parallel"),
    )(x_q, x_kv, ap["wq"], ap["bq"].reshape(1, E),
      ap["wkv"], ap["bkv"].reshape(1, 2 * E),
      ap["wo"], ap["bo"].reshape(1, E),
      ln_g.reshape(1, E), ln_b.reshape(1, E))


# ---------------------------- fused FFN sub-layer ----------------------------

def _ffn_block_kernel(*refs, final_ln):
    if final_ln:
        (x_ref, w1_ref, b1_ref, w2_ref, b2_ref,
         g_ref, bb_ref, fg_ref, fb_ref, o_ref) = refs
    else:
        (x_ref, w1_ref, b1_ref, w2_ref, b2_ref,
         g_ref, bb_ref, o_ref) = refs
    x = x_ref[...]                                               # (tm, E) bf16
    h = jnp.dot(x, w1_ref[...],
                preferred_element_type=jnp.float32) + b1_ref[...]
    h = jnp.maximum(h, 0.0)
    y = jnp.dot(h.astype(jnp.bfloat16), w2_ref[...],
                preferred_element_type=jnp.float32) + b2_ref[...]
    out = _layernorm_f32(y + x.astype(jnp.float32), g_ref[...], bb_ref[...])
    if final_ln:                     # folded stack-final LayerNorm (enc / dec)
        out = _layernorm_f32(out, fg_ref[...], fb_ref[...])
    o_ref[...] = out.astype(o_ref.dtype)


def ffn_block(x, w1, b1, w2, b2, ln_g, ln_b, final_g=None, final_b=None):
    """LN(x + W2 relu(W1 x)) [+ optional stack-final LN], tiled over flattened
    (B*S) row blocks."""
    B, S, E = x.shape
    M = B * S
    dff = w1.shape[1]
    tm = _row_tile(M)
    final_ln = final_g is not None
    xf = x.reshape(M, E)
    in_arrays = [xf, w1, b1.reshape(1, dff), w2, b2.reshape(1, E),
                 ln_g.reshape(1, E), ln_b.reshape(1, E)]
    in_specs = [pl.BlockSpec((tm, E), lambda i: (i, 0)),
                pl.BlockSpec((E, dff), lambda i: (0, 0)),
                pl.BlockSpec((1, dff), lambda i: (0, 0)),
                pl.BlockSpec((dff, E), lambda i: (0, 0)),
                pl.BlockSpec((1, E), lambda i: (0, 0)),
                pl.BlockSpec((1, E), lambda i: (0, 0)),
                pl.BlockSpec((1, E), lambda i: (0, 0))]
    if final_ln:
        in_arrays += [final_g.reshape(1, E), final_b.reshape(1, E)]
        in_specs += [pl.BlockSpec((1, E), lambda i: (0, 0)),
                     pl.BlockSpec((1, E), lambda i: (0, 0))]
    out = pl.pallas_call(
        functools.partial(_ffn_block_kernel, final_ln=final_ln),
        out_shape=jax.ShapeDtypeStruct((M, E), jnp.bfloat16),
        grid=(M // tm,),
        in_specs=in_specs,
        out_specs=pl.BlockSpec((tm, E), lambda i: (i, 0)),
        compiler_params=_cparams("parallel"),
    )(*in_arrays)
    return out.reshape(B, S, E)


# ----------------------------- vocab projection -------------------------------

def _project_kernel(x_ref, w_ref, bias_ref, o_ref):
    o_ref[...] = jnp.dot(x_ref[...], w_ref[...],
                         preferred_element_type=jnp.float32) + bias_ref[...]


def project(y, w_pad, b_pad):
    """logits = y @ W + b (final decoder LN already applied upstream), vocab
    padded to a multiple of 128 for lane-dense stores; tiled over
    (row-block, vocab-tile)."""
    B, S, E = y.shape
    M = B * S
    Vp = w_pad.shape[1]
    tm = _row_tile(M)
    tn = next(t for t in (512, 256, 128) if Vp % t == 0)
    yf = y.reshape(M, E)
    logits = pl.pallas_call(
        _project_kernel,
        out_shape=jax.ShapeDtypeStruct((M, Vp), jnp.float32),
        grid=(M // tm, Vp // tn),
        in_specs=[pl.BlockSpec((tm, E), lambda i, j: (i, 0)),
                  pl.BlockSpec((E, tn), lambda i, j: (0, j)),
                  pl.BlockSpec((1, tn), lambda i, j: (0, j))],
        out_specs=pl.BlockSpec((tm, tn), lambda i, j: (i, j)),
        compiler_params=_cparams("parallel", "parallel"),
    )(yf, w_pad, b_pad.reshape(1, Vp))
    return logits.reshape(B, S, Vp)


# ------------------------------ params & PE -----------------------------------

def sinusoidal_pe(max_len, d):
    pos = jnp.arange(max_len, dtype=jnp.float32)[:, None]
    div = jnp.exp(jnp.arange(0, d, 2, dtype=jnp.float32) * (-math.log(10000.0) / d))
    pe = jnp.zeros((max_len, d), jnp.float32)
    pe = pe.at[:, 0::2].set(jnp.sin(pos * div))
    pe = pe.at[:, 1::2].set(jnp.cos(pos * div))
    return pe


def init_params(key, vocab, E, nhead, nlayers, dff):
    keys = iter(jax.random.split(key, 512))
    scale = 1.0 / math.sqrt(E // nhead)        # folded into Q weights / bias

    def w32(shape, s=0.02):
        return jax.random.normal(next(keys), shape, jnp.float32) * s

    def wbf(shape, s=0.02):                    # bf16-stored matmul weights
        return w32(shape, s).astype(jnp.bfloat16)

    def zeros(n):
        return jnp.zeros((n,), jnp.float32)

    def ones(n):
        return jnp.ones((n,), jnp.float32)

    def self_attn_params():
        wqkv = w32((E, 3 * E))
        wqkv = wqkv.at[:, :E].multiply(scale)            # fold 1/sqrt(Dh)
        return dict(wqkv=wqkv.astype(jnp.bfloat16),
                    bqkv=zeros(3 * E),                   # (Q bias scaled too if nonzero)
                    wo=wbf((E, E)), bo=zeros(E))

    def cross_attn_params():
        return dict(wq=(w32((E, E)) * scale).astype(jnp.bfloat16), bq=zeros(E),
                    wkv=wbf((E, 2 * E)), bkv=zeros(2 * E),
                    wo=wbf((E, E)), bo=zeros(E))

    enc = [dict(self_attn=self_attn_params(),
                ln1_g=ones(E), ln1_b=zeros(E),
                ln2_g=ones(E), ln2_b=zeros(E),
                w1=wbf((E, dff)), b1=zeros(dff),
                w2=wbf((dff, E)), b2=zeros(E)) for _ in range(nlayers)]
    dec = [dict(self_attn=self_attn_params(), cross_attn=cross_attn_params(),
                ln1_g=ones(E), ln1_b=zeros(E),
                ln2_g=ones(E), ln2_b=zeros(E),
                ln3_g=ones(E), ln3_b=zeros(E),
                w1=wbf((E, dff)), b1=zeros(dff),
                w2=wbf((dff, E)), b2=zeros(E)) for _ in range(nlayers)]

    # vocab projection padded to a multiple of 128 lanes (padding sliced off in
    # the wrapper before argmax, so it never affects results)
    Vp = ((vocab + 127) // 128) * 128
    out_w = jnp.zeros((E, Vp), jnp.float32).at[:, :vocab].set(
        w32((E, vocab))).astype(jnp.bfloat16)
    out_b = jnp.zeros((Vp,), jnp.float32)

    return dict(embedding=w32((vocab, E), 1.0),
                enc=enc, dec=dec,
                enc_norm_g=ones(E), enc_norm_b=zeros(E),
                dec_norm_g=ones(E), dec_norm_b=zeros(E),
                out_w=out_w, out_b=out_b)


# ------------------------------- forward pass --------------------------------

def seq2seq_transformer_forward(params, src_ids, trg_ids, *, nhead):
    trg_ids = trg_ids[:, :-1]                        # trg = trg[:, :-1]
    B, S_src = src_ids.shape
    S_trg = trg_ids.shape[1]
    V, E = params["embedding"].shape
    emb_scale = math.sqrt(E)
    pe = sinusoidal_pe(max(S_src, S_trg), E)

    # embedding gather + sqrt(E) scale + PE: memory-bound glue left to XLA,
    # fused next to the gather; cast to bf16 for the kernel pipeline.
    src_x = (jnp.take(params["embedding"], src_ids, axis=0) * emb_scale
             + pe[:S_src]).astype(jnp.bfloat16)
    trg_x = (jnp.take(params["embedding"], trg_ids, axis=0) * emb_scale
             + pe[:S_trg]).astype(jnp.bfloat16)

    # encoder stack (post-norm); final encoder LayerNorm folded into the last
    # encoder FFN kernel.  src_mask (flag=1) is all zeros => no masking.
    mem = src_x
    n_enc = len(params["enc"])
    for li, p in enumerate(params["enc"]):
        mem = self_attn_block(mem, p["self_attn"], p["ln1_g"], p["ln1_b"],
                              nhead=nhead, causal=False)
        last = (li == n_enc - 1)
        mem = ffn_block(mem, p["w1"], p["b1"], p["w2"], p["b2"],
                        p["ln2_g"], p["ln2_b"],
                        final_g=params["enc_norm_g"] if last else None,
                        final_b=params["enc_norm_b"] if last else None)

    # decoder stack (post-norm): causal self-attn, unmasked cross-attn, FFN.
    # final decoder LayerNorm folded into the last decoder FFN kernel.
    y = trg_x
    n_dec = len(params["dec"])
    for li, p in enumerate(params["dec"]):
        y = self_attn_block(y, p["self_attn"], p["ln1_g"], p["ln1_b"],
                            nhead=nhead, causal=True)
        y = cross_attn_block(y, mem, p["cross_attn"], p["ln2_g"], p["ln2_b"],
                             nhead=nhead)
        last = (li == n_dec - 1)
        y = ffn_block(y, p["w1"], p["b1"], p["w2"], p["b2"],
                      p["ln3_g"], p["ln3_b"],
                      final_g=params["dec_norm_g"] if last else None,
                      final_b=params["dec_norm_b"] if last else None)

    # pure vocab projection (LN already applied), lane-dense padded output.
    logits_p = project(y, params["out_w"], params["out_b"])
    logits = logits_p[:, :, :V]                     # drop lane-padding columns
    topi = jnp.argmax(logits, axis=-1)
    return topi, logits


# ----------------------------------- main -------------------------------------

if __name__ == "__main__":
    B, S_SRC, S_TRG_IN = 2, 8, 9          # trg has 9 tokens -> 8 after [:, :-1]
    EMB, NHEAD, NLAYERS, DFF, VOCAB = 32, 4, 2, 64, 64

    key = jax.random.PRNGKey(0)
    pkey, skey, tkey = jax.random.split(key, 3)
    params = init_params(pkey, VOCAB, EMB, NHEAD, NLAYERS, DFF)
    src = jax.random.randint(skey, (B, S_SRC), 0, VOCAB, dtype=jnp.int32)
    trg = jax.random.randint(tkey, (B, S_TRG_IN), 0, VOCAB, dtype=jnp.int32)

    fwd = jax.jit(functools.partial(seq2seq_transformer_forward, nhead=NHEAD))
    topi, logits = fwd(params, src, trg)
    jax.block_until_ready((topi, logits))

    assert topi.shape == (B, S_TRG_IN - 1)
    assert logits.shape == (B, S_TRG_IN - 1, VOCAB)
    assert bool(jnp.all(jnp.isfinite(logits)))
    print("KERNEL_OK")
</pallas_src>

<mosaic_0001>
module attributes {stable_mosaic.version = 11 : i64} {
  func.func @_ffn_block_kernel(%arg0: i32, %arg1: memref<16x32xbf16, #tpu.memory_space<vmem>>, %arg2: memref<32x64xbf16, #tpu.memory_space<vmem>>, %arg3: memref<1x64xf32, #tpu.memory_space<vmem>>, %arg4: memref<64x32xbf16, #tpu.memory_space<vmem>>, %arg5: memref<1x32xf32, #tpu.memory_space<vmem>>, %arg6: memref<1x32xf32, #tpu.memory_space<vmem>>, %arg7: memref<1x32xf32, #tpu.memory_space<vmem>>, %arg8: memref<16x32xbf16, #tpu.memory_space<vmem>>) attributes {dimension_semantics = [#tpu.dimension_semantics<parallel>], iteration_bounds = array<i64: 1>, scalar_prefetch = 0 : i64, scratch_operands = 0 : i64, tpu.core_type = #tpu.core_type<tc>, window_params = [{transform_indices = @transform_0, window_bounds = array<i64: 16, 32>}, {pipeline_mode = #tpu.pipeline_mode<synchronous>, transform_indices = @transform_1, window_bounds = array<i64: 32, 64>}, {pipeline_mode = #tpu.pipeline_mode<synchronous>, transform_indices = @transform_2, window_bounds = array<i64: 1, 64>}, {pipeline_mode = #tpu.pipeline_mode<synchronous>, transform_indices = @transform_3, window_bounds = array<i64: 64, 32>}, {pipeline_mode = #tpu.pipeline_mode<synchronous>, transform_indices = @transform_4, window_bounds = array<i64: 1, 32>}, {pipeline_mode = #tpu.pipeline_mode<synchronous>, transform_indices = @transform_5, window_bounds = array<i64: 1, 32>}, {pipeline_mode = #tpu.pipeline_mode<synchronous>, transform_indices = @transform_6, window_bounds = array<i64: 1, 32>}, {transform_indices = @transform_7, window_bounds = array<i64: 16, 32>}]} {
    %c0 = arith.constant 0 : index
    %c0_0 = arith.constant 0 : index
    %0 = vector.load %arg1[%c0, %c0_0] : memref<16x32xbf16, #tpu.memory_space<vmem>>, vector<16x32xbf16>
    %c0_1 = arith.constant 0 : index
    %c0_2 = arith.constant 0 : index
    %1 = vector.load %arg2[%c0_1, %c0_2] : memref<32x64xbf16, #tpu.memory_space<vmem>>, vector<32x64xbf16>
    %cst = arith.constant dense<0.000000e+00> : vector<16x64xf32>
    %2 = tpu.matmul %0, %1, %cst {dimension_numbers = #tpu.dot_dimension_numbers<[1], [0], [0], [1], [0, 0, 1, 1], [], []>} : vector<16x32xbf16>, vector<32x64xbf16>, vector<16x64xf32> -> vector<16x64xf32>
    %c0_3 = arith.constant 0 : index
    %c0_4 = arith.constant 0 : index
    %3 = vector.load %arg3[%c0_3, %c0_4] : memref<1x64xf32, #tpu.memory_space<vmem>>, vector<1x64xf32>
    %4 = vector.broadcast %3 : vector<1x64xf32> to vector<16x64xf32>
    %5 = arith.addf %2, %4 : vector<16x64xf32>
    %cst_5 = arith.constant 0.000000e+00 : f32
    %6 = vector.broadcast %cst_5 : f32 to vector<16x64xf32>
    %7 = arith.maximumf %5, %6 : vector<16x64xf32>
    %8 = arith.truncf %7 : vector<16x64xf32> to vector<16x64xbf16>
    %c0_6 = arith.constant 0 : index
    %c0_7 = arith.constant 0 : index
    %9 = vector.load %arg4[%c0_6, %c0_7] : memref<64x32xbf16, #tpu.memory_space<vmem>>, vector<64x32xbf16>
    %cst_8 = arith.constant dense<0.000000e+00> : vector<16x32xf32>
    %10 = tpu.matmul %8, %9, %cst_8 {dimension_numbers = #tpu.dot_dimension_numbers<[1], [0], [0], [1], [0, 0, 1, 1], [], []>} : vector<16x64xbf16>, vector<64x32xbf16>, vector<16x32xf32> -> vector<16x32xf32>
    %c0_9 = arith.constant 0 : index
    %c0_10 = arith.constant 0 : index
    %11 = vector.load %arg5[%c0_9, %c0_10] : memref<1x32xf32, #tpu.memory_space<vmem>>, vector<1x32xf32>
    %12 = vector.broadcast %11 : vector<1x32xf32> to vector<16x32xf32>
    %13 = arith.addf %10, %12 : vector<16x32xf32>
    %14 = arith.extf %0 : vector<16x32xbf16> to vector<16x32xf32>
    %15 = arith.addf %13, %14 : vector<16x32xf32>
    %c0_11 = arith.constant 0 : index
    %c0_12 = arith.constant 0 : index
    %16 = vector.load %arg6[%c0_11, %c0_12] : memref<1x32xf32, #tpu.memory_space<vmem>>, vector<1x32xf32>
    %c0_13 = arith.constant 0 : index
    %c0_14 = arith.constant 0 : index
    %17 = vector.load %arg7[%c0_13, %c0_14] : memref<1x32xf32, #tpu.memory_space<vmem>>, vector<1x32xf32>
    %cst_15 = arith.constant dense<0.000000e+00> : vector<16xf32>
    %18 = vector.multi_reduction <add>, %15, %cst_15 [1] : vector<16x32xf32> to vector<16xf32>
    %19 = vector.shape_cast %18 : vector<16xf32> to vector<16x1xf32>
    %cst_16 = arith.constant 3.200000e+01 : f32
    %20 = vector.broadcast %cst_16 : f32 to vector<16x1xf32>
    %21 = arith.divf %19, %20 : vector<16x1xf32>
    %22 = vector.broadcast %21 : vector<16x1xf32> to vector<16x32xf32>
    %23 = arith.subf %15, %22 : vector<16x32xf32>
    %24 = arith.mulf %23, %23 : vector<16x32xf32>
    %cst_17 = arith.constant dense<0.000000e+00> : vector<16xf32>
    %25 = vector.multi_reduction <add>, %24, %cst_17 [1] : vector<16x32xf32> to vector<16xf32>
    %26 = vector.shape_cast %25 : vector<16xf32> to vector<16x1xf32>
    %cst_18 = arith.constant 3.200000e+01 : f32
    %27 = vector.broadcast %cst_18 : f32 to vector<16x1xf32>
    %28 = arith.divf %26, %27 : vector<16x1xf32>
    %29 = vector.broadcast %21 : vector<16x1xf32> to vector<16x32xf32>
    %30 = arith.subf %15, %29 : vector<16x32xf32>
    %cst_19 = arith.constant 9.99999974E-6 : f32
    %31 = vector.broadcast %cst_19 : f32 to vector<16x1xf32>
    %32 = arith.addf %28, %31 : vector<16x1xf32>
    %33 = math.rsqrt %32 : vector<16x1xf32>
    %34 = vector.broadcast %33 : vector<16x1xf32> to vector<16x32xf32>
    %35 = arith.mulf %30, %34 : vector<16x32xf32>
    %36 = vector.broadcast %16 : vector<1x32xf32> to vector<16x32xf32>
    %37 = arith.mulf %35, %36 : vector<16x32xf32>
    %38 = vector.broadcast %17 : vector<1x32xf32> to vector<16x32xf32>
    %39 = arith.addf %37, %38 : vector<16x32xf32>
    %40 = arith.truncf %39 : vector<16x32xf32> to vector<16x32xbf16>
    %c0_20 = arith.constant 0 : index
    %c0_21 = arith.constant 0 : index
    %41 = vector.load %arg8[%c0_20, %c0_21] : memref<16x32xbf16, #tpu.memory_space<vmem>>, vector<16x32xbf16>
    tpu.vector_store %arg8[%c0_20, %c0_21], %40 {strides = array<i32>} : memref<16x32xbf16, #tpu.memory_space<vmem>>, vector<16x32xbf16>,
    return
  }
  func.func @transform_0(%arg0: i32) -> (i32, i32) {
    %c0_i32 = arith.constant 0 : i32
    %c0_i32_0 = arith.constant 0 : i32
    return %arg0, %c0_i32 : i32, i32
  }
  func.func @transform_1(%arg0: i32) -> (i32, i32) {
    %c0_i32 = arith.constant 0 : i32
    %c0_i32_0 = arith.constant 0 : i32
    %c0_i32_1 = arith.constant 0 : i32
    return %c0_i32, %c0_i32_0 : i32, i32
  }
  func.func @transform_2(%arg0: i32) -> (i32, i32) {
    %c0_i32 = arith.constant 0 : i32
    %c0_i32_0 = arith.constant 0 : i32
    %c0_i32_1 = arith.constant 0 : i32
    return %c0_i32, %c0_i32_0 : i32, i32
  }
  func.func @transform_3(%arg0: i32) -> (i32, i32) {
    %c0_i32 = arith.constant 0 : i32
    %c0_i32_0 = arith.constant 0 : i32
    %c0_i32_1 = arith.constant 0 : i32
    return %c0_i32, %c0_i32_0 : i32, i32
  }
  func.func @transform_4(%arg0: i32) -> (i32, i32) {
    %c0_i32 = arith.constant 0 : i32
    %c0_i32_0 = arith.constant 0 : i32
    %c0_i32_1 = arith.constant 0 : i32
    return %c0_i32, %c0_i32_0 : i32, i32
  }
  func.func @transform_5(%arg0: i32) -> (i32, i32) {
    %c0_i32 = arith.constant 0 : i32
    %c0_i32_0 = arith.constant 0 : i32
    %c0_i32_1 = arith.constant 0 : i32
    return %c0_i32, %c0_i32_0 : i32, i32
  }
  func.func @transform_6(%arg0: i32) -> (i32, i32) {
    %c0_i32 = arith.constant 0 : i32
    %c0_i32_0 = arith.constant 0 : i32
    %c0_i32_1 = arith.constant 0 : i32
    return %c0_i32, %c0_i32_0 : i32, i32
  }
  func.func @transform_7(%arg0: i32) -> (i32, i32) {
    %c0_i32 = arith.constant 0 : i32
    %c0_i32_0 = arith.constant 0 : i32
    return %arg0, %c0_i32 : i32, i32
  }
}

module attributes {stable_mosaic.version = 11 : i64} {
  func.func @_attn_block_kernel(%arg0: i32, %arg1: memref<1x8x32xbf16, #tpu.memory_space<vmem>>, %arg2: memref<32x96xbf16, #tpu.memory_space<vmem>>, %arg3: memref<1x96xf32, #tpu.memory_space<vmem>>, %arg4: memref<32x32xbf16, #tpu.memory_space<vmem>>, %arg5: memref<1x32xf32, #tpu.memory_space<vmem>>, %arg6: memref<1x32xf32, #tpu.memory_space<vmem>>, %arg7: memref<1x32xf32, #tpu.memory_space<vmem>>, %arg8: memref<1x8x32xbf16, #tpu.memory_space<vmem>>) attributes {dimension_semantics = [#tpu.dimension_semantics<parallel>], iteration_bounds = array<i64: 2>, scalar_prefetch = 0 : i64, scratch_operands = 0 : i64, tpu.core_type = #tpu.core_type<tc>, window_params = [{transform_indices = @transform_0, window_bounds = array<i64: 1, 8, 32>}, {pipeline_mode = #tpu.pipeline_mode<synchronous>, transform_indices = @transform_1, window_bounds = array<i64: 32, 96>}, {pipeline_mode = #tpu.pipeline_mode<synchronous>, transform_indices = @transform_2, window_bounds = array<i64: 1, 96>}, {pipeline_mode = #tpu.pipeline_mode<synchronous>, transform_indices = @transform_3, window_bounds = array<i64: 32, 32>}, {pipeline_mode = #tpu.pipeline_mode<synchronous>, transform_indices = @transform_4, window_bounds = array<i64: 1, 32>}, {pipeline_mode = #tpu.pipeline_mode<synchronous>, transform_indices = @transform_5, window_bounds = array<i64: 1, 32>}, {pipeline_mode = #tpu.pipeline_mode<synchronous>, transform_indices = @transform_6, window_bounds = array<i64: 1, 32>}, {transform_indices = @transform_7, window_bounds = array<i64: 1, 8, 32>}]} {
    %c0 = arith.constant 0 : index
    %c0_0 = arith.constant 0 : index
    %c0_1 = arith.constant 0 : index
    %0 = vector.load %arg1[%c0, %c0_0, %c0_1] : memref<1x8x32xbf16, #tpu.memory_space<vmem>>, vector<1x8x32xbf16>
    %1 = vector.shape_cast %0 : vector<1x8x32xbf16> to vector<8x32xbf16>
    %c0_2 = arith.constant 0 : index
    %c0_3 = arith.constant 0 : index
    %2 = vector.load %arg2[%c0_2, %c0_3] : memref<32x96xbf16, #tpu.memory_space<vmem>>, vector<32x96xbf16>
    %cst = arith.constant dense<0.000000e+00> : vector<8x96xf32>
    %3 = tpu.matmul %1, %2, %cst {dimension_numbers = #tpu.dot_dimension_numbers<[1], [0], [0], [1], [0, 0, 1, 1], [], []>} : vector<8x32xbf16>, vector<32x96xbf16>, vector<8x96xf32> -> vector<8x96xf32>
    %c0_4 = arith.constant 0 : index
    %c0_5 = arith.constant 0 : index
    %4 = vector.load %arg3[%c0_4, %c0_5] : memref<1x96xf32, #tpu.memory_space<vmem>>, vector<1x96xf32>
    %5 = vector.broadcast %4 : vector<1x96xf32> to vector<8x96xf32>
    %6 = arith.addf %3, %5 : vector<8x96xf32>
    %7 = vector.extract_strided_slice %6 {offsets = [0, 0], sizes = [8, 32], strides = [1, 1]} : vector<8x96xf32> to vector<8x32xf32>
    %8 = vector.extract_strided_slice %6 {offsets = [0, 32], sizes = [8, 32], strides = [1, 1]} : vector<8x96xf32> to vector<8x32xf32>
    %9 = vector.extract_strided_slice %6 {offsets = [0, 64], sizes = [8, 32], strides = [1, 1]} : vector<8x96xf32> to vector<8x32xf32>
    %10 = vector.extract_strided_slice %7 {offsets = [0, 0], sizes = [8, 8], strides = [1, 1]} : vector<8x32xf32> to vector<8x8xf32>
    %11 = vector.extract_strided_slice %7 {offsets = [0, 8], sizes = [8, 8], strides = [1, 1]} : vector<8x32xf32> to vector<8x8xf32>
    %12 = vector.extract_strided_slice %7 {offsets = [0, 16], sizes = [8, 8], strides = [1, 1]} : vector<8x32xf32> to vector<8x8xf32>
    %13 = vector.extract_strided_slice %7 {offsets = [0, 24], sizes = [8, 8], strides = [1, 1]} : vector<8x32xf32> to vector<8x8xf32>
    %14 = vector.shape_cast %10 : vector<8x8xf32> to vector<1x8x8xf32>
    %15 = vector.shape_cast %11 : vector<8x8xf32> to vector<1x8x8xf32>
    %16 = vector.shape_cast %12 : vector<8x8xf32> to vector<1x8x8xf32>
    %17 = vector.shape_cast %13 : vector<8x8xf32> to vector<1x8x8xf32>
    %18 = tpu.concatenate %14, %15, %16, %17 in 0 : vector<1x8x8xf32>, vector<1x8x8xf32>, vector<1x8x8xf32>, vector<1x8x8xf32> -> vector<4x8x8xf32>
    %19 = arith.truncf %18 : vector<4x8x8xf32> to vector<4x8x8xbf16>
    %20 = vector.extract_strided_slice %8 {offsets = [0, 0], sizes = [8, 8], strides = [1, 1]} : vector<8x32xf32> to vector<8x8xf32>
    %21 = vector.extract_strided_slice %8 {offsets = [0, 8], sizes = [8, 8], strides = [1, 1]} : vector<8x32xf32> to vector<8x8xf32>
    %22 = vector.extract_strided_slice %8 {offsets = [0, 16], sizes = [8, 8], strides = [1, 1]} : vector<8x32xf32> to vector<8x8xf32>
    %23 = vector.extract_strided_slice %8 {offsets = [0, 24], sizes = [8, 8], strides = [1, 1]} : vector<8x32xf32> to vector<8x8xf32>
    %24 = vector.shape_cast %20 : vector<8x8xf32> to vector<1x8x8xf32>
    %25 = vector.shape_cast %21 : vector<8x8xf32> to vector<1x8x8xf32>
    %26 = vector.shape_cast %22 : vector<8x8xf32> to vector<1x8x8xf32>
    %27 = vector.shape_cast %23 : vector<8x8xf32> to vector<1x8x8xf32>
    %28 = tpu.concatenate %24, %25, %26, %27 in 0 : vector<1x8x8xf32>, vector<1x8x8xf32>, vector<1x8x8xf32>, vector<1x8x8xf32> -> vector<4x8x8xf32>
    %29 = arith.truncf %28 : vector<4x8x8xf32> to vector<4x8x8xbf16>
    %30 = vector.extract_strided_slice %9 {offsets = [0, 0], sizes = [8, 8], strides = [1, 1]} : vector<8x32xf32> to vector<8x8xf32>
    %31 = vector.extract_strided_slice %9 {offsets = [0, 8], sizes = [8, 8], strides = [1, 1]} : vector<8x32xf32> to vector<8x8xf32>
    %32 = vector.extract_strided_slice %9 {offsets = [0, 16], sizes = [8, 8], strides = [1, 1]} : vector<8x32xf32> to vector<8x8xf32>
    %33 = vector.extract_strided_slice %9 {offsets = [0, 24], sizes = [8, 8], strides = [1, 1]} : vector<8x32xf32> to vector<8x8xf32>
    %34 = vector.shape_cast %30 : vector<8x8xf32> to vector<1x8x8xf32>
    %35 = vector.shape_cast %31 : vector<8x8xf32> to vector<1x8x8xf32>
    %36 = vector.shape_cast %32 : vector<8x8xf32> to vector<1x8x8xf32>
    %37 = vector.shape_cast %33 : vector<8x8xf32> to vector<1x8x8xf32>
    %38 = tpu.concatenate %34, %35, %36, %37 in 0 : vector<1x8x8xf32>, vector<1x8x8xf32>, vector<1x8x8xf32>, vector<1x8x8xf32> -> vector<4x8x8xf32>
    %39 = arith.truncf %38 : vector<4x8x8xf32> to vector<4x8x8xbf16>
    "tpu.trace_start"() <{level = 10 : i32, message = "hqd,hkd->hqk"}> : () -> ()
    %cst_6 = arith.constant dense<0.000000e+00> : vector<4x8x8xf32>
    %40 = tpu.matmul %19, %29, %cst_6 {dimension_numbers = #tpu.dot_dimension_numbers<[2], [2], [1], [1], [0, 0, 0, 1, 1, 1], [0], [0]>} : vector<4x8x8xbf16>, vector<4x8x8xbf16>, vector<4x8x8xf32> -> vector<4x8x8xf32>
    "tpu.trace_stop"() : () -> ()
    %41 = tpu.iota {dimensions = array<i32: 0>} : vector<8x8xi32>
    %42 = tpu.iota {dimensions = array<i32: 1>} : vector<8x8xi32>
    %43 = arith.cmpi sgt, %42, %41 : vector<8x8xi32>
    %cst_7 = arith.constant -1.000000e+30 : f32
    %cst_8 = arith.constant 0.000000e+00 : f32
    %44 = vector.broadcast %cst_7 : f32 to vector<8x8xf32>
    %45 = vector.broadcast %cst_8 : f32 to vector<8x8xf32>
    %46 = arith.select %43, %44, %45 : vector<8x8xi1>, vector<8x8xf32>
    %47 = vector.shape_cast %46 : vector<8x8xf32> to vector<1x8x8xf32>
    %48 = vector.broadcast %47 : vector<1x8x8xf32> to vector<4x8x8xf32>
    %49 = arith.addf %40, %48 : vector<4x8x8xf32>
    %cst_9 = arith.constant dense<0xFF800000> : vector<4x8xf32>
    %50 = vector.multi_reduction <maximumf>, %49, %cst_9 [2] : vector<4x8x8xf32> to vector<4x8xf32>
    %51 = vector.shape_cast %50 : vector<4x8xf32> to vector<4x8x1xf32>
    %52 = vector.broadcast %51 : vector<4x8x1xf32> to vector<4x8x8xf32>
    %53 = arith.subf %49, %52 : vector<4x8x8xf32>
    %54 = math.exp %53 : vector<4x8x8xf32>
    %cst_10 = arith.constant dense<0.000000e+00> : vector<4x8xf32>
    %55 = vector.multi_reduction <add>, %54, %cst_10 [2] : vector<4x8x8xf32> to vector<4x8xf32>
    %56 = vector.shape_cast %55 : vector<4x8xf32> to vector<4x8x1xf32>
    %57 = tpu.reciprocal %56 {approx = true} : vector<4x8x1xf32> -> vector<4x8x1xf32>
    %58 = vector.broadcast %57 : vector<4x8x1xf32> to vector<4x8x8xf32>
    %59 = arith.mulf %54, %58 : vector<4x8x8xf32>
    %60 = arith.truncf %59 : vector<4x8x8xf32> to vector<4x8x8xbf16>
    "tpu.trace_start"() <{level = 10 : i32, message = "hqk,hkd->hqd"}> : () -> ()
    %cst_11 = arith.constant dense<0.000000e+00> : vector<4x8x8xf32>
    %61 = tpu.matmul %60, %39, %cst_11 {dimension_numbers = #tpu.dot_dimension_numbers<[2], [1], [1], [2], [0, 0, 0, 1, 1, 2], [0], [0]>} : vector<4x8x8xbf16>, vector<4x8x8xbf16>, vector<4x8x8xf32> -> vector<4x8x8xf32>
    "tpu.trace_stop"() : () -> ()
    %62 = vector.extract_strided_slice %61 {offsets = [0, 0, 0], sizes = [1, 8, 8], strides = [1, 1, 1]} : vector<4x8x8xf32> to vector<1x8x8xf32>
    %63 = vector.shape_cast %62 : vector<1x8x8xf32> to vector<8x8xf32>
    %64 = vector.extract_strided_slice %61 {offsets = [1, 0, 0], sizes = [1, 8, 8], strides = [1, 1, 1]} : vector<4x8x8xf32> to vector<1x8x8xf32>
    %65 = vector.shape_cast %64 : vector<1x8x8xf32> to vector<8x8xf32>
    %66 = vector.extract_strided_slice %61 {offsets = [2, 0, 0], sizes = [1, 8, 8], strides = [1, 1, 1]} : vector<4x8x8xf32> to vector<1x8x8xf32>
    %67 = vector.shape_cast %66 : vector<1x8x8xf32> to vector<8x8xf32>
    %68 = vector.extract_strided_slice %61 {offsets = [3, 0, 0], sizes = [1, 8, 8], strides = [1, 1, 1]} : vector<4x8x8xf32> to vector<1x8x8xf32>
    %69 = vector.shape_cast %68 : vector<1x8x8xf32> to vector<8x8xf32>
    %70 = tpu.concatenate %63, %65, %67, %69 in 1 : vector<8x8xf32>, vector<8x8xf32>, vector<8x8xf32>, vector<8x8xf32> -> vector<8x32xf32>
    %71 = arith.truncf %70 : vector<8x32xf32> to vector<8x32xbf16>
    %c0_12 = arith.constant 0 : index
    %c0_13 = arith.constant 0 : index
    %72 = vector.load %arg4[%c0_12, %c0_13] : memref<32x32xbf16, #tpu.memory_space<vmem>>, vector<32x32xbf16>
    %cst_14 = arith.constant dense<0.000000e+00> : vector<8x32xf32>
    %73 = tpu.matmul %71, %72, %cst_14 {dimension_numbers = #tpu.dot_dimension_numbers<[1], [0], [0], [1], [0, 0, 1, 1], [], []>} : vector<8x32xbf16>, vector<32x32xbf16>, vector<8x32xf32> -> vector<8x32xf32>
    %c0_15 = arith.constant 0 : index
    %c0_16 = arith.constant 0 : index
    %74 = vector.load %arg5[%c0_15, %c0_16] : memref<1x32xf32, #tpu.memory_space<vmem>>, vector<1x32xf32>
    %75 = vector.broadcast %74 : vector<1x32xf32> to vector<8x32xf32>
    %76 = arith.addf %73, %75 : vector<8x32xf32>
    %77 = arith.extf %1 : vector<8x32xbf16> to vector<8x32xf32>
    %78 = arith.addf %76, %77 : vector<8x32xf32>
    %c0_17 = arith.constant 0 : index
    %c0_18 = arith.constant 0 : index
    %79 = vector.load %arg6[%c0_17, %c0_18] : memref<1x32xf32, #tpu.memory_space<vmem>>, vector<1x32xf32>
    %c0_19 = arith.constant 0 : index
    %c0_20 = arith.constant 0 : index
    %80 = vector.load %arg7[%c0_19, %c0_20] : memref<1x32xf32, #tpu.memory_space<vmem>>, vector<1x32xf32>
    %cst_21 = arith.constant dense<0.000000e+00> : vector<8xf32>
    %81 = vector.multi_reduction <add>, %78, %cst_21 [1] : vector<8x32xf32> to vector<8xf32>
    %82 = vector.shape_cast %81 : vector<8xf32> to vector<8x1xf32>
    %cst_22 = arith.constant 3.200000e+01 : f32
    %83 = vector.broadcast %cst_22 : f32 to vector<8x1xf32>
    %84 = arith.divf %82, %83 : vector<8x1xf32>
    %85 = vector.broadcast %84 : vector<8x1xf32> to vector<8x32xf32>
    %86 = arith.subf %78, %85 : vector<8x32xf32>
    %87 = arith.mulf %86, %86 : vector<8x32xf32>
    %cst_23 = arith.constant dense<0.000000e+00> : vector<8xf32>
    %88 = vector.multi_reduction <add>, %87, %cst_23 [1] : vector<8x32xf32> to vector<8xf32>
    %89 = vector.shape_cast %88 : vector<8xf32> to vector<8x1xf32>
    %cst_24 = arith.constant 3.200000e+01 : f32
    %90 = vector.broadcast %cst_24 : f32 to vector<8x1xf32>
    %91 = arith.divf %89, %90 : vector<8x1xf32>
    %92 = vector.broadcast %84 : vector<8x1xf32> to vector<8x32xf32>
    %93 = arith.subf %78, %92 : vector<8x32xf32>
    %cst_25 = arith.constant 9.99999974E-6 : f32
    %94 = vector.broadcast %cst_25 : f32 to vector<8x1xf32>
    %95 = arith.addf %91, %94 : vector<8x1xf32>
    %96 = math.rsqrt %95 : vector<8x1xf32>
    %97 = vector.broadcast %96 : vector<8x1xf32> to vector<8x32xf32>
    %98 = arith.mulf %93, %97 : vector<8x32xf32>
    %99 = vector.broadcast %79 : vector<1x32xf32> to vector<8x32xf32>
    %100 = arith.mulf %98, %99 : vector<8x32xf32>
    %101 = vector.broadcast %80 : vector<1x32xf32> to vector<8x32xf32>
    %102 = arith.addf %100, %101 : vector<8x32xf32>
    %103 = arith.truncf %102 : vector<8x32xf32> to vector<8x32xbf16>
    %c0_26 = arith.constant 0 : index
    %c0_27 = arith.constant 0 : index
    %c0_28 = arith.constant 0 : index
    %104 = vector.load %arg8[%c0_26, %c0_27, %c0_28] : memref<1x8x32xbf16, #tpu.memory_space<vmem>>, vector<1x8x32xbf16>
    %105 = vector.shape_cast %104 : vector<1x8x32xbf16> to vector<8x32xbf16>
    %106 = vector.shape_cast %103 : vector<8x32xbf16> to vector<1x8x32xbf16>
    tpu.vector_store %arg8[%c0_26, %c0_27, %c0_28], %106 {strides = array<i32>} : memref<1x8x32xbf16, #tpu.memory_space<vmem>>, vector<1x8x32xbf16>,
    return
  }
  func.func @transform_0(%arg0: i32) -> (i32, i32, i32) {
    %c0_i32 = arith.constant 0 : i32
    %c0_i32_0 = arith.constant 0 : i32
    %c0_i32_1 = arith.constant 0 : i32
    return %arg0, %c0_i32, %c0_i32_0 : i32, i32, i32
  }
  func.func @transform_1(%arg0: i32) -> (i32, i32) {
    %c0_i32 = arith.constant 0 : i32
    %c0_i32_0 = arith.constant 0 : i32
    %c0_i32_1 = arith.constant 0 : i32
    return %c0_i32, %c0_i32_0 : i32, i32
  }
  func.func @transform_2(%arg0: i32) -> (i32, i32) {
    %c0_i32 = arith.constant 0 : i32
    %c0_i32_0 = arith.constant 0 : i32
    %c0_i32_1 = arith.constant 0 : i32
    return %c0_i32, %c0_i32_0 : i32, i32
  }
  func.func @transform_3(%arg0: i32) -> (i32, i32) {
    %c0_i32 = arith.constant 0 : i32
    %c0_i32_0 = arith.constant 0 : i32
    %c0_i32_1 = arith.constant 0 : i32
    return %c0_i32, %c0_i32_0 : i32, i32
  }
  func.func @transform_4(%arg0: i32) -> (i32, i32) {
    %c0_i32 = arith.constant 0 : i32
    %c0_i32_0 = arith.constant 0 : i32
    %c0_i32_1 = arith.constant 0 : i32
    return %c0_i32, %c0_i32_0 : i32, i32
  }
  func.func @transform_5(%arg0: i32) -> (i32, i32) {
    %c0_i32 = arith.constant 0 : i32
    %c0_i32_0 = arith.constant 0 : i32
    %c0_i32_1 = arith.constant 0 : i32
    return %c0_i32, %c0_i32_0 : i32, i32
  }
  func.func @transform_6(%arg0: i32) -> (i32, i32) {
    %c0_i32 = arith.constant 0 : i32
    %c0_i32_0 = arith.constant 0 : i32
    %c0_i32_1 = arith.constant 0 : i32
    return %c0_i32, %c0_i32_0 : i32, i32
  }
  func.func @transform_7(%arg0: i32) -> (i32, i32, i32) {
    %c0_i32 = arith.constant 0 : i32
    %c0_i32_0 = arith.constant 0 : i32
    %c0_i32_1 = arith.constant 0 : i32
    return %arg0, %c0_i32, %c0_i32_0 : i32, i32, i32
  }
}

module attributes {stable_mosaic.version = 11 : i64} {
  func.func @_ffn_block_kernel(%arg0: i32, %arg1: memref<16x32xbf16, #tpu.memory_space<vmem>>, %arg2: memref<32x64xbf16, #tpu.memory_space<vmem>>, %arg3: memref<1x64xf32, #tpu.memory_space<vmem>>, %arg4: memref<64x32xbf16, #tpu.memory_space<vmem>>, %arg5: memref<1x32xf32, #tpu.memory_space<vmem>>, %arg6: memref<1x32xf32, #tpu.memory_space<vmem>>, %arg7: memref<1x32xf32, #tpu.memory_space<vmem>>, %arg8: memref<1x32xf32, #tpu.memory_space<vmem>>, %arg9: memref<1x32xf32, #tpu.memory_space<vmem>>, %arg10: memref<16x32xbf16, #tpu.memory_space<vmem>>) attributes {dimension_semantics = [#tpu.dimension_semantics<parallel>], iteration_bounds = array<i64: 1>, scalar_prefetch = 0 : i64, scratch_operands = 0 : i64, tpu.core_type = #tpu.core_type<tc>, window_params = [{transform_indices = @transform_0, window_bounds = array<i64: 16, 32>}, {pipeline_mode = #tpu.pipeline_mode<synchronous>, transform_indices = @transform_1, window_bounds = array<i64: 32, 64>}, {pipeline_mode = #tpu.pipeline_mode<synchronous>, transform_indices = @transform_2, window_bounds = array<i64: 1, 64>}, {pipeline_mode = #tpu.pipeline_mode<synchronous>, transform_indices = @transform_3, window_bounds = array<i64: 64, 32>}, {pipeline_mode = #tpu.pipeline_mode<synchronous>, transform_indices = @transform_4, window_bounds = array<i64: 1, 32>}, {pipeline_mode = #tpu.pipeline_mode<synchronous>, transform_indices = @transform_5, window_bounds = array<i64: 1, 32>}, {pipeline_mode = #tpu.pipeline_mode<synchronous>, transform_indices = @transform_6, window_bounds = array<i64: 1, 32>}, {pipeline_mode = #tpu.pipeline_mode<synchronous>, transform_indices = @transform_7, window_bounds = array<i64: 1, 32>}, {pipeline_mode = #tpu.pipeline_mode<synchronous>, transform_indices = @transform_8, window_bounds = array<i64: 1, 32>}, {transform_indices = @transform_9, window_bounds = array<i64: 16, 32>}]} {
    %c0 = arith.constant 0 : index
    %c0_0 = arith.constant 0 : index
    %0 = vector.load %arg1[%c0, %c0_0] : memref<16x32xbf16, #tpu.memory_space<vmem>>, vector<16x32xbf16>
    %c0_1 = arith.constant 0 : index
    %c0_2 = arith.constant 0 : index
    %1 = vector.load %arg2[%c0_1, %c0_2] : memref<32x64xbf16, #tpu.memory_space<vmem>>, vector<32x64xbf16>
    %cst = arith.constant dense<0.000000e+00> : vector<16x64xf32>
    %2 = tpu.matmul %0, %1, %cst {dimension_numbers = #tpu.dot_dimension_numbers<[1], [0], [0], [1], [0, 0, 1, 1], [], []>} : vector<16x32xbf16>, vector<32x64xbf16>, vector<16x64xf32> -> vector<16x64xf32>
    %c0_3 = arith.constant 0 : index
    %c0_4 = arith.constant 0 : index
    %3 = vector.load %arg3[%c0_3, %c0_4] : memref<1x64xf32, #tpu.memory_space<vmem>>, vector<1x64xf32>
    %4 = vector.broadcast %3 : vector<1x64xf32> to vector<16x64xf32>
    %5 = arith.addf %2, %4 : vector<16x64xf32>
    %cst_5 = arith.constant 0.000000e+00 : f32
    %6 = vector.broadcast %cst_5 : f32 to vector<16x64xf32>
    %7 = arith.maximumf %5, %6 : vector<16x64xf32>
    %8 = arith.truncf %7 : vector<16x64xf32> to vector<16x64xbf16>
    %c0_6 = arith.constant 0 : index
    %c0_7 = arith.constant 0 : index
    %9 = vector.load %arg4[%c0_6, %c0_7] : memref<64x32xbf16, #tpu.memory_space<vmem>>, vector<64x32xbf16>
    %cst_8 = arith.constant dense<0.000000e+00> : vector<16x32xf32>
    %10 = tpu.matmul %8, %9, %cst_8 {dimension_numbers = #tpu.dot_dimension_numbers<[1], [0], [0], [1], [0, 0, 1, 1], [], []>} : vector<16x64xbf16>, vector<64x32xbf16>, vector<16x32xf32> -> vector<16x32xf32>
    %c0_9 = arith.constant 0 : index
    %c0_10 = arith.constant 0 : index
    %11 = vector.load %arg5[%c0_9, %c0_10] : memref<1x32xf32, #tpu.memory_space<vmem>>, vector<1x32xf32>
    %12 = vector.broadcast %11 : vector<1x32xf32> to vector<16x32xf32>
    %13 = arith.addf %10, %12 : vector<16x32xf32>
    %14 = arith.extf %0 : vector<16x32xbf16> to vector<16x32xf32>
    %15 = arith.addf %13, %14 : vector<16x32xf32>
    %c0_11 = arith.constant 0 : index
    %c0_12 = arith.constant 0 : index
    %16 = vector.load %arg6[%c0_11, %c0_12] : memref<1x32xf32, #tpu.memory_space<vmem>>, vector<1x32xf32>
    %c0_13 = arith.constant 0 : index
    %c0_14 = arith.constant 0 : index
    %17 = vector.load %arg7[%c0_13, %c0_14] : memref<1x32xf32, #tpu.memory_space<vmem>>, vector<1x32xf32>
    %cst_15 = arith.constant dense<0.000000e+00> : vector<16xf32>
    %18 = vector.multi_reduction <add>, %15, %cst_15 [1] : vector<16x32xf32> to vector<16xf32>
    %19 = vector.shape_cast %18 : vector<16xf32> to vector<16x1xf32>
    %cst_16 = arith.constant 3.200000e+01 : f32
    %20 = vector.broadcast %cst_16 : f32 to vector<16x1xf32>
    %21 = arith.divf %19, %20 : vector<16x1xf32>
    %22 = vector.broadcast %21 : vector<16x1xf32> to vector<16x32xf32>
    %23 = arith.subf %15, %22 : vector<16x32xf32>
    %24 = arith.mulf %23, %23 : vector<16x32xf32>
    %cst_17 = arith.constant dense<0.000000e+00> : vector<16xf32>
    %25 = vector.multi_reduction <add>, %24, %cst_17 [1] : vector<16x32xf32> to vector<16xf32>
    %26 = vector.shape_cast %25 : vector<16xf32> to vector<16x1xf32>
    %cst_18 = arith.constant 3.200000e+01 : f32
    %27 = vector.broadcast %cst_18 : f32 to vector<16x1xf32>
    %28 = arith.divf %26, %27 : vector<16x1xf32>
    %29 = vector.broadcast %21 : vector<16x1xf32> to vector<16x32xf32>
    %30 = arith.subf %15, %29 : vector<16x32xf32>
    %cst_19 = arith.constant 9.99999974E-6 : f32
    %31 = vector.broadcast %cst_19 : f32 to vector<16x1xf32>
    %32 = arith.addf %28, %31 : vector<16x1xf32>
    %33 = math.rsqrt %32 : vector<16x1xf32>
    %34 = vector.broadcast %33 : vector<16x1xf32> to vector<16x32xf32>
    %35 = arith.mulf %30, %34 : vector<16x32xf32>
    %36 = vector.broadcast %16 : vector<1x32xf32> to vector<16x32xf32>
    %37 = arith.mulf %35, %36 : vector<16x32xf32>
    %38 = vector.broadcast %17 : vector<1x32xf32> to vector<16x32xf32>
    %39 = arith.addf %37, %38 : vector<16x32xf32>
    %c0_20 = arith.constant 0 : index
    %c0_21 = arith.constant 0 : index
    %40 = vector.load %arg8[%c0_20, %c0_21] : memref<1x32xf32, #tpu.memory_space<vmem>>, vector<1x32xf32>
    %c0_22 = arith.constant 0 : index
    %c0_23 = arith.constant 0 : index
    %41 = vector.load %arg9[%c0_22, %c0_23] : memref<1x32xf32, #tpu.memory_space<vmem>>, vector<1x32xf32>
    %cst_24 = arith.constant dense<0.000000e+00> : vector<16xf32>
    %42 = vector.multi_reduction <add>, %39, %cst_24 [1] : vector<16x32xf32> to vector<16xf32>
    %43 = vector.shape_cast %42 : vector<16xf32> to vector<16x1xf32>
    %cst_25 = arith.constant 3.200000e+01 : f32
    %44 = vector.broadcast %cst_25 : f32 to vector<16x1xf32>
    %45 = arith.divf %43, %44 : vector<16x1xf32>
    %46 = vector.broadcast %45 : vector<16x1xf32> to vector<16x32xf32>
    %47 = arith.subf %39, %46 : vector<16x32xf32>
    %48 = arith.mulf %47, %47 : vector<16x32xf32>
    %cst_26 = arith.constant dense<0.000000e+00> : vector<16xf32>
    %49 = vector.multi_reduction <add>, %48, %cst_26 [1] : vector<16x32xf32> to vector<16xf32>
    %50 = vector.shape_cast %49 : vector<16xf32> to vector<16x1xf32>
    %cst_27 = arith.constant 3.200000e+01 : f32
    %51 = vector.broadcast %cst_27 : f32 to vector<16x1xf32>
    %52 = arith.divf %50, %51 : vector<16x1xf32>
    %53 = vector.broadcast %45 : vector<16x1xf32> to vector<16x32xf32>
    %54 = arith.subf %39, %53 : vector<16x32xf32>
    %cst_28 = arith.constant 9.99999974E-6 : f32
    %55 = vector.broadcast %cst_28 : f32 to vector<16x1xf32>
    %56 = arith.addf %52, %55 : vector<16x1xf32>
    %57 = math.rsqrt %56 : vector<16x1xf32>
    %58 = vector.broadcast %57 : vector<16x1xf32> to vector<16x32xf32>
    %59 = arith.mulf %54, %58 : vector<16x32xf32>
    %60 = vector.broadcast %40 : vector<1x32xf32> to vector<16x32xf32>
    %61 = arith.mulf %59, %60 : vector<16x32xf32>
    %62 = vector.broadcast %41 : vector<1x32xf32> to vector<16x32xf32>
    %63 = arith.addf %61, %62 : vector<16x32xf32>
    %64 = arith.truncf %63 : vector<16x32xf32> to vector<16x32xbf16>
    %c0_29 = arith.constant 0 : index
    %c0_30 = arith.constant 0 : index
    %65 = vector.load %arg10[%c0_29, %c0_30] : memref<16x32xbf16, #tpu.memory_space<vmem>>, vector<16x32xbf16>
    tpu.vector_store %arg10[%c0_29, %c0_30], %64 {strides = array<i32>} : memref<16x32xbf16, #tpu.memory_space<vmem>>, vector<16x32xbf16>,
    return
  }
  func.func @transform_0(%arg0: i32) -> (i32, i32) {
    %c0_i32 = arith.constant 0 : i32
    %c0_i32_0 = arith.constant 0 : i32
    return %arg0, %c0_i32 : i32, i32
  }
  func.func @transform_1(%arg0: i32) -> (i32, i32) {
    %c0_i32 = arith.constant 0 : i32
    %c0_i32_0 = arith.constant 0 : i32
    %c0_i32_1 = arith.constant 0 : i32
    return %c0_i32, %c0_i32_0 : i32, i32
  }
  func.func @transform_2(%arg0: i32) -> (i32, i32) {
    %c0_i32 = arith.constant 0 : i32
    %c0_i32_0 = arith.constant 0 : i32
    %c0_i32_1 = arith.constant 0 : i32
    return %c0_i32, %c0_i32_0 : i32, i32
  }
  func.func @transform_3(%arg0: i32) -> (i32, i32) {
    %c0_i32 = arith.constant 0 : i32
    %c0_i32_0 = arith.constant 0 : i32
    %c0_i32_1 = arith.constant 0 : i32
    return %c0_i32, %c0_i32_0 : i32, i32
  }
  func.func @transform_4(%arg0: i32) -> (i32, i32) {
    %c0_i32 = arith.constant 0 : i32
    %c0_i32_0 = arith.constant 0 : i32
    %c0_i32_1 = arith.constant 0 : i32
    return %c0_i32, %c0_i32_0 : i32, i32
  }
  func.func @transform_5(%arg0: i32) -> (i32, i32) {
    %c0_i32 = arith.constant 0 : i32
    %c0_i32_0 = arith.constant 0 : i32
    %c0_i32_1 = arith.constant 0 : i32
    return %c0_i32, %c0_i32_0 : i32, i32
  }
  func.func @transform_6(%arg0: i32) -> (i32, i32) {
    %c0_i32 = arith.constant 0 : i32
    %c0_i32_0 = arith.constant 0 : i32
    %c0_i32_1 = arith.constant 0 : i32
    return %c0_i32, %c0_i32_0 : i32, i32
  }
  func.func @transform_7(%arg0: i32) -> (i32, i32) {
    %c0_i32 = arith.constant 0 : i32
    %c0_i32_0 = arith.constant 0 : i32
    %c0_i32_1 = arith.constant 0 : i32
    return %c0_i32, %c0_i32_0 : i32, i32
  }
  func.func @transform_8(%arg0: i32) -> (i32, i32) {
    %c0_i32 = arith.constant 0 : i32
    %c0_i32_0 = arith.constant 0 : i32
    %c0_i32_1 = arith.constant 0 : i32
    return %c0_i32, %c0_i32_0 : i32, i32
  }
  func.func @transform_9(%arg0: i32) -> (i32, i32) {
    %c0_i32 = arith.constant 0 : i32
    %c0_i32_0 = arith.constant 0 : i32
    return %arg0, %c0_i32 : i32, i32
  }
}

module attributes {stable_mosaic.version = 11 : i64} {
  func.func @_attn_block_kernel(%arg0: i32, %arg1: memref<1x8x32xbf16, #tpu.memory_space<vmem>>, %arg2: memref<32x96xbf16, #tpu.memory_space<vmem>>, %arg3: memref<1x96xf32, #tpu.memory_space<vmem>>, %arg4: memref<32x32xbf16, #tpu.memory_space<vmem>>, %arg5: memref<1x32xf32, #tpu.memory_space<vmem>>, %arg6: memref<1x32xf32, #tpu.memory_space<vmem>>, %arg7: memref<1x32xf32, #tpu.memory_space<vmem>>, %arg8: memref<1x8x32xbf16, #tpu.memory_space<vmem>>) attributes {dimension_semantics = [#tpu.dimension_semantics<parallel>], iteration_bounds = array<i64: 2>, scalar_prefetch = 0 : i64, scratch_operands = 0 : i64, tpu.core_type = #tpu.core_type<tc>, window_params = [{transform_indices = @transform_0, window_bounds = array<i64: 1, 8, 32>}, {pipeline_mode = #tpu.pipeline_mode<synchronous>, transform_indices = @transform_1, window_bounds = array<i64: 32, 96>}, {pipeline_mode = #tpu.pipeline_mode<synchronous>, transform_indices = @transform_2, window_bounds = array<i64: 1, 96>}, {pipeline_mode = #tpu.pipeline_mode<synchronous>, transform_indices = @transform_3, window_bounds = array<i64: 32, 32>}, {pipeline_mode = #tpu.pipeline_mode<synchronous>, transform_indices = @transform_4, window_bounds = array<i64: 1, 32>}, {pipeline_mode = #tpu.pipeline_mode<synchronous>, transform_indices = @transform_5, window_bounds = array<i64: 1, 32>}, {pipeline_mode = #tpu.pipeline_mode<synchronous>, transform_indices = @transform_6, window_bounds = array<i64: 1, 32>}, {transform_indices = @transform_7, window_bounds = array<i64: 1, 8, 32>}]} {
    %c0 = arith.constant 0 : index
    %c0_0 = arith.constant 0 : index
    %c0_1 = arith.constant 0 : index
    %0 = vector.load %arg1[%c0, %c0_0, %c0_1] : memref<1x8x32xbf16, #tpu.memory_space<vmem>>, vector<1x8x32xbf16>
    %1 = vector.shape_cast %0 : vector<1x8x32xbf16> to vector<8x32xbf16>
    %c0_2 = arith.constant 0 : index
    %c0_3 = arith.constant 0 : index
    %2 = vector.load %arg2[%c0_2, %c0_3] : memref<32x96xbf16, #tpu.memory_space<vmem>>, vector<32x96xbf16>
    %cst = arith.constant dense<0.000000e+00> : vector<8x96xf32>
    %3 = tpu.matmul %1, %2, %cst {dimension_numbers = #tpu.dot_dimension_numbers<[1], [0], [0], [1], [0, 0, 1, 1], [], []>} : vector<8x32xbf16>, vector<32x96xbf16>, vector<8x96xf32> -> vector<8x96xf32>
    %c0_4 = arith.constant 0 : index
    %c0_5 = arith.constant 0 : index
    %4 = vector.load %arg3[%c0_4, %c0_5] : memref<1x96xf32, #tpu.memory_space<vmem>>, vector<1x96xf32>
    %5 = vector.broadcast %4 : vector<1x96xf32> to vector<8x96xf32>
    %6 = arith.addf %3, %5 : vector<8x96xf32>
    %7 = vector.extract_strided_slice %6 {offsets = [0, 0], sizes = [8, 32], strides = [1, 1]} : vector<8x96xf32> to vector<8x32xf32>
    %8 = vector.extract_strided_slice %6 {offsets = [0, 32], sizes = [8, 32], strides = [1, 1]} : vector<8x96xf32> to vector<8x32xf32>
    %9 = vector.extract_strided_slice %6 {offsets = [0, 64], sizes = [8, 32], strides = [1, 1]} : vector<8x96xf32> to vector<8x32xf32>
    %10 = vector.extract_strided_slice %7 {offsets = [0, 0], sizes = [8, 8], strides = [1, 1]} : vector<8x32xf32> to vector<8x8xf32>
    %11 = vector.extract_strided_slice %7 {offsets = [0, 8], sizes = [8, 8], strides = [1, 1]} : vector<8x32xf32> to vector<8x8xf32>
    %12 = vector.extract_strided_slice %7 {offsets = [0, 16], sizes = [8, 8], strides = [1, 1]} : vector<8x32xf32> to vector<8x8xf32>
    %13 = vector.extract_strided_slice %7 {offsets = [0, 24], sizes = [8, 8], strides = [1, 1]} : vector<8x32xf32> to vector<8x8xf32>
    %14 = vector.shape_cast %10 : vector<8x8xf32> to vector<1x8x8xf32>
    %15 = vector.shape_cast %11 : vector<8x8xf32> to vector<1x8x8xf32>
    %16 = vector.shape_cast %12 : vector<8x8xf32> to vector<1x8x8xf32>
    %17 = vector.shape_cast %13 : vector<8x8xf32> to vector<1x8x8xf32>
    %18 = tpu.concatenate %14, %15, %16, %17 in 0 : vector<1x8x8xf32>, vector<1x8x8xf32>, vector<1x8x8xf32>, vector<1x8x8xf32> -> vector<4x8x8xf32>
    %19 = arith.truncf %18 : vector<4x8x8xf32> to vector<4x8x8xbf16>
    %20 = vector.extract_strided_slice %8 {offsets = [0, 0], sizes = [8, 8], strides = [1, 1]} : vector<8x32xf32> to vector<8x8xf32>
    %21 = vector.extract_strided_slice %8 {offsets = [0, 8], sizes = [8, 8], strides = [1, 1]} : vector<8x32xf32> to vector<8x8xf32>
    %22 = vector.extract_strided_slice %8 {offsets = [0, 16], sizes = [8, 8], strides = [1, 1]} : vector<8x32xf32> to vector<8x8xf32>
    %23 = vector.extract_strided_slice %8 {offsets = [0, 24], sizes = [8, 8], strides = [1, 1]} : vector<8x32xf32> to vector<8x8xf32>
    %24 = vector.shape_cast %20 : vector<8x8xf32> to vector<1x8x8xf32>
    %25 = vector.shape_cast %21 : vector<8x8xf32> to vector<1x8x8xf32>
    %26 = vector.shape_cast %22 : vector<8x8xf32> to vector<1x8x8xf32>
    %27 = vector.shape_cast %23 : vector<8x8xf32> to vector<1x8x8xf32>
    %28 = tpu.concatenate %24, %25, %26, %27 in 0 : vector<1x8x8xf32>, vector<1x8x8xf32>, vector<1x8x8xf32>, vector<1x8x8xf32> -> vector<4x8x8xf32>
    %29 = arith.truncf %28 : vector<4x8x8xf32> to vector<4x8x8xbf16>
    %30 = vector.extract_strided_slice %9 {offsets = [0, 0], sizes = [8, 8], strides = [1, 1]} : vector<8x32xf32> to vector<8x8xf32>
    %31 = vector.extract_strided_slice %9 {offsets = [0, 8], sizes = [8, 8], strides = [1, 1]} : vector<8x32xf32> to vector<8x8xf32>
    %32 = vector.extract_strided_slice %9 {offsets = [0, 16], sizes = [8, 8], strides = [1, 1]} : vector<8x32xf32> to vector<8x8xf32>
    %33 = vector.extract_strided_slice %9 {offsets = [0, 24], sizes = [8, 8], strides = [1, 1]} : vector<8x32xf32> to vector<8x8xf32>
    %34 = vector.shape_cast %30 : vector<8x8xf32> to vector<1x8x8xf32>
    %35 = vector.shape_cast %31 : vector<8x8xf32> to vector<1x8x8xf32>
    %36 = vector.shape_cast %32 : vector<8x8xf32> to vector<1x8x8xf32>
    %37 = vector.shape_cast %33 : vector<8x8xf32> to vector<1x8x8xf32>
    %38 = tpu.concatenate %34, %35, %36, %37 in 0 : vector<1x8x8xf32>, vector<1x8x8xf32>, vector<1x8x8xf32>, vector<1x8x8xf32> -> vector<4x8x8xf32>
    %39 = arith.truncf %38 : vector<4x8x8xf32> to vector<4x8x8xbf16>
    "tpu.trace_start"() <{level = 10 : i32, message = "hqd,hkd->hqk"}> : () -> ()
    %cst_6 = arith.constant dense<0.000000e+00> : vector<4x8x8xf32>
    %40 = tpu.matmul %19, %29, %cst_6 {dimension_numbers = #tpu.dot_dimension_numbers<[2], [2], [1], [1], [0, 0, 0, 1, 1, 1], [0], [0]>} : vector<4x8x8xbf16>, vector<4x8x8xbf16>, vector<4x8x8xf32> -> vector<4x8x8xf32>
    "tpu.trace_stop"() : () -> ()
    %cst_7 = arith.constant dense<0xFF800000> : vector<4x8xf32>
    %41 = vector.multi_reduction <maximumf>, %40, %cst_7 [2] : vector<4x8x8xf32> to vector<4x8xf32>
    %42 = vector.shape_cast %41 : vector<4x8xf32> to vector<4x8x1xf32>
    %43 = vector.broadcast %42 : vector<4x8x1xf32> to vector<4x8x8xf32>
    %44 = arith.subf %40, %43 : vector<4x8x8xf32>
    %45 = math.exp %44 : vector<4x8x8xf32>
    %cst_8 = arith.constant dense<0.000000e+00> : vector<4x8xf32>
    %46 = vector.multi_reduction <add>, %45, %cst_8 [2] : vector<4x8x8xf32> to vector<4x8xf32>
    %47 = vector.shape_cast %46 : vector<4x8xf32> to vector<4x8x1xf32>
    %48 = tpu.reciprocal %47 {approx = true} : vector<4x8x1xf32> -> vector<4x8x1xf32>
    %49 = vector.broadcast %48 : vector<4x8x1xf32> to vector<4x8x8xf32>
    %50 = arith.mulf %45, %49 : vector<4x8x8xf32>
    %51 = arith.truncf %50 : vector<4x8x8xf32> to vector<4x8x8xbf16>
    "tpu.trace_start"() <{level = 10 : i32, message = "hqk,hkd->hqd"}> : () -> ()
    %cst_9 = arith.constant dense<0.000000e+00> : vector<4x8x8xf32>
    %52 = tpu.matmul %51, %39, %cst_9 {dimension_numbers = #tpu.dot_dimension_numbers<[2], [1], [1], [2], [0, 0, 0, 1, 1, 2], [0], [0]>} : vector<4x8x8xbf16>, vector<4x8x8xbf16>, vector<4x8x8xf32> -> vector<4x8x8xf32>
    "tpu.trace_stop"() : () -> ()
    %53 = vector.extract_strided_slice %52 {offsets = [0, 0, 0], sizes = [1, 8, 8], strides = [1, 1, 1]} : vector<4x8x8xf32> to vector<1x8x8xf32>
    %54 = vector.shape_cast %53 : vector<1x8x8xf32> to vector<8x8xf32>
    %55 = vector.extract_strided_slice %52 {offsets = [1, 0, 0], sizes = [1, 8, 8], strides = [1, 1, 1]} : vector<4x8x8xf32> to vector<1x8x8xf32>
    %56 = vector.shape_cast %55 : vector<1x8x8xf32> to vector<8x8xf32>
    %57 = vector.extract_strided_slice %52 {offsets = [2, 0, 0], sizes = [1, 8, 8], strides = [1, 1, 1]} : vector<4x8x8xf32> to vector<1x8x8xf32>
    %58 = vector.shape_cast %57 : vector<1x8x8xf32> to vector<8x8xf32>
    %59 = vector.extract_strided_slice %52 {offsets = [3, 0, 0], sizes = [1, 8, 8], strides = [1, 1, 1]} : vector<4x8x8xf32> to vector<1x8x8xf32>
    %60 = vector.shape_cast %59 : vector<1x8x8xf32> to vector<8x8xf32>
    %61 = tpu.concatenate %54, %56, %58, %60 in 1 : vector<8x8xf32>, vector<8x8xf32>, vector<8x8xf32>, vector<8x8xf32> -> vector<8x32xf32>
    %62 = arith.truncf %61 : vector<8x32xf32> to vector<8x32xbf16>
    %c0_10 = arith.constant 0 : index
    %c0_11 = arith.constant 0 : index
    %63 = vector.load %arg4[%c0_10, %c0_11] : memref<32x32xbf16, #tpu.memory_space<vmem>>, vector<32x32xbf16>
    %cst_12 = arith.constant dense<0.000000e+00> : vector<8x32xf32>
    %64 = tpu.matmul %62, %63, %cst_12 {dimension_numbers = #tpu.dot_dimension_numbers<[1], [0], [0], [1], [0, 0, 1, 1], [], []>} : vector<8x32xbf16>, vector<32x32xbf16>, vector<8x32xf32> -> vector<8x32xf32>
    %c0_13 = arith.constant 0 : index
    %c0_14 = arith.constant 0 : index
    %65 = vector.load %arg5[%c0_13, %c0_14] : memref<1x32xf32, #tpu.memory_space<vmem>>, vector<1x32xf32>
    %66 = vector.broadcast %65 : vector<1x32xf32> to vector<8x32xf32>
    %67 = arith.addf %64, %66 : vector<8x32xf32>
    %68 = arith.extf %1 : vector<8x32xbf16> to vector<8x32xf32>
    %69 = arith.addf %67, %68 : vector<8x32xf32>
    %c0_15 = arith.constant 0 : index
    %c0_16 = arith.constant 0 : index
    %70 = vector.load %arg6[%c0_15, %c0_16] : memref<1x32xf32, #tpu.memory_space<vmem>>, vector<1x32xf32>
    %c0_17 = arith.constant 0 : index
    %c0_18 = arith.constant 0 : index
    %71 = vector.load %arg7[%c0_17, %c0_18] : memref<1x32xf32, #tpu.memory_space<vmem>>, vector<1x32xf32>
    %cst_19 = arith.constant dense<0.000000e+00> : vector<8xf32>
    %72 = vector.multi_reduction <add>, %69, %cst_19 [1] : vector<8x32xf32> to vector<8xf32>
    %73 = vector.shape_cast %72 : vector<8xf32> to vector<8x1xf32>
    %cst_20 = arith.constant 3.200000e+01 : f32
    %74 = vector.broadcast %cst_20 : f32 to vector<8x1xf32>
    %75 = arith.divf %73, %74 : vector<8x1xf32>
    %76 = vector.broadcast %75 : vector<8x1xf32> to vector<8x32xf32>
    %77 = arith.subf %69, %76 : vector<8x32xf32>
    %78 = arith.mulf %77, %77 : vector<8x32xf32>
    %cst_21 = arith.constant dense<0.000000e+00> : vector<8xf32>
    %79 = vector.multi_reduction <add>, %78, %cst_21 [1] : vector<8x32xf32> to vector<8xf32>
    %80 = vector.shape_cast %79 : vector<8xf32> to vector<8x1xf32>
    %cst_22 = arith.constant 3.200000e+01 : f32
    %81 = vector.broadcast %cst_22 : f32 to vector<8x1xf32>
    %82 = arith.divf %80, %81 : vector<8x1xf32>
    %83 = vector.broadcast %75 : vector<8x1xf32> to vector<8x32xf32>
    %84 = arith.subf %69, %83 : vector<8x32xf32>
    %cst_23 = arith.constant 9.99999974E-6 : f32
    %85 = vector.broadcast %cst_23 : f32 to vector<8x1xf32>
    %86 = arith.addf %82, %85 : vector<8x1xf32>
    %87 = math.rsqrt %86 : vector<8x1xf32>
    %88 = vector.broadcast %87 : vector<8x1xf32> to vector<8x32xf32>
    %89 = arith.mulf %84, %88 : vector<8x32xf32>
    %90 = vector.broadcast %70 : vector<1x32xf32> to vector<8x32xf32>
    %91 = arith.mulf %89, %90 : vector<8x32xf32>
    %92 = vector.broadcast %71 : vector<1x32xf32> to vector<8x32xf32>
    %93 = arith.addf %91, %92 : vector<8x32xf32>
    %94 = arith.truncf %93 : vector<8x32xf32> to vector<8x32xbf16>
    %c0_24 = arith.constant 0 : index
    %c0_25 = arith.constant 0 : index
    %c0_26 = arith.constant 0 : index
    %95 = vector.load %arg8[%c0_24, %c0_25, %c0_26] : memref<1x8x32xbf16, #tpu.memory_space<vmem>>, vector<1x8x32xbf16>
    %96 = vector.shape_cast %95 : vector<1x8x32xbf16> to vector<8x32xbf16>
    %97 = vector.shape_cast %94 : vector<8x32xbf16> to vector<1x8x32xbf16>
    tpu.vector_store %arg8[%c0_24, %c0_25, %c0_26], %97 {strides = array<i32>} : memref<1x8x32xbf16, #tpu.memory_space<vmem>>, vector<1x8x32xbf16>,
    return
  }
  func.func @transform_0(%arg0: i32) -> (i32, i32, i32) {
    %c0_i32 = arith.constant 0 : i32
    %c0_i32_0 = arith.constant 0 : i32
    %c0_i32_1 = arith.constant 0 : i32
    return %arg0, %c0_i32, %c0_i32_0 : i32, i32, i32
  }
  func.func @transform_1(%arg0: i32) -> (i32, i32) {
    %c0_i32 = arith.constant 0 : i32
    %c0_i32_0 = arith.constant 0 : i32
    %c0_i32_1 = arith.constant 0 : i32
    return %c0_i32, %c0_i32_0 : i32, i32
  }
  func.func @transform_2(%arg0: i32) -> (i32, i32) {
    %c0_i32 = arith.constant 0 : i32
    %c0_i32_0 = arith.constant 0 : i32
    %c0_i32_1 = arith.constant 0 : i32
    return %c0_i32, %c0_i32_0 : i32, i32
  }
  func.func @transform_3(%arg0: i32) -> (i32, i32) {
    %c0_i32 = arith.constant 0 : i32
    %c0_i32_0 = arith.constant 0 : i32
    %c0_i32_1 = arith.constant 0 : i32
    return %c0_i32, %c0_i32_0 : i32, i32
  }
  func.func @transform_4(%arg0: i32) -> (i32, i32) {
    %c0_i32 = arith.constant 0 : i32
    %c0_i32_0 = arith.constant 0 : i32
    %c0_i32_1 = arith.constant 0 : i32
    return %c0_i32, %c0_i32_0 : i32, i32
  }
  func.func @transform_5(%arg0: i32) -> (i32, i32) {
    %c0_i32 = arith.constant 0 : i32
    %c0_i32_0 = arith.constant 0 : i32
    %c0_i32_1 = arith.constant 0 : i32
    return %c0_i32, %c0_i32_0 : i32, i32
  }
  func.func @transform_6(%arg0: i32) -> (i32, i32) {
    %c0_i32 = arith.constant 0 : i32
    %c0_i32_0 = arith.constant 0 : i32
    %c0_i32_1 = arith.constant 0 : i32
    return %c0_i32, %c0_i32_0 : i32, i32
  }
  func.func @transform_7(%arg0: i32) -> (i32, i32, i32) {
    %c0_i32 = arith.constant 0 : i32
    %c0_i32_0 = arith.constant 0 : i32
    %c0_i32_1 = arith.constant 0 : i32
    return %arg0, %c0_i32, %c0_i32_0 : i32, i32, i32
  }
}

module attributes {stable_mosaic.version = 11 : i64} {
  func.func @_project_kernel(%arg0: i32, %arg1: i32, %arg2: memref<16x32xbf16, #tpu.memory_space<vmem>>, %arg3: memref<32x128xbf16, #tpu.memory_space<vmem>>, %arg4: memref<1x128xf32, #tpu.memory_space<vmem>>, %arg5: memref<16x128xf32, #tpu.memory_space<vmem>>) attributes {dimension_semantics = [#tpu.dimension_semantics<parallel>, #tpu.dimension_semantics<parallel>], iteration_bounds = array<i64: 1, 1>, scalar_prefetch = 0 : i64, scratch_operands = 0 : i64, tpu.core_type = #tpu.core_type<tc>, window_params = [{transform_indices = @transform_0, window_bounds = array<i64: 16, 32>}, {transform_indices = @transform_1, window_bounds = array<i64: 32, 128>}, {transform_indices = @transform_2, window_bounds = array<i64: 1, 128>}, {transform_indices = @transform_3, window_bounds = array<i64: 16, 128>}]} {
    %c0 = arith.constant 0 : index
    %c0_0 = arith.constant 0 : index
    %0 = vector.load %arg2[%c0, %c0_0] : memref<16x32xbf16, #tpu.memory_space<vmem>>, vector<16x32xbf16>
    %c0_1 = arith.constant 0 : index
    %c0_2 = arith.constant 0 : index
    %1 = vector.load %arg3[%c0_1, %c0_2] : memref<32x128xbf16, #tpu.memory_space<vmem>>, vector<32x128xbf16>
    %cst = arith.constant dense<0.000000e+00> : vector<16x128xf32>
    %2 = tpu.matmul %0, %1, %cst {dimension_numbers = #tpu.dot_dimension_numbers<[1], [0], [0], [1], [0, 0, 1, 1], [], []>} : vector<16x32xbf16>, vector<32x128xbf16>, vector<16x128xf32> -> vector<16x128xf32>
    %c0_3 = arith.constant 0 : index
    %c0_4 = arith.constant 0 : index
    %3 = vector.load %arg4[%c0_3, %c0_4] : memref<1x128xf32, #tpu.memory_space<vmem>>, vector<1x128xf32>
    %4 = vector.broadcast %3 : vector<1x128xf32> to vector<16x128xf32>
    %5 = arith.addf %2, %4 : vector<16x128xf32>
    %c0_5 = arith.constant 0 : index
    %c0_6 = arith.constant 0 : index
    %6 = vector.load %arg5[%c0_5, %c0_6] : memref<16x128xf32, #tpu.memory_space<vmem>>, vector<16x128xf32>
    tpu.vector_store %arg5[%c0_5, %c0_6], %5 {strides = array<i32>} : memref<16x128xf32, #tpu.memory_space<vmem>>, vector<16x128xf32>,
    return
  }
  func.func @transform_0(%arg0: i32, %arg1: i32) -> (i32, i32) {
    %c0_i32 = arith.constant 0 : i32
    %c0_i32_0 = arith.constant 0 : i32
    return %arg0, %c0_i32 : i32, i32
  }
  func.func @transform_1(%arg0: i32, %arg1: i32) -> (i32, i32) {
    %c0_i32 = arith.constant 0 : i32
    %c0_i32_0 = arith.constant 0 : i32
    return %c0_i32, %arg1 : i32, i32
  }
  func.func @transform_2(%arg0: i32, %arg1: i32) -> (i32, i32) {
    %c0_i32 = arith.constant 0 : i32
    %c0_i32_0 = arith.constant 0 : i32
    return %c0_i32, %arg1 : i32, i32
  }
  func.func @transform_3(%arg0: i32, %arg1: i32) -> (i32, i32) {
    %c0_i32 = arith.constant 0 : i32
    return %arg0, %arg1 : i32, i32
  }
}

module attributes {stable_mosaic.version = 11 : i64} {
  func.func @_attn_block_kernel(%arg0: i32, %arg1: memref<1x8x32xbf16, #tpu.memory_space<vmem>>, %arg2: memref<1x8x32xbf16, #tpu.memory_space<vmem>>, %arg3: memref<32x32xbf16, #tpu.memory_space<vmem>>, %arg4: memref<1x32xf32, #tpu.memory_space<vmem>>, %arg5: memref<32x64xbf16, #tpu.memory_space<vmem>>, %arg6: memref<1x64xf32, #tpu.memory_space<vmem>>, %arg7: memref<32x32xbf16, #tpu.memory_space<vmem>>, %arg8: memref<1x32xf32, #tpu.memory_space<vmem>>, %arg9: memref<1x32xf32, #tpu.memory_space<vmem>>, %arg10: memref<1x32xf32, #tpu.memory_space<vmem>>, %arg11: memref<1x8x32xbf16, #tpu.memory_space<vmem>>) attributes {dimension_semantics = [#tpu.dimension_semantics<parallel>], iteration_bounds = array<i64: 2>, scalar_prefetch = 0 : i64, scratch_operands = 0 : i64, tpu.core_type = #tpu.core_type<tc>, window_params = [{transform_indices = @transform_0, window_bounds = array<i64: 1, 8, 32>}, {transform_indices = @transform_1, window_bounds = array<i64: 1, 8, 32>}, {pipeline_mode = #tpu.pipeline_mode<synchronous>, transform_indices = @transform_2, window_bounds = array<i64: 32, 32>}, {pipeline_mode = #tpu.pipeline_mode<synchronous>, transform_indices = @transform_3, window_bounds = array<i64: 1, 32>}, {pipeline_mode = #tpu.pipeline_mode<synchronous>, transform_indices = @transform_4, window_bounds = array<i64: 32, 64>}, {pipeline_mode = #tpu.pipeline_mode<synchronous>, transform_indices = @transform_5, window_bounds = array<i64: 1, 64>}, {pipeline_mode = #tpu.pipeline_mode<synchronous>, transform_indices = @transform_6, window_bounds = array<i64: 32, 32>}, {pipeline_mode = #tpu.pipeline_mode<synchronous>, transform_indices = @transform_7, window_bounds = array<i64: 1, 32>}, {pipeline_mode = #tpu.pipeline_mode<synchronous>, transform_indices = @transform_8, window_bounds = array<i64: 1, 32>}, {pipeline_mode = #tpu.pipeline_mode<synchronous>, transform_indices = @transform_9, window_bounds = array<i64: 1, 32>}, {transform_indices = @transform_10, window_bounds = array<i64: 1, 8, 32>}]} {
    %c0 = arith.constant 0 : index
    %c0_0 = arith.constant 0 : index
    %c0_1 = arith.constant 0 : index
    %0 = vector.load %arg1[%c0, %c0_0, %c0_1] : memref<1x8x32xbf16, #tpu.memory_space<vmem>>, vector<1x8x32xbf16>
    %1 = vector.shape_cast %0 : vector<1x8x32xbf16> to vector<8x32xbf16>
    %c0_2 = arith.constant 0 : index
    %c0_3 = arith.constant 0 : index
    %c0_4 = arith.constant 0 : index
    %2 = vector.load %arg2[%c0_2, %c0_3, %c0_4] : memref<1x8x32xbf16, #tpu.memory_space<vmem>>, vector<1x8x32xbf16>
    %3 = vector.shape_cast %2 : vector<1x8x32xbf16> to vector<8x32xbf16>
    %c0_5 = arith.constant 0 : index
    %c0_6 = arith.constant 0 : index
    %4 = vector.load %arg3[%c0_5, %c0_6] : memref<32x32xbf16, #tpu.memory_space<vmem>>, vector<32x32xbf16>
    %cst = arith.constant dense<0.000000e+00> : vector<8x32xf32>
    %5 = tpu.matmul %1, %4, %cst {dimension_numbers = #tpu.dot_dimension_numbers<[1], [0], [0], [1], [0, 0, 1, 1], [], []>} : vector<8x32xbf16>, vector<32x32xbf16>, vector<8x32xf32> -> vector<8x32xf32>
    %c0_7 = arith.constant 0 : index
    %c0_8 = arith.constant 0 : index
    %6 = vector.load %arg4[%c0_7, %c0_8] : memref<1x32xf32, #tpu.memory_space<vmem>>, vector<1x32xf32>
    %7 = vector.broadcast %6 : vector<1x32xf32> to vector<8x32xf32>
    %8 = arith.addf %5, %7 : vector<8x32xf32>
    %c0_9 = arith.constant 0 : index
    %c0_10 = arith.constant 0 : index
    %9 = vector.load %arg5[%c0_9, %c0_10] : memref<32x64xbf16, #tpu.memory_space<vmem>>, vector<32x64xbf16>
    %cst_11 = arith.constant dense<0.000000e+00> : vector<8x64xf32>
    %10 = tpu.matmul %3, %9, %cst_11 {dimension_numbers = #tpu.dot_dimension_numbers<[1], [0], [0], [1], [0, 0, 1, 1], [], []>} : vector<8x32xbf16>, vector<32x64xbf16>, vector<8x64xf32> -> vector<8x64xf32>
    %c0_12 = arith.constant 0 : index
    %c0_13 = arith.constant 0 : index
    %11 = vector.load %arg6[%c0_12, %c0_13] : memref<1x64xf32, #tpu.memory_space<vmem>>, vector<1x64xf32>
    %12 = vector.broadcast %11 : vector<1x64xf32> to vector<8x64xf32>
    %13 = arith.addf %10, %12 : vector<8x64xf32>
    %14 = vector.extract_strided_slice %13 {offsets = [0, 0], sizes = [8, 32], strides = [1, 1]} : vector<8x64xf32> to vector<8x32xf32>
    %15 = vector.extract_strided_slice %13 {offsets = [0, 32], sizes = [8, 32], strides = [1, 1]} : vector<8x64xf32> to vector<8x32xf32>
    %16 = vector.extract_strided_slice %8 {offsets = [0, 0], sizes = [8, 8], strides = [1, 1]} : vector<8x32xf32> to vector<8x8xf32>
    %17 = vector.extract_strided_slice %8 {offsets = [0, 8], sizes = [8, 8], strides = [1, 1]} : vector<8x32xf32> to vector<8x8xf32>
    %18 = vector.extract_strided_slice %8 {offsets = [0, 16], sizes = [8, 8], strides = [1, 1]} : vector<8x32xf32> to vector<8x8xf32>
    %19 = vector.extract_strided_slice %8 {offsets = [0, 24], sizes = [8, 8], strides = [1, 1]} : vector<8x32xf32> to vector<8x8xf32>
    %20 = vector.shape_cast %16 : vector<8x8xf32> to vector<1x8x8xf32>
    %21 = vector.shape_cast %17 : vector<8x8xf32> to vector<1x8x8xf32>
    %22 = vector.shape_cast %18 : vector<8x8xf32> to vector<1x8x8xf32>
    %23 = vector.shape_cast %19 : vector<8x8xf32> to vector<1x8x8xf32>
    %24 = tpu.concatenate %20, %21, %22, %23 in 0 : vector<1x8x8xf32>, vector<1x8x8xf32>, vector<1x8x8xf32>, vector<1x8x8xf32> -> vector<4x8x8xf32>
    %25 = arith.truncf %24 : vector<4x8x8xf32> to vector<4x8x8xbf16>
    %26 = vector.extract_strided_slice %14 {offsets = [0, 0], sizes = [8, 8], strides = [1, 1]} : vector<8x32xf32> to vector<8x8xf32>
    %27 = vector.extract_strided_slice %14 {offsets = [0, 8], sizes = [8, 8], strides = [1, 1]} : vector<8x32xf32> to vector<8x8xf32>
    %28 = vector.extract_strided_slice %14 {offsets = [0, 16], sizes = [8, 8], strides = [1, 1]} : vector<8x32xf32> to vector<8x8xf32>
    %29 = vector.extract_strided_slice %14 {offsets = [0, 24], sizes = [8, 8], strides = [1, 1]} : vector<8x32xf32> to vector<8x8xf32>
    %30 = vector.shape_cast %26 : vector<8x8xf32> to vector<1x8x8xf32>
    %31 = vector.shape_cast %27 : vector<8x8xf32> to vector<1x8x8xf32>
    %32 = vector.shape_cast %28 : vector<8x8xf32> to vector<1x8x8xf32>
    %33 = vector.shape_cast %29 : vector<8x8xf32> to vector<1x8x8xf32>
    %34 = tpu.concatenate %30, %31, %32, %33 in 0 : vector<1x8x8xf32>, vector<1x8x8xf32>, vector<1x8x8xf32>, vector<1x8x8xf32> -> vector<4x8x8xf32>
    %35 = arith.truncf %34 : vector<4x8x8xf32> to vector<4x8x8xbf16>
    %36 = vector.extract_strided_slice %15 {offsets = [0, 0], sizes = [8, 8], strides = [1, 1]} : vector<8x32xf32> to vector<8x8xf32>
    %37 = vector.extract_strided_slice %15 {offsets = [0, 8], sizes = [8, 8], strides = [1, 1]} : vector<8x32xf32> to vector<8x8xf32>
    %38 = vector.extract_strided_slice %15 {offsets = [0, 16], sizes = [8, 8], strides = [1, 1]} : vector<8x32xf32> to vector<8x8xf32>
    %39 = vector.extract_strided_slice %15 {offsets = [0, 24], sizes = [8, 8], strides = [1, 1]} : vector<8x32xf32> to vector<8x8xf32>
    %40 = vector.shape_cast %36 : vector<8x8xf32> to vector<1x8x8xf32>
    %41 = vector.shape_cast %37 : vector<8x8xf32> to vector<1x8x8xf32>
    %42 = vector.shape_cast %38 : vector<8x8xf32> to vector<1x8x8xf32>
    %43 = vector.shape_cast %39 : vector<8x8xf32> to vector<1x8x8xf32>
    %44 = tpu.concatenate %40, %41, %42, %43 in 0 : vector<1x8x8xf32>, vector<1x8x8xf32>, vector<1x8x8xf32>, vector<1x8x8xf32> -> vector<4x8x8xf32>
    %45 = arith.truncf %44 : vector<4x8x8xf32> to vector<4x8x8xbf16>
    "tpu.trace_start"() <{level = 10 : i32, message = "hqd,hkd->hqk"}> : () -> ()
    %cst_14 = arith.constant dense<0.000000e+00> : vector<4x8x8xf32>
    %46 = tpu.matmul %25, %35, %cst_14 {dimension_numbers = #tpu.dot_dimension_numbers<[2], [2], [1], [1], [0, 0, 0, 1, 1, 1], [0], [0]>} : vector<4x8x8xbf16>, vector<4x8x8xbf16>, vector<4x8x8xf32> -> vector<4x8x8xf32>
    "tpu.trace_stop"() : () -> ()
    %cst_15 = arith.constant dense<0xFF800000> : vector<4x8xf32>
    %47 = vector.multi_reduction <maximumf>, %46, %cst_15 [2] : vector<4x8x8xf32> to vector<4x8xf32>
    %48 = vector.shape_cast %47 : vector<4x8xf32> to vector<4x8x1xf32>
    %49 = vector.broadcast %48 : vector<4x8x1xf32> to vector<4x8x8xf32>
    %50 = arith.subf %46, %49 : vector<4x8x8xf32>
    %51 = math.exp %50 : vector<4x8x8xf32>
    %cst_16 = arith.constant dense<0.000000e+00> : vector<4x8xf32>
    %52 = vector.multi_reduction <add>, %51, %cst_16 [2] : vector<4x8x8xf32> to vector<4x8xf32>
    %53 = vector.shape_cast %52 : vector<4x8xf32> to vector<4x8x1xf32>
    %54 = tpu.reciprocal %53 {approx = true} : vector<4x8x1xf32> -> vector<4x8x1xf32>
    %55 = vector.broadcast %54 : vector<4x8x1xf32> to vector<4x8x8xf32>
    %56 = arith.mulf %51, %55 : vector<4x8x8xf32>
    %57 = arith.truncf %56 : vector<4x8x8xf32> to vector<4x8x8xbf16>
    "tpu.trace_start"() <{level = 10 : i32, message = "hqk,hkd->hqd"}> : () -> ()
    %cst_17 = arith.constant dense<0.000000e+00> : vector<4x8x8xf32>
    %58 = tpu.matmul %57, %45, %cst_17 {dimension_numbers = #tpu.dot_dimension_numbers<[2], [1], [1], [2], [0, 0, 0, 1, 1, 2], [0], [0]>} : vector<4x8x8xbf16>, vector<4x8x8xbf16>, vector<4x8x8xf32> -> vector<4x8x8xf32>
    "tpu.trace_stop"() : () -> ()
    %59 = vector.extract_strided_slice %58 {offsets = [0, 0, 0], sizes = [1, 8, 8], strides = [1, 1, 1]} : vector<4x8x8xf32> to vector<1x8x8xf32>
    %60 = vector.shape_cast %59 : vector<1x8x8xf32> to vector<8x8xf32>
    %61 = vector.extract_strided_slice %58 {offsets = [1, 0, 0], sizes = [1, 8, 8], strides = [1, 1, 1]} : vector<4x8x8xf32> to vector<1x8x8xf32>
    %62 = vector.shape_cast %61 : vector<1x8x8xf32> to vector<8x8xf32>
    %63 = vector.extract_strided_slice %58 {offsets = [2, 0, 0], sizes = [1, 8, 8], strides = [1, 1, 1]} : vector<4x8x8xf32> to vector<1x8x8xf32>
    %64 = vector.shape_cast %63 : vector<1x8x8xf32> to vector<8x8xf32>
    %65 = vector.extract_strided_slice %58 {offsets = [3, 0, 0], sizes = [1, 8, 8], strides = [1, 1, 1]} : vector<4x8x8xf32> to vector<1x8x8xf32>
    %66 = vector.shape_cast %65 : vector<1x8x8xf32> to vector<8x8xf32>
    %67 = tpu.concatenate %60, %62, %64, %66 in 1 : vector<8x8xf32>, vector<8x8xf32>, vector<8x8xf32>, vector<8x8xf32> -> vector<8x32xf32>
    %68 = arith.truncf %67 : vector<8x32xf32> to vector<8x32xbf16>
    %c0_18 = arith.constant 0 : index
    %c0_19 = arith.constant 0 : index
    %69 = vector.load %arg7[%c0_18, %c0_19] : memref<32x32xbf16, #tpu.memory_space<vmem>>, vector<32x32xbf16>
    %cst_20 = arith.constant dense<0.000000e+00> : vector<8x32xf32>
    %70 = tpu.matmul %68, %69, %cst_20 {dimension_numbers = #tpu.dot_dimension_numbers<[1], [0], [0], [1], [0, 0, 1, 1], [], []>} : vector<8x32xbf16>, vector<32x32xbf16>, vector<8x32xf32> -> vector<8x32xf32>
    %c0_21 = arith.constant 0 : index
    %c0_22 = arith.constant 0 : index
    %71 = vector.load %arg8[%c0_21, %c0_22] : memref<1x32xf32, #tpu.memory_space<vmem>>, vector<1x32xf32>
    %72 = vector.broadcast %71 : vector<1x32xf32> to vector<8x32xf32>
    %73 = arith.addf %70, %72 : vector<8x32xf32>
    %74 = arith.extf %1 : vector<8x32xbf16> to vector<8x32xf32>
    %75 = arith.addf %73, %74 : vector<8x32xf32>
    %c0_23 = arith.constant 0 : index
    %c0_24 = arith.constant 0 : index
    %76 = vector.load %arg9[%c0_23, %c0_24] : memref<1x32xf32, #tpu.memory_space<vmem>>, vector<1x32xf32>
    %c0_25 = arith.constant 0 : index
    %c0_26 = arith.constant 0 : index
    %77 = vector.load %arg10[%c0_25, %c0_26] : memref<1x32xf32, #tpu.memory_space<vmem>>, vector<1x32xf32>
    %cst_27 = arith.constant dense<0.000000e+00> : vector<8xf32>
    %78 = vector.multi_reduction <add>, %75, %cst_27 [1] : vector<8x32xf32> to vector<8xf32>
    %79 = vector.shape_cast %78 : vector<8xf32> to vector<8x1xf32>
    %cst_28 = arith.constant 3.200000e+01 : f32
    %80 = vector.broadcast %cst_28 : f32 to vector<8x1xf32>
    %81 = arith.divf %79, %80 : vector<8x1xf32>
    %82 = vector.broadcast %81 : vector<8x1xf32> to vector<8x32xf32>
    %83 = arith.subf %75, %82 : vector<8x32xf32>
    %84 = arith.mulf %83, %83 : vector<8x32xf32>
    %cst_29 = arith.constant dense<0.000000e+00> : vector<8xf32>
    %85 = vector.multi_reduction <add>, %84, %cst_29 [1] : vector<8x32xf32> to vector<8xf32>
    %86 = vector.shape_cast %85 : vector<8xf32> to vector<8x1xf32>
    %cst_30 = arith.constant 3.200000e+01 : f32
    %87 = vector.broadcast %cst_30 : f32 to vector<8x1xf32>
    %88 = arith.divf %86, %87 : vector<8x1xf32>
    %89 = vector.broadcast %81 : vector<8x1xf32> to vector<8x32xf32>
    %90 = arith.subf %75, %89 : vector<8x32xf32>
    %cst_31 = arith.constant 9.99999974E-6 : f32
    %91 = vector.broadcast %cst_31 : f32 to vector<8x1xf32>
    %92 = arith.addf %88, %91 : vector<8x1xf32>
    %93 = math.rsqrt %92 : vector<8x1xf32>
    %94 = vector.broadcast %93 : vector<8x1xf32> to vector<8x32xf32>
    %95 = arith.mulf %90, %94 : vector<8x32xf32>
    %96 = vector.broadcast %76 : vector<1x32xf32> to vector<8x32xf32>
    %97 = arith.mulf %95, %96 : vector<8x32xf32>
    %98 = vector.broadcast %77 : vector<1x32xf32> to vector<8x32xf32>
    %99 = arith.addf %97, %98 : vector<8x32xf32>
    %100 = arith.truncf %99 : vector<8x32xf32> to vector<8x32xbf16>
    %c0_32 = arith.constant 0 : index
    %c0_33 = arith.constant 0 : index
    %c0_34 = arith.constant 0 : index
    %101 = vector.load %arg11[%c0_32, %c0_33, %c0_34] : memref<1x8x32xbf16, #tpu.memory_space<vmem>>, vector<1x8x32xbf16>
    %102 = vector.shape_cast %101 : vector<1x8x32xbf16> to vector<8x32xbf16>
    %103 = vector.shape_cast %100 : vector<8x32xbf16> to vector<1x8x32xbf16>
    tpu.vector_store %arg11[%c0_32, %c0_33, %c0_34], %103 {strides = array<i32>} : memref<1x8x32xbf16, #tpu.memory_space<vmem>>, vector<1x8x32xbf16>,
    return
  }
  func.func @transform_0(%arg0: i32) -> (i32, i32, i32) {
    %c0_i32 = arith.constant 0 : i32
    %c0_i32_0 = arith.constant 0 : i32
    %c0_i32_1 = arith.constant 0 : i32
    return %arg0, %c0_i32, %c0_i32_0 : i32, i32, i32
  }
  func.func @transform_1(%arg0: i32) -> (i32, i32, i32) {
    %c0_i32 = arith.constant 0 : i32
    %c0_i32_0 = arith.constant 0 : i32
    %c0_i32_1 = arith.constant 0 : i32
    return %arg0, %c0_i32, %c0_i32_0 : i32, i32, i32
  }
  func.func @transform_2(%arg0: i32) -> (i32, i32) {
    %c0_i32 = arith.constant 0 : i32
    %c0_i32_0 = arith.constant 0 : i32
    %c0_i32_1 = arith.constant 0 : i32
    return %c0_i32, %c0_i32_0 : i32, i32
  }
  func.func @transform_3(%arg0: i32) -> (i32, i32) {
    %c0_i32 = arith.constant 0 : i32
    %c0_i32_0 = arith.constant 0 : i32
    %c0_i32_1 = arith.constant 0 : i32
    return %c0_i32, %c0_i32_0 : i32, i32
  }
  func.func @transform_4(%arg0: i32) -> (i32, i32) {
    %c0_i32 = arith.constant 0 : i32
    %c0_i32_0 = arith.constant 0 : i32
    %c0_i32_1 = arith.constant 0 : i32
    return %c0_i32, %c0_i32_0 : i32, i32
  }
  func.func @transform_5(%arg0: i32) -> (i32, i32) {
    %c0_i32 = arith.constant 0 : i32
    %c0_i32_0 = arith.constant 0 : i32
    %c0_i32_1 = arith.constant 0 : i32
    return %c0_i32, %c0_i32_0 : i32, i32
  }
  func.func @transform_6(%arg0: i32) -> (i32, i32) {
    %c0_i32 = arith.constant 0 : i32
    %c0_i32_0 = arith.constant 0 : i32
    %c0_i32_1 = arith.constant 0 : i32
    return %c0_i32, %c0_i32_0 : i32, i32
  }
  func.func @transform_7(%arg0: i32) -> (i32, i32) {
    %c0_i32 = arith.constant 0 : i32
    %c0_i32_0 = arith.constant 0 : i32
    %c0_i32_1 = arith.constant 0 : i32
    return %c0_i32, %c0_i32_0 : i32, i32
  }
  func.func @transform_8(%arg0: i32) -> (i32, i32) {
    %c0_i32 = arith.constant 0 : i32
    %c0_i32_0 = arith.constant 0 : i32
    %c0_i32_1 = arith.constant 0 : i32
    return %c0_i32, %c0_i32_0 : i32, i32
  }
  func.func @transform_9(%arg0: i32) -> (i32, i32) {
    %c0_i32 = arith.constant 0 : i32
    %c0_i32_0 = arith.constant 0 : i32
    %c0_i32_1 = arith.constant 0 : i32
    return %c0_i32, %c0_i32_0 : i32, i32
  }
  func.func @transform_10(%arg0: i32) -> (i32, i32, i32) {
    %c0_i32 = arith.constant 0 : i32
    %c0_i32_0 = arith.constant 0 : i32
    %c0_i32_1 = arith.constant 0 : i32
    return %arg0, %c0_i32, %c0_i32_0 : i32, i32, i32
  }
}

</mosaic_0001>

<bundles_post_ra>
// kernel: seq2seq_transformer_forward.14
= control target key start
LH: loop header
LB: loop body
LE: loop exit
PB: predicated region body
PF: predicated region fallthrough
CT: control target
= control target key end

     0   :  { %v368_v0 = vmov 0.0   ;;  %vm369_vm0 = vmmov 0   ;;  %vm63_vm1 = vcmask 261120   ;;  %vm150_vm2 = vcmask 523264   ;;  %s474_s1 = inlined_call_operand.vmem [shape: bf16[32,64], index: 1, kind: input, shape index: {}]   ;;  %s475_s0 = inlined_call_operand.vmem [shape: bf16[16,32], index: 0, kind: input, shape index: {}]   ;;  %s476_s3 = inlined_call_operand.vmem [shape: bf16[64,32], index: 3, kind: input, shape index: {}]   ;;  %s477_s2 = inlined_call_operand.vmem [shape: f32[1,64], index: 2, kind: input, shape index: {}]   ;;  %s478_s4 = inlined_call_operand.vmem [shape: f32[1,32], index: 4, kind: input, shape index: {}]   ;;  %s479_s5 = inlined_call_operand.vmem [shape: f32[1,32], index: 5, kind: input, shape index: {}]   ;;  %s480_s6 = inlined_call_operand.vmem [shape: f32[1,32], index: 6, kind: input, shape index: {}]   ;;  %s481_s7 = inlined_call_operand.vmem [shape: f32[1,32], index: 7, kind: input, shape index: {}]   ;;  %s482_s8 = inlined_call_operand.vmem [shape: f32[1,32], index: 8, kind: input, shape index: {}]   ;;  %s483_s9 = inlined_call_operand.vmem [shape: bf16[16,32], index: 9, kind: output, shape index: {}]  }
   0x1   :  { %330 = vmatprep.subr.bf16.mxu0 %v368_v0  ;;  %v352_v1 = vld [vmem:[%s474_s1 + $0x8] sm:$0xff]   ;;  %334 = vmatprep.mubr.msk.bf16.mxu0 %vm369_vm0, %v368_v0  ;;  %v353_v2 = vld [vmem:[%s474_s1] sm:$0xff]   ;;  %v355_v4 = vld [vmem:[%s476_s3 + $0x18] sm:$0xff]   ;;  %vm296_vm3 = vcmask 257024  }
   0x2   :  { %338 = vmatprep.subr.bf16.mxu1 %v368_v0  ;;  %346 = vmatprep.mubr.msk.bf16.mxu1 %vm369_vm0, %v368_v0  ;;  %v33_v3 = vld [vmem:[%s475_s0] sm:$0xff]   ;;  %v356_v5 = vld [vmem:[%s476_s3 + $0x10] sm:$0xff]   ;;  %v357_v6 = vld [vmem:[%s476_s3 + $0x8] sm:$0xff]  }
   0x3   :  { %331 = vmatpush3.bf16.msra.mxu0 %v352_v1  ;;  %339 = vmatpush3.bf16.msra.mxu1 %v355_v4  ;;  %v358_v7 = vld [vmem:[%s476_s3] sm:$0xff]   ;;  %v195_v19 = vunpack.c.l.bf16 %v33_v3  ;;  %v196_v24 = vunpack.c.h.bf16 %v33_v3 }
   0x4   :  { %332 = vmatprep.subr.bf16.mxu0 %v368_v0  ;;  %340 = vmatprep.subr.bf16.mxu1 %v368_v0  ;;  %v303_v8 = vld [vmem:[%s477_s2] ss:$0 sm:$0xff] }
   0x5   :  { %v308_v18 = vld [vmem:[%s478_s4] ss:$0 sm:$0xff] }
   0x6   :  { %v314_v48 = vld [vmem:[%s479_s5] ss:$0 sm:$0xff] }
   0x7   :  { %333 = vmatpush3.bf16.msra.mxu0 %v353_v2  ;;  %341 = vmatpush3.bf16.msra.mxu1 %v356_v5  ;;  %v315_v50 = vld [vmem:[%s480_s6] ss:$0 sm:$0xff] }
   0x8   :  { %342 = vmatprep.subr.bf16.mxu1 %v368_v0 }
   0xa   :  { %335 = vmatmul.mubr.msk.bf16.vlgmr.msra.gmra.mxu0 %vm63_vm1, %v33_v3 }
   0xb   :  { %343 = vmatpush3.bf16.msra.mxu1 %v357_v6 }
   0xc   :  { %344 = vmatprep.subr.bf16.mxu1 %v368_v0 }
   0xf   :  { %345 = vmatpush3.bf16.msra.mxu1 %v358_v7 }
  0xca   :  { %v101_v9 = vpop.f32.mrf.mxu0 }
  0xcb   :  { %v102_v11 = vadd.f32 %v303_v8, %v101_v9 }
  0xcc   :  { %v336_v10 = vpop.f32.mrf.mxu0 }
  0xcd   :  { %v108_v15 = vmax.f32 %v102_v11, 0.0 }
  0xce   :  { %v104_v12 = vpop.f32.mrf.mxu0 }
  0xcf   :  { %v105_v13 = vadd.f32 %v303_v8, %v104_v12  ;;  %v316_v12 = vld [vmem:[%s481_s7] ss:$0 sm:$0xff] }
  0xd0   :  { %v337_v14 = vpop.f32.mrf.mxu0 }
  0xd1   :  { %v109_v16 = vmax.f32 %v105_v13, 0.0  ;;  %v317_v14 = vld [vmem:[%s482_s8] ss:$0 sm:$0xff] }
  0xd3   :  { %v110_v17 = vpack.c.bf16 %v109_v16, %v108_v15 }
  0xd5   :  { %347 = vmatmul.mubr.msk.bf16.vlgmr.msra.gmra.mxu1 %vm150_vm2, %v110_v17 }
 0x195   :  { %v188_v20 = vpop.f32.mrf.mxu1 }
 0x196   :  { %v189_v21 = vadd.f32 %v308_v18, %v188_v20 }
 0x197   :  { %v348_v22 = vpop.f32.mrf.mxu1 }
 0x198   :  { %v197_v23 = vadd.f32 %v195_v19, %v189_v21 }
 0x199   :  { %v191_v25 = vpop.f32.mrf.mxu1 }
 0x19a   :  { %v192_v26 = vadd.f32 %v308_v18, %v191_v25  ;;  %v201_v27 = vsel %vm63_vm1, %v197_v23, 0.0 }
 0x19b   :  { %202 = vadd.xlane.f32.xlu0 %v201_v27  ;;  %v349_v28 = vpop.f32.mrf.mxu1 }
 0x19c   :  { %v198_v29 = vadd.f32 %v196_v24, %v192_v26 }
 0x19e   :  { %v204_v30 = vsel %vm63_vm1, %v198_v29, 0.0 }
 0x19f   :  { %205 = vadd.xlane.f32.xlu0 %v204_v30 }
 0x224   :  { %v203_v31 = vpop.xlane.xlu0 %202 }
 0x225   :  { %v208_v32 = vmul.f32 0.03125, %v203_v31 }
 0x227   :  { %v210_v33 = vsub.f32 %v197_v23, %v208_v32 }
 0x228   :  { %v206_v34 = vpop.xlane.xlu0 %205 }
 0x229   :  { %v209_v35 = vmul.f32 0.03125, %v206_v34  ;;  %v212_v36 = vmul.f32 %v210_v33, %v210_v33 }
 0x22b   :  { %v211_v37 = vsub.f32 %v198_v29, %v209_v35  ;;  %v214_v38 = vsel %vm63_vm1, %v212_v36, 0.0 }
 0x22c   :  { %215 = vadd.xlane.f32.xlu1 %v214_v38 }
 0x22d   :  { %v213_v39 = vmul.f32 %v211_v37, %v211_v37 }
 0x22f   :  { %v217_v40 = vsel %vm63_vm1, %v213_v39, 0.0 }
 0x230   :  { %218 = vadd.xlane.f32.xlu1 %v217_v40 }
 0x2b5   :  { %v216_v41 = vpop.xlane.xlu1 %215 }
 0x2b6   :  { %v220_v42 = vmul.f32 0.03125, %v216_v41 }
 0x2b8   :  { %v222_v43 = vadd.f32 1e-05, %v220_v42 }
 0x2b9   :  { %v219_v44 = vpop.xlane.xlu1 %218 }
 0x2ba   :  { %360 = vrsqrt.f32 %v222_v43  ;;  %v221_v45 = vmul.f32 0.03125, %v219_v44 }
 0x2bc   :  { %v223_v46 = vadd.f32 1e-05, %v221_v45 }
 0x2be   :  { %362 = vrsqrt.f32 %v223_v46 }
 0x2c7   :  { %v361_v47 = vpop.eup %360 }
 0x2c8   :  { %v226_v49 = vmul.f32 %v361_v47, %v210_v33 }
 0x2ca   :  { %v234_v51 = vmul.f32 %v314_v48, %v226_v49 }
 0x2cb   :  { %v363_v52 = vpop.eup %362 }
 0x2cc   :  { %v242_v53 = vadd.f32 %v315_v50, %v234_v51  ;;  %v227_v54 = vmul.f32 %v363_v52, %v211_v37 }
 0x2ce   :  { %v246_v55 = vsel %vm63_vm1, %v242_v53, 0.0  ;;  %v235_v56 = vmul.f32 %v314_v48, %v227_v54 }
 0x2cf   :  { %247 = vadd.xlane.f32.xlu0 %v246_v55 }
 0x2d0   :  { %v243_v57 = vadd.f32 %v315_v50, %v235_v56 }
 0x2d2   :  { %v249_v58 = vsel %vm63_vm1, %v243_v57, 0.0 }
 0x2d3   :  { %250 = vadd.xlane.f32.xlu1 %v249_v58 }
 0x358   :  { %v248_v59 = vpop.xlane.xlu0 %247 }
 0x359   :  { %v252_v60 = vmul.f32 0.03125, %v248_v59 }
 0x35b   :  { %v254_v61 = vsub.f32 %v242_v53, %v252_v60 }
 0x35c   :  { %v251_v62 = vpop.xlane.xlu1 %250 }
 0x35d   :  { %v253_v63 = vmul.f32 0.03125, %v251_v62  ;;  %v256_v0 = vmul.f32 %v254_v61, %v254_v61 }
 0x35f   :  { %v255_v1 = vsub.f32 %v243_v57, %v253_v63  ;;  %v258_v2 = vsel %vm63_vm1, %v256_v0, 0.0 }
 0x360   :  { %259 = vadd.xlane.f32.xlu0 %v258_v2 }
 0x361   :  { %v257_v3 = vmul.f32 %v255_v1, %v255_v1 }
 0x363   :  { %v261_v4 = vsel %vm63_vm1, %v257_v3, 0.0 }
 0x364   :  { %262 = vadd.xlane.f32.xlu1 %v261_v4 }
 0x3e9   :  { %v260_v5 = vpop.xlane.xlu0 %259 }
 0x3ea   :  { %v264_v6 = vmul.f32 0.03125, %v260_v5 }
 0x3ec   :  { %v266_v7 = vadd.f32 1e-05, %v264_v6 }
 0x3ed   :  { %v263_v8 = vpop.xlane.xlu1 %262 }
 0x3ee   :  { %364 = vrsqrt.f32 %v266_v7  ;;  %v265_v9 = vmul.f32 0.03125, %v263_v8 }
 0x3f0   :  { %v267_v10 = vadd.f32 1e-05, %v265_v9 }
 0x3f2   :  { %366 = vrsqrt.f32 %v267_v10 }
 0x3fb   :  { %v365_v11 = vpop.eup %364 }
 0x3fc   :  { %v270_v13 = vmul.f32 %v365_v11, %v254_v61 }
 0x3fe   :  { %v278_v15 = vmul.f32 %v316_v12, %v270_v13 }
 0x3ff   :  { %v367_v16 = vpop.eup %366 }
 0x400   :  { %v286_v17 = vadd.f32 %v317_v14, %v278_v15  ;;  %v271_v18 = vmul.f32 %v367_v16, %v255_v1 }
 0x402   :  { %v320_v19 = vpack.c.bf16 %v286_v17, %v286_v17  ;;  %v279_v20 = vmul.f32 %v316_v12, %v271_v18 }
 0x404   :  { %297 = vst.msk [vmem:[%s483_s9] sm:$0xf] %vm296_vm3, %v320_v19  ;;  %v287_v21 = vadd.f32 %v317_v14, %v279_v20 }
 0x406   :  { %v321_v22 = vpack.c.bf16 %v287_v21, %v287_v21 }
 0x408   :  { %298 = vst.msk [vmem:[%s483_s9 + $0x4] sm:$0xf] %vm296_vm3, %v321_v22 }

// kernel: seq2seq_transformer_forward.12
= control target key start
LH: loop header
LB: loop body
LE: loop exit
PB: predicated region body
PF: predicated region fallthrough
CT: control target
= control target key end

     0   :  { %v312_v0 = vmov 0.0   ;;  %vm313_vm0 = vmmov 0   ;;  %vm57_vm1 = vcmask 261120   ;;  %vm144_vm2 = vcmask 523264   ;;  %s398_s1 = inlined_call_operand.vmem [shape: bf16[32,64], index: 1, kind: input, shape index: {}]   ;;  %s399_s0 = inlined_call_operand.vmem [shape: bf16[16,32], index: 0, kind: input, shape index: {}]   ;;  %s400_s3 = inlined_call_operand.vmem [shape: bf16[64,32], index: 3, kind: input, shape index: {}]   ;;  %s401_s2 = inlined_call_operand.vmem [shape: f32[1,64], index: 2, kind: input, shape index: {}]   ;;  %s402_s4 = inlined_call_operand.vmem [shape: f32[1,32], index: 4, kind: input, shape index: {}]   ;;  %s403_s5 = inlined_call_operand.vmem [shape: f32[1,32], index: 5, kind: input, shape index: {}]   ;;  %s404_s6 = inlined_call_operand.vmem [shape: f32[1,32], index: 6, kind: input, shape index: {}]   ;;  %s405_s7 = inlined_call_operand.vmem [shape: bf16[16,32], index: 7, kind: output, shape index: {}]  }
   0x1   :  { %278 = vmatprep.subr.bf16.mxu0 %v312_v0  ;;  %v300_v1 = vld [vmem:[%s398_s1 + $0x8] sm:$0xff]   ;;  %282 = vmatprep.mubr.msk.bf16.mxu0 %vm313_vm0, %v312_v0  ;;  %v301_v2 = vld [vmem:[%s398_s1] sm:$0xff]   ;;  %v303_v4 = vld [vmem:[%s400_s3 + $0x18] sm:$0xff]   ;;  %vm246_vm3 = vcmask 257024  }
   0x2   :  { %286 = vmatprep.subr.bf16.mxu1 %v312_v0  ;;  %294 = vmatprep.mubr.msk.bf16.mxu1 %vm313_vm0, %v312_v0  ;;  %v27_v3 = vld [vmem:[%s399_s0] sm:$0xff]   ;;  %v304_v5 = vld [vmem:[%s400_s3 + $0x10] sm:$0xff]   ;;  %v305_v6 = vld [vmem:[%s400_s3 + $0x8] sm:$0xff]  }
   0x3   :  { %279 = vmatpush3.bf16.msra.mxu0 %v300_v1  ;;  %287 = vmatpush3.bf16.msra.mxu1 %v303_v4  ;;  %v306_v7 = vld [vmem:[%s400_s3] sm:$0xff]   ;;  %v189_v19 = vunpack.c.l.bf16 %v27_v3  ;;  %v190_v24 = vunpack.c.h.bf16 %v27_v3 }
   0x4   :  { %280 = vmatprep.subr.bf16.mxu0 %v312_v0  ;;  %288 = vmatprep.subr.bf16.mxu1 %v312_v0  ;;  %v253_v8 = vld [vmem:[%s401_s2] ss:$0 sm:$0xff] }
   0x5   :  { %v258_v18 = vld [vmem:[%s402_s4] ss:$0 sm:$0xff] }
   0x6   :  { %v264_v48 = vld [vmem:[%s403_s5] ss:$0 sm:$0xff] }
   0x7   :  { %281 = vmatpush3.bf16.msra.mxu0 %v301_v2  ;;  %289 = vmatpush3.bf16.msra.mxu1 %v304_v5  ;;  %v265_v50 = vld [vmem:[%s404_s6] ss:$0 sm:$0xff] }
   0x8   :  { %290 = vmatprep.subr.bf16.mxu1 %v312_v0 }
   0xa   :  { %283 = vmatmul.mubr.msk.bf16.vlgmr.msra.gmra.mxu0 %vm57_vm1, %v27_v3 }
   0xb   :  { %291 = vmatpush3.bf16.msra.mxu1 %v305_v6 }
   0xc   :  { %292 = vmatprep.subr.bf16.mxu1 %v312_v0 }
   0xf   :  { %293 = vmatpush3.bf16.msra.mxu1 %v306_v7 }
  0xca   :  { %v95_v9 = vpop.f32.mrf.mxu0 }
  0xcb   :  { %v96_v11 = vadd.f32 %v253_v8, %v95_v9 }
  0xcc   :  { %v284_v10 = vpop.f32.mrf.mxu0 }
  0xcd   :  { %v102_v15 = vmax.f32 %v96_v11, 0.0 }
  0xce   :  { %v98_v12 = vpop.f32.mrf.mxu0 }
  0xcf   :  { %v99_v13 = vadd.f32 %v253_v8, %v98_v12 }
  0xd0   :  { %v285_v14 = vpop.f32.mrf.mxu0 }
  0xd1   :  { %v103_v16 = vmax.f32 %v99_v13, 0.0 }
  0xd3   :  { %v104_v17 = vpack.c.bf16 %v103_v16, %v102_v15 }
  0xd5   :  { %295 = vmatmul.mubr.msk.bf16.vlgmr.msra.gmra.mxu1 %vm144_vm2, %v104_v17 }
 0x195   :  { %v182_v20 = vpop.f32.mrf.mxu1 }
 0x196   :  { %v183_v21 = vadd.f32 %v258_v18, %v182_v20 }
 0x197   :  { %v296_v22 = vpop.f32.mrf.mxu1 }
 0x198   :  { %v191_v23 = vadd.f32 %v189_v19, %v183_v21 }
 0x199   :  { %v185_v25 = vpop.f32.mrf.mxu1 }
 0x19a   :  { %v186_v26 = vadd.f32 %v258_v18, %v185_v25  ;;  %v195_v27 = vsel %vm57_vm1, %v191_v23, 0.0 }
 0x19b   :  { %196 = vadd.xlane.f32.xlu0 %v195_v27  ;;  %v297_v28 = vpop.f32.mrf.mxu1 }
 0x19c   :  { %v192_v29 = vadd.f32 %v190_v24, %v186_v26 }
 0x19e   :  { %v198_v30 = vsel %vm57_vm1, %v192_v29, 0.0 }
 0x19f   :  { %199 = vadd.xlane.f32.xlu0 %v198_v30 }
 0x224   :  { %v197_v31 = vpop.xlane.xlu0 %196 }
 0x225   :  { %v202_v32 = vmul.f32 0.03125, %v197_v31 }
 0x227   :  { %v204_v33 = vsub.f32 %v191_v23, %v202_v32 }
 0x228   :  { %v200_v34 = vpop.xlane.xlu0 %199 }
 0x229   :  { %v203_v35 = vmul.f32 0.03125, %v200_v34  ;;  %v206_v36 = vmul.f32 %v204_v33, %v204_v33 }
 0x22b   :  { %v205_v37 = vsub.f32 %v192_v29, %v203_v35  ;;  %v208_v38 = vsel %vm57_vm1, %v206_v36, 0.0 }
 0x22c   :  { %209 = vadd.xlane.f32.xlu1 %v208_v38 }
 0x22d   :  { %v207_v39 = vmul.f32 %v205_v37, %v205_v37 }
 0x22f   :  { %v211_v40 = vsel %vm57_vm1, %v207_v39, 0.0 }
 0x230   :  { %212 = vadd.xlane.f32.xlu1 %v211_v40 }
 0x2b5   :  { %v210_v41 = vpop.xlane.xlu1 %209 }
 0x2b6   :  { %v214_v42 = vmul.f32 0.03125, %v210_v41 }
 0x2b8   :  { %v216_v43 = vadd.f32 1e-05, %v214_v42 }
 0x2b9   :  { %v213_v44 = vpop.xlane.xlu1 %212 }
 0x2ba   :  { %308 = vrsqrt.f32 %v216_v43  ;;  %v215_v45 = vmul.f32 0.03125, %v213_v44 }
 0x2bc   :  { %v217_v46 = vadd.f32 1e-05, %v215_v45 }
 0x2be   :  { %310 = vrsqrt.f32 %v217_v46 }
 0x2c7   :  { %v309_v47 = vpop.eup %308 }
 0x2c8   :  { %v220_v49 = vmul.f32 %v309_v47, %v204_v33 }
 0x2ca   :  { %v228_v51 = vmul.f32 %v264_v48, %v220_v49 }
 0x2cb   :  { %v311_v52 = vpop.eup %310 }
 0x2cc   :  { %v236_v53 = vadd.f32 %v265_v50, %v228_v51  ;;  %v221_v54 = vmul.f32 %v311_v52, %v205_v37 }
 0x2ce   :  { %v268_v55 = vpack.c.bf16 %v236_v53, %v236_v53  ;;  %v229_v56 = vmul.f32 %v264_v48, %v221_v54 }
 0x2d0   :  { %247 = vst.msk [vmem:[%s405_s7] sm:$0xf] %vm246_vm3, %v268_v55  ;;  %v237_v57 = vadd.f32 %v265_v50, %v229_v56 }
 0x2d2   :  { %v269_v58 = vpack.c.bf16 %v237_v57, %v237_v57 }
 0x2d4   :  { %248 = vst.msk [vmem:[%s405_s7 + $0x4] sm:$0xf] %vm246_vm3, %v269_v58 }

// kernel: seq2seq_transformer_forward.11
= control target key start
LH: loop header
LB: loop body
LE: loop exit
PB: predicated region body
PF: predicated region fallthrough
CT: control target
= control target key end

     0   :  { %s1178_s24 = smov 0   ;;  %s1310_s0 = inlined_call_operand.vmem [shape: bf16[2,8,32], index: 0, kind: input, shape index: {}]   ;;  %s1311_s1 = inlined_call_operand.vmem [shape: bf16[32,96], index: 1, kind: input, shape index: {}]   ;;  %s1312_s2 = inlined_call_operand.vmem [shape: f32[1,96], index: 2, kind: input, shape index: {}]   ;;  %s1313_s3 = inlined_call_operand.vmem [shape: bf16[32,32], index: 3, kind: input, shape index: {}]   ;;  %s1314_s4 = inlined_call_operand.vmem [shape: f32[1,32], index: 4, kind: input, shape index: {}]   ;;  %s1315_s5 = inlined_call_operand.vmem [shape: f32[1,32], index: 5, kind: input, shape index: {}]   ;;  %s1316_s6 = inlined_call_operand.vmem [shape: f32[1,32], index: 6, kind: input, shape index: {}]   ;;  %s1317_s7 = inlined_call_operand.vmem [shape: bf16[2,8,32], index: 7, kind: output, shape index: {}]  }
   0x1 LB: > { %s967_s25 = sadd.s32 4294967295, %s1126_s24   ;;  %p971_p0 = scmp.ge.s32.totalorder %s1126_s24, 1  ;;  %s1126_s24 = sphi %s1178_s24, %s17_s24  }
   0x2   : > { %p236_p1 = scmp.lt.s32.totalorder %s1126_s24, 3 }
   0x4   : > { %p237_p2 = pnand %p971_p0, %p236_p1 }
   0x5   : > { %p266_p3 = scmp.lt.s32.totalorder (!%p237_p2), %s967_s25, 1  ;;  %s1130_s13 = smov (!%p237_p2), 104  }
   0x6   : > { %240 = sbr.rel (%p237_p2) target bundleno = 1789 (0x6fd), region = 48  ;;  %s1131_s14 = smov (!%p237_p2), 120  }
   0x7   : > { %s1132_s15 = smov (!%p237_p2), 112   ;;  %s1133_s16 = smov (!%p237_p2), 96  }
   0x8   : > { %s1134_s17 = smov (!%p237_p2), 64   ;;  %s1135_s22 = smov (!%p237_p2), 8  }
   0x9   : > { %s1136_s23 = smov (!%p237_p2), 16   ;;  %s1137_s26 = smov (!%p237_p2), 24  }
   0xb   : > { %v1098_v0 = vld [vmem:[%s1311_s1 + $0x8] sm:$0xff]   ;;  %v1128_v1 = vmov 0.0   ;;  %v1099_v2 = vld [vmem:[%s1311_s1] sm:$0xff]   ;;  %vm1129_vm0 = vmmov 0   ;;  %s1319_s25 = smov (!%p266_p3, %s967_s25), 1  ;;  %vm299_vm1 = vcmask 261120  }
   0xc   : > { %1016 = vmatprep.subr.bf16.mxu0 %v1128_v1  ;;  %1024 = vmatprep.subr.bf16.mxu1 %v1128_v1  ;;  %s972_s30 = sshll.u32 %s1319_s25, 2  ;;  %v974_v4 = vld [vmem:[%s1312_s2] ss:$0 sm:$0xff]  ;;  %vm360_vm2 = vcmask 64512   ;;  %vm607_vm3 = vcmask 1043456   ;;  %vm808_vm4 = vcmask 130048  }
   0xd   : > { %1017 = vmatpush3.bf16.msra.mxu0 %v1098_v0  ;;  %1020 = vmatprep.mubr.msk.bf16.mxu0 %vm1129_vm0, %v1128_v1  ;;  %s269_s10 = scalar_lea.vmem %s1310_s0, %s972_s30  ;;  %vm810_vm5 = vcmask 195584   ;;  %vm912_vm6 = vcmask 257024  }
   0xe   : > { %1018 = vmatprep.subr.bf16.mxu0 %v1128_v1  ;;  %1026 = vmatprep.mubr.msk.bf16.mxu1 %vm1129_vm0, %v1128_v1  ;;  %v1208_v3 = vld [vmem:[%s269_s10] sm:$0xf] }
  0x11   : > { %1019 = vmatpush3.bf16.msra.mxu0 %v1099_v2 }
  0x12   : > { %1030 = vmatprep.subr.bf16.mxu0 %v1128_v1 }
  0x14   : > { %1021 = vmatmul.mubr.msk.bf16.vlgmr.msra.gmra.mxu0 %vm299_vm1, %v1208_v3 }
  0x15   : > { %1032 = vmatprep.mubr.msk.bf16.mxu0 %vm1129_vm0, %v1128_v1 }
  0xd4   : > { %v337_v5 = vpop.f32.mrf.mxu0 }
  0xd5   : > { %v338_v6 = vadd.f32 %v974_v4, %v337_v5 }
  0xd6   : > { %v1022_v7 = vpop.f32.mrf.mxu0 }
  0xd7   : > { %350 = vrot.lane.b32.xlu1 %v338_v6, %s1130_s13  ;;  %344 = vrot.lane.b32.xlu0 %v338_v6, %s1131_s14  ;;  %v1217_v9 = vpack.c.bf16 %v338_v6, %v338_v6  ;;  %s273_s13 = scalar_lea.vmem %s1317_s7, %s972_s30 }
  0xd8   : > { %v340_v8 = vpop.f32.mrf.mxu0 }
  0xda   : > { %v1023_v10 = vpop.f32.mrf.mxu0 }
  0xdb   : > { %347 = vrot.lane.b32.xlu0 %v338_v6, %s1132_s15  ;;  %358 = vrot.lane.b32.xlu1 %v1217_v9, %s1133_s16 }
 0x149   : > { %v351_v11 = vpop.permute.xlu1 %350  ;;  %v345_v12 = vpop.permute.xlu0 %344 }
 0x14a   : > { %v354_v13 = vpack.c.bf16 %v345_v12, %v345_v12  ;;  %v1220_v16 = vpack.c.bf16 %v351_v11, %v351_v11 }
 0x14c   : > { %408 = vrot.lane.b32.xlu0 %v354_v13, %s1133_s16 }
 0x14d   : > { %v348_v14 = vpop.permute.xlu0 %347  ;;  %v359_v15 = vpop.permute.xlu1 %358 }
 0x14e   : > { %v1222_v17 = vpack.c.bf16 %v348_v14, %v348_v14  ;;  %v365_v18 = vsel %vm360_vm2, %v359_v15, 0 }
 0x14f   : > { %1025 = vmatpush3.bf16.xpose.msra.mxu1 %v365_v18 }
 0x150   : > { %506 = vrot.lane.b32.xlu0 %v1220_v16, %s1133_s16  ;;  %457 = vrot.lane.b32.xlu1 %v1222_v17, %s1133_s16 }
 0x151   : > { %1036 = vmatprep.subr.bf16.mxu1 %v1128_v1 }
 0x156   : > { %1027 = vmatmul.mubr.msk.bf16.vlgmr.msra.gmra.mxu1 %vm360_vm2, %v1217_v9 }
 0x157   : > { %1038 = vmatprep.mubr.msk.bf16.mxu1 %vm1129_vm0, %v1128_v1 }
 0x1be   : > { %v409_v19 = vpop.permute.xlu0 %408 }
 0x1bf   : > { %v414_v20 = vsel %vm360_vm2, %v409_v19, 0 }
 0x1c0   : > { %1031 = vmatpush3.bf16.xpose.msra.mxu0 %v414_v20 }
 0x1c1   : > { %1042 = vmatprep.subr.bf16.mxu0 %v1128_v1 }
 0x1c2   : > { %v458_v21 = vpop.permute.xlu1 %457  ;;  %v507_v23 = vpop.permute.xlu0 %506 }
 0x1c3   : > { %v463_v22 = vsel %vm360_vm2, %v458_v21, 0  ;;  %v512_v24 = vsel %vm360_vm2, %v507_v23, 0 }
 0x1c4   : > { %1037 = vmatpush3.bf16.xpose.msra.mxu1 %v463_v22 }
 0x1c5   : > { %1048 = vmatprep.subr.bf16.mxu1 %v1128_v1 }
 0x1c7   : > { %1033 = vmatmul.mubr.msk.bf16.vlgmr.msra.gmra.mxu0 %vm360_vm2, %v354_v13 }
 0x1c8   : > { %1043 = vmatpush3.bf16.xpose.msra.mxu0 %v512_v24  ;;  %1044 = vmatprep.mubr.msk.bf16.mxu0 %vm1129_vm0, %v1128_v1 }
 0x1c9   : > { %1054 = vmatprep.subr.bf16.mxu0 %v1128_v1 }
 0x1cb   : > { %1039 = vmatmul.mubr.msk.bf16.vlgmr.msra.gmra.mxu1 %vm360_vm2, %v1222_v17 }
 0x1cc   : > { %1050 = vmatprep.mubr.msk.bf16.mxu1 %vm1129_vm0, %v1128_v1 }
 0x1cf   : > { %1045 = vmatmul.mubr.msk.bf16.vlgmr.msra.gmra.mxu0 %vm360_vm2, %v1220_v16 }
 0x1d0   : > { %1056 = vmatprep.mubr.msk.bf16.mxu0 %vm1129_vm0, %v1128_v1 }
 0x216   : > { %v401_v25 = vpop.f32.mrf.mxu1 }
 0x217   : > { %v554_v26 = vsel %vm360_vm2, %v401_v25, -inf }
 0x218   : > { %555 = vmax.xlane.f32.xlu1 %v554_v26  ;;  %v1028_v27 = vpop.f32.mrf.mxu1 }
 0x21a   : > { %v404_v28 = vpop.f32.mrf.mxu1 }
 0x21c   : > { %v1029_v29 = vpop.f32.mrf.mxu1 }
 0x287   : > { %v450_v30 = vpop.f32.mrf.mxu0 }
 0x288   : > { %v557_v31 = vsel %vm360_vm2, %v450_v30, -inf }
 0x289   : > { %558 = vmax.xlane.f32.xlu0 %v557_v31  ;;  %v1034_v32 = vpop.f32.mrf.mxu0  ;;  %v1100_v31 = vld [vmem:[%s1313_s3 + $0x8] sm:$0xff]  }
 0x28a   : > { %v1101_v32 = vld [vmem:[%s1313_s3] sm:$0xff]  }
 0x28b   : > { %v453_v33 = vpop.f32.mrf.mxu0  ;;  %v499_v34 = vpop.f32.mrf.mxu1 }
 0x28c   : > { %v560_v35 = vsel %vm360_vm2, %v499_v34, -inf }
 0x28d   : > { %v1040_v36 = vpop.f32.mrf.mxu1  ;;  %561 = vmax.xlane.f32.xlu0 %v560_v35  ;;  %v1035_v37 = vpop.f32.mrf.mxu0 }
 0x28f   : > { %v502_v38 = vpop.f32.mrf.mxu1  ;;  %v548_v39 = vpop.f32.mrf.mxu0 }
 0x290   : > { %v563_v40 = vsel %vm360_vm2, %v548_v39, -inf }
 0x291   : > { %v1041_v41 = vpop.f32.mrf.mxu1  ;;  %564 = vmax.xlane.f32.xlu1 %v563_v40  ;;  %v1046_v42 = vpop.f32.mrf.mxu0 }
 0x293   : > { %v551_v43 = vpop.f32.mrf.mxu0 }
 0x295   : > { %v1047_v44 = vpop.f32.mrf.mxu0 }
 0x2a1   : > { %v556_v45 = vpop.xlane.xlu1 %555 }
 0x2a2   : > { %651 = vrot.lane.b32.xlu1 %v354_v13, %s1134_s17  ;;  %v566_v46 = vsub.f32 %v401_v25, %v556_v45 }
 0x2a3   : > { %602 = vrot.lane.b32.xlu0 %v1217_v9, %s1134_s17 }
 0x2a4   : > { %v570_v47 = vmul.f32 1.442695, %v566_v46 }
 0x2a6   : > { %1102 = vpow2.f32 %v570_v47 }
 0x2b3   : > { %v1103_v48 = vpop.eup %1102 }
 0x2b4   : > { %v578_v49 = vsel %vm360_vm2, %v1103_v48, 0.0 }
 0x2c2   : > { %579 = vadd.xlane.f32.xlu0 %v578_v49 }
 0x312   : > { %v559_v50 = vpop.xlane.xlu0 %558 }
 0x313   : > { %v567_v51 = vsub.f32 %v450_v30, %v559_v50 }
 0x315   : > { %v572_v52 = vmul.f32 1.442695, %v567_v51  ;;  %v986_v51 = vld [vmem:[%s1314_s4] ss:$0 sm:$0xff] }
 0x316   : > { %v562_v53 = vpop.xlane.xlu0 %561 }
 0x317   : > { %1104 = vpow2.f32 %v572_v52  ;;  %v568_v54 = vsub.f32 %v499_v34, %v562_v53  ;;  %v879_v52 = vunpack.c.l.bf16 %v1208_v3 }
 0x319   : > { %v574_v55 = vmul.f32 1.442695, %v568_v54 }
 0x31a   : > { %v603_v56 = vpop.permute.xlu0 %602  ;;  %v565_v57 = vpop.xlane.xlu1 %564 }
 0x31b   : > { %1106 = vpow2.f32 %v574_v55  ;;  %v609_v58 = vsel %vm607_vm3, %v603_v56, 0  ;;  %v569_v59 = vsub.f32 %v548_v39, %v565_v57 }
 0x31c   : > { %1049 = vmatpush3.bf16.msra.mxu1 %v609_v58 }
 0x31d   : > { %v576_v60 = vmul.f32 1.442695, %v569_v59  ;;  %1060 = vmatprep.subr.bf16.mxu1 %v1128_v1 }
 0x31e   : > { %v652_v61 = vpop.permute.xlu1 %651 }
 0x31f   : > { %1108 = vpow2.f32 %v576_v60  ;;  %v657_v62 = vsel %vm607_vm3, %v652_v61, 0 }
 0x320   : > { %1055 = vmatpush3.bf16.msra.mxu0 %v657_v62 }
 0x321   : > { %1066 = vmatprep.subr.bf16.mxu0 %v1128_v1 }
 0x324   : > { %v1105_v63 = vpop.eup %1104 }
 0x325   : > { %v581_v0 = vsel %vm360_vm2, %v1105_v63, 0.0 }
 0x326   : > { %582 = vadd.xlane.f32.xlu1 %v581_v0 }
 0x328   : > { %v1107_v2 = vpop.eup %1106 }
 0x329   : > { %v584_v4 = vsel %vm360_vm2, %v1107_v2, 0.0 }
 0x32a   : > { %585 = vadd.xlane.f32.xlu0 %v584_v4 }
 0x32c   : > { %v1109_v5 = vpop.eup %1108 }
 0x32d   : > { %v587_v6 = vsel %vm360_vm2, %v1109_v5, 0.0 }
 0x32e   : > { %588 = vadd.xlane.f32.xlu1 %v587_v6  ;;  %v990_v6 = vld [vmem:[%s1315_s5] ss:$0 sm:$0xff] }
 0x33f   : > { %699 = vrot.lane.b32.xlu1 %v1222_v17, %s1134_s17 }
 0x340   : > { %747 = vrot.lane.b32.xlu0 %v1220_v16, %s1134_s17 }
 0x34b   : > { %v580_v7 = vpop.xlane.xlu0 %579 }
 0x34c   : > { %1110 = vrcp.f32 %v580_v7 }
 0x359   : > { %v1111_v8 = vpop.eup %1110 }
 0x35a   : > { %v594_v9 = vmul.f32 %v1111_v8, %v1103_v48  ;;  %v991_v8 = vld [vmem:[%s1316_s6] ss:$0 sm:$0xff] }
 0x35c   : > { %v598_v10 = vpack.c.bf16 %v594_v9, %v594_v9 }
 0x35e   : > { %1051 = vmatmul.mubr.msk.bf16.vlgmr.msra.gmra.mxu1 %vm360_vm2, %v598_v10 }
 0x35f   : > { %1062 = vmatprep.mubr.msk.bf16.mxu1 %vm1129_vm0, %v1128_v1 }
 0x3af   : > { %v583_v11 = vpop.xlane.xlu1 %582 }
 0x3b0   : > { %1112 = vrcp.f32 %v583_v11 }
 0x3b3   : > { %v586_v12 = vpop.xlane.xlu0 %585 }
 0x3b4   : > { %1114 = vrcp.f32 %v586_v12 }
 0x3b7   : > { %v589_v13 = vpop.xlane.xlu1 %588  ;;  %v748_v18 = vpop.permute.xlu0 %747 }
 0x3b8   : > { %1116 = vrcp.f32 %v589_v13  ;;  %v753_v21 = vsel %vm607_vm3, %v748_v18, 0 }
 0x3bb   : > { %v700_v14 = vpop.permute.xlu1 %699 }
 0x3bc   : > { %v705_v15 = vsel %vm607_vm3, %v700_v14, 0 }
 0x3bd   : > { %v1113_v16 = vpop.eup %1112  ;;  %1061 = vmatpush3.bf16.msra.mxu1 %v705_v15 }
 0x3be   : > { %v595_v17 = vmul.f32 %v1113_v16, %v1105_v63  ;;  %1072 = vmatprep.subr.bf16.mxu1 %v1128_v1 }
 0x3c0   : > { %v599_v19 = vpack.c.bf16 %v595_v17, %v595_v17 }
 0x3c1   : > { %v1115_v20 = vpop.eup %1114 }
 0x3c2   : > { %1057 = vmatmul.mubr.msk.bf16.vlgmr.msra.gmra.mxu0 %vm360_vm2, %v599_v19  ;;  %v596_v22 = vmul.f32 %v1115_v20, %v1107_v2 }
 0x3c3   : > { %1067 = vmatpush3.bf16.msra.mxu0 %v753_v21  ;;  %1068 = vmatprep.mubr.msk.bf16.mxu0 %vm1129_vm0, %v1128_v1 }
 0x3c4   : > { %v600_v23 = vpack.c.bf16 %v596_v22, %v596_v22 }
 0x3c5   : > { %v1117_v24 = vpop.eup %1116 }
 0x3c6   : > { %1063 = vmatmul.mubr.msk.bf16.vlgmr.msra.gmra.mxu1 %vm360_vm2, %v600_v23  ;;  %v597_v25 = vmul.f32 %v1117_v24, %v1109_v5 }
 0x3c7   : > { %1076 = vmatprep.mubr.msk.bf16.mxu1 %vm1129_vm0, %v1128_v1  ;;  %1073 = vmatpush3.bf16.msra.mxu1 %v1100_v31 }
 0x3c8   : > { %v601_v26 = vpack.c.bf16 %v597_v25, %v597_v25  ;;  %1074 = vmatprep.subr.bf16.mxu1 %v1128_v1 }
 0x3ca   : > { %1069 = vmatmul.mubr.msk.bf16.vlgmr.msra.gmra.mxu0 %vm360_vm2, %v601_v26 }
 0x3cb   : > { %1075 = vmatpush3.bf16.msra.mxu1 %v1101_v32 }
 0x41e   : > { %v645_v27 = vpop.f32.mrf.mxu1 }
 0x420   : > { %v1052_v28 = vpop.f32.mrf.mxu1 }
 0x422   : > { %v648_v29 = vpop.f32.mrf.mxu1 }
 0x424   : > { %v1053_v30 = vpop.f32.mrf.mxu1 }
 0x482   : > { %v693_v33 = vpop.f32.mrf.mxu0 }
 0x483   : > { %796 = vrot.lane.b32.xlu1 %v693_v33, %s1135_s22 }
 0x484   : > { %v1058_v34 = vpop.f32.mrf.mxu0 }
 0x486   : > { %v696_v35 = vpop.f32.mrf.mxu0  ;;  %v741_v36 = vpop.f32.mrf.mxu1 }
 0x487   : > { %800 = vrot.lane.b32.xlu0 %v741_v36, %s1136_s23 }
 0x488   : > { %v1059_v37 = vpop.f32.mrf.mxu0  ;;  %v1064_v38 = vpop.f32.mrf.mxu1 }
 0x48a   : > { %v744_v39 = vpop.f32.mrf.mxu1  ;;  %v789_v40 = vpop.f32.mrf.mxu0 }
 0x48b   : > { %804 = vrot.lane.b32.xlu1 %v789_v40, %s1137_s26 }
 0x48c   : > { %v1065_v1 = vpop.f32.mrf.mxu1  ;;  %v1070_v41 = vpop.f32.mrf.mxu0 }
 0x48e   : > { %v792_v42 = vpop.f32.mrf.mxu0 }
 0x490   : > { %v1071_v43 = vpop.f32.mrf.mxu0 }
 0x4f5   : > { %v797_v44 = vpop.permute.xlu1 %796 }
 0x4f6   : > { %v807_v46 = vsel %vm360_vm2, %v645_v27, %v797_v44 }
 0x4f9   : > { %v801_v45 = vpop.permute.xlu0 %800 }
 0x4fa   : > { %v809_v47 = vsel %vm808_vm4, %v807_v46, %v801_v45 }
 0x4fd   : > { %v805_v48 = vpop.permute.xlu1 %804 }
 0x4fe   : > { %v811_v49 = vsel %vm810_vm5, %v809_v47, %v805_v48 }
 0x4ff   : > { %v812_v50 = vpack.c.bf16 %v811_v49, %v811_v49 }
 0x501   : > { %1077 = vmatmul.mubr.msk.bf16.vlgmr.msra.gmra.mxu1 %vm299_vm1, %v812_v50 }
 0x5c1   : > { %v873_v53 = vpop.f32.mrf.mxu1 }
 0x5c2   : > { %v874_v54 = vadd.f32 %v986_v51, %v873_v53 }
 0x5c3   : > { %v1078_v55 = vpop.f32.mrf.mxu1 }
 0x5c4   : > { %v880_v56 = vadd.f32 %v879_v52, %v874_v54 }
 0x5c5   : > { %v876_v57 = vpop.f32.mrf.mxu1 }
 0x5c6   : > { %v883_v58 = vsel %vm299_vm1, %v880_v56, 0.0 }
 0x5c7   : > { %884 = vadd.xlane.f32.xlu0 %v883_v58  ;;  %v1079_v59 = vpop.f32.mrf.mxu1 }
 0x650   : > { %v885_v60 = vpop.xlane.xlu0 %884 }
 0x651   : > { %v887_v61 = vmul.f32 0.03125, %v885_v60 }
 0x653   : > { %v888_v62 = vsub.f32 %v880_v56, %v887_v61 }
 0x655   : > { %v889_v63 = vmul.f32 %v888_v62, %v888_v62 }
 0x657   : > { %v890_v0 = vsel %vm299_vm1, %v889_v63, 0.0 }
 0x658   : > { %891 = vadd.xlane.f32.xlu1 %v890_v0 }
 0x6e1   : > { %v892_v2 = vpop.xlane.xlu1 %891 }
 0x6e2   : > { %v893_v4 = vmul.f32 0.03125, %v892_v2 }
 0x6e4   : > { %v894_v3 = vadd.f32 1e-05, %v893_v4 }
 0x6e6   : > { %1118 = vrsqrt.f32 %v894_v3 }
 0x6f3   : > { %v1119_v5 = vpop.eup %1118 }
 0x6f4   : > { %v896_v7 = vmul.f32 %v1119_v5, %v888_v62 }
 0x6f6   : > { %v903_v9 = vmul.f32 %v990_v6, %v896_v7 }
 0x6f8   : > { %v910_v10 = vadd.f32 %v991_v8, %v903_v9 }
 0x6fa   : > { %v911_v11 = vpack.c.bf16 %v910_v10, %v910_v10 }
 0x6fc   : > { %913 = vst.msk [vmem:[%s273_s13] sm:$0xf] %vm912_vm6, %v911_v11 }
 0x6fd PF: > { %s17_s24 = sadd.s32 1, %s1126_s24  }
 0x6fe   : > { %p14_p4 = scmp.ge.s32.totalorder %s17_s24, 4  }
 0x700   :  { %16 = sbr.rel (!%p14_p4) target bundleno = 1 (0x1), region = 78 }

// kernel: seq2seq_transformer_forward.15
= control target key start
LH: loop header
LB: loop body
LE: loop exit
PB: predicated region body
PF: predicated region fallthrough
CT: control target
= control target key end

     0   :  { %s1184_s24 = smov 0   ;;  %s1322_s0 = inlined_call_operand.vmem [shape: bf16[2,8,32], index: 0, kind: input, shape index: {}]   ;;  %s1323_s1 = inlined_call_operand.vmem [shape: bf16[32,96], index: 1, kind: input, shape index: {}]   ;;  %s1324_s2 = inlined_call_operand.vmem [shape: f32[1,96], index: 2, kind: input, shape index: {}]   ;;  %s1325_s3 = inlined_call_operand.vmem [shape: bf16[32,32], index: 3, kind: input, shape index: {}]   ;;  %s1326_s4 = inlined_call_operand.vmem [shape: f32[1,32], index: 4, kind: input, shape index: {}]   ;;  %s1327_s5 = inlined_call_operand.vmem [shape: f32[1,32], index: 5, kind: input, shape index: {}]   ;;  %s1328_s6 = inlined_call_operand.vmem [shape: f32[1,32], index: 6, kind: input, shape index: {}]   ;;  %s1329_s7 = inlined_call_operand.vmem [shape: bf16[2,8,32], index: 7, kind: output, shape index: {}]  }
   0x1 LB: > { %s973_s25 = sadd.s32 4294967295, %s1132_s24   ;;  %p977_p0 = scmp.ge.s32.totalorder %s1132_s24, 1  ;;  %s1132_s24 = sphi %s1184_s24, %s17_s24  }
   0x2   : > { %p236_p1 = scmp.lt.s32.totalorder %s1132_s24, 3 }
   0x4   : > { %p237_p2 = pnand %p977_p0, %p236_p1 }
   0x5   : > { %p266_p3 = scmp.lt.s32.totalorder (!%p237_p2), %s973_s25, 1  ;;  %s1136_s13 = smov (!%p237_p2), 104  }
   0x6   : > { %240 = sbr.rel (%p237_p2) target bundleno = 1791 (0x6ff), region = 48  ;;  %s1137_s14 = smov (!%p237_p2), 120  }
   0x7   : > { %s1138_s15 = smov (!%p237_p2), 112   ;;  %s1139_s16 = smov (!%p237_p2), 96  }
   0x8   : > { %s1140_s17 = smov (!%p237_p2), 64   ;;  %s1141_s22 = smov (!%p237_p2), 8  }
   0x9   : > { %s1142_s23 = smov (!%p237_p2), 16   ;;  %s1143_s26 = smov (!%p237_p2), 24  }
   0xb   : > { %v1104_v0 = vld [vmem:[%s1323_s1 + $0x8] sm:$0xff]   ;;  %v1134_v1 = vmov 0.0   ;;  %v1105_v2 = vld [vmem:[%s1323_s1] sm:$0xff]   ;;  %vm1135_vm0 = vmmov 0   ;;  %s1331_s25 = smov (!%p266_p3, %s973_s25), 1  ;;  %vm299_vm1 = vcmask 261120   ;;  %v357_v25 = vlaneseq }
   0xc   : > { %1022 = vmatprep.subr.bf16.mxu0 %v1134_v1  ;;  %1030 = vmatprep.subr.bf16.mxu1 %v1134_v1  ;;  %s978_s30 = sshll.u32 %s1331_s25, 2  ;;  %v980_v4 = vld [vmem:[%s1324_s2] ss:$0 sm:$0xff]  ;;  %vm366_vm2 = vcmask 64512   ;;  %vm613_vm4 = vcmask 1043456   ;;  %vm814_vm5 = vcmask 130048  }
   0xd   : > { %1023 = vmatpush3.bf16.msra.mxu0 %v1104_v0  ;;  %1026 = vmatprep.mubr.msk.bf16.mxu0 %vm1135_vm0, %v1134_v1  ;;  %s269_s10 = scalar_lea.vmem %s1322_s0, %s978_s30  ;;  %v358_v26 = vshrl.u32 %v357_v25, 7  ;;  %v360_v27 = vand.u32 127, %v357_v25  ;;  %vm816_vm6 = vcmask 195584   ;;  %vm918_vm7 = vcmask 257024  }
   0xe   : > { %1024 = vmatprep.subr.bf16.mxu0 %v1134_v1  ;;  %1032 = vmatprep.mubr.msk.bf16.mxu1 %vm1135_vm0, %v1134_v1  ;;  %v1214_v3 = vld [vmem:[%s269_s10] sm:$0xf] }
   0xf   : > { %vm361_vm3 = vcmp.gt.s32.totalorder %v360_v27, %v358_v26 }
  0x10   : > { %v362_v28 = vsel %vm361_vm3, -1e+30, %v1134_v1 }
  0x11   : > { %1025 = vmatpush3.bf16.msra.mxu0 %v1105_v2 }
  0x12   : > { %1036 = vmatprep.subr.bf16.mxu0 %v1134_v1 }
  0x14   : > { %1027 = vmatmul.mubr.msk.bf16.vlgmr.msra.gmra.mxu0 %vm299_vm1, %v1214_v3 }
  0x15   : > { %1038 = vmatprep.mubr.msk.bf16.mxu0 %vm1135_vm0, %v1134_v1 }
  0xd4   : > { %v337_v5 = vpop.f32.mrf.mxu0 }
  0xd5   : > { %v338_v6 = vadd.f32 %v980_v4, %v337_v5 }
  0xd6   : > { %v1028_v7 = vpop.f32.mrf.mxu0 }
  0xd7   : > { %350 = vrot.lane.b32.xlu1 %v338_v6, %s1136_s13  ;;  %344 = vrot.lane.b32.xlu0 %v338_v6, %s1137_s14  ;;  %v1223_v9 = vpack.c.bf16 %v338_v6, %v338_v6  ;;  %s273_s13 = scalar_lea.vmem %s1329_s7, %s978_s30 }
  0xd8   : > { %v340_v8 = vpop.f32.mrf.mxu0 }
  0xda   : > { %v1029_v10 = vpop.f32.mrf.mxu0 }
  0xdb   : > { %347 = vrot.lane.b32.xlu0 %v338_v6, %s1138_s15  ;;  %364 = vrot.lane.b32.xlu1 %v1223_v9, %s1139_s16 }
 0x149   : > { %v351_v11 = vpop.permute.xlu1 %350  ;;  %v345_v12 = vpop.permute.xlu0 %344 }
 0x14a   : > { %v1226_v13 = vpack.c.bf16 %v345_v12, %v345_v12  ;;  %v1229_v16 = vpack.c.bf16 %v351_v11, %v351_v11 }
 0x14c   : > { %414 = vrot.lane.b32.xlu0 %v1226_v13, %s1139_s16 }
 0x14d   : > { %v348_v14 = vpop.permute.xlu0 %347  ;;  %v365_v15 = vpop.permute.xlu1 %364 }
 0x14e   : > { %v1231_v17 = vpack.c.bf16 %v348_v14, %v348_v14  ;;  %v371_v18 = vsel %vm366_vm2, %v365_v15, 0 }
 0x14f   : > { %1031 = vmatpush3.bf16.xpose.msra.mxu1 %v371_v18 }
 0x150   : > { %512 = vrot.lane.b32.xlu0 %v1229_v16, %s1139_s16  ;;  %463 = vrot.lane.b32.xlu1 %v1231_v17, %s1139_s16 }
 0x151   : > { %1042 = vmatprep.subr.bf16.mxu1 %v1134_v1 }
 0x156   : > { %1033 = vmatmul.mubr.msk.bf16.vlgmr.msra.gmra.mxu1 %vm366_vm2, %v1223_v9 }
 0x157   : > { %1044 = vmatprep.mubr.msk.bf16.mxu1 %vm1135_vm0, %v1134_v1 }
 0x1be   : > { %v415_v19 = vpop.permute.xlu0 %414 }
 0x1bf   : > { %v420_v20 = vsel %vm366_vm2, %v415_v19, 0 }
 0x1c0   : > { %1037 = vmatpush3.bf16.xpose.msra.mxu0 %v420_v20 }
 0x1c1   : > { %1048 = vmatprep.subr.bf16.mxu0 %v1134_v1 }
 0x1c2   : > { %v464_v21 = vpop.permute.xlu1 %463  ;;  %v513_v23 = vpop.permute.xlu0 %512 }
 0x1c3   : > { %v469_v22 = vsel %vm366_vm2, %v464_v21, 0  ;;  %v518_v24 = vsel %vm366_vm2, %v513_v23, 0 }
 0x1c4   : > { %1043 = vmatpush3.bf16.xpose.msra.mxu1 %v469_v22 }
 0x1c5   : > { %1054 = vmatprep.subr.bf16.mxu1 %v1134_v1 }
 0x1c7   : > { %1039 = vmatmul.mubr.msk.bf16.vlgmr.msra.gmra.mxu0 %vm366_vm2, %v1226_v13 }
 0x1c8   : > { %1049 = vmatpush3.bf16.xpose.msra.mxu0 %v518_v24  ;;  %1050 = vmatprep.mubr.msk.bf16.mxu0 %vm1135_vm0, %v1134_v1 }
 0x1c9   : > { %1060 = vmatprep.subr.bf16.mxu0 %v1134_v1 }
 0x1cb   : > { %1045 = vmatmul.mubr.msk.bf16.vlgmr.msra.gmra.mxu1 %vm366_vm2, %v1231_v17 }
 0x1cc   : > { %1056 = vmatprep.mubr.msk.bf16.mxu1 %vm1135_vm0, %v1134_v1 }
 0x1cf   : > { %1051 = vmatmul.mubr.msk.bf16.vlgmr.msra.gmra.mxu0 %vm366_vm2, %v1229_v16 }
 0x1d0   : > { %1062 = vmatprep.mubr.msk.bf16.mxu0 %vm1135_vm0, %v1134_v1 }
 0x216   : > { %v407_v29 = vpop.f32.mrf.mxu1 }
 0x217   : > { %v408_v30 = vadd.f32 %v407_v29, %v362_v28 }
 0x218   : > { %v1034_v31 = vpop.f32.mrf.mxu1 }
 0x219   : > { %v560_v32 = vsel %vm366_vm2, %v408_v30, -inf }
 0x21a   : > { %561 = vmax.xlane.f32.xlu1 %v560_v32  ;;  %v410_v33 = vpop.f32.mrf.mxu1 }
 0x21c   : > { %v1035_v34 = vpop.f32.mrf.mxu1 }
 0x287   : > { %v456_v35 = vpop.f32.mrf.mxu0 }
 0x288   : > { %v457_v36 = vadd.f32 %v456_v35, %v362_v28 }
 0x289   : > { %v1040_v37 = vpop.f32.mrf.mxu0 }
 0x28a   : > { %v563_v38 = vsel %vm366_vm2, %v457_v36, -inf }
 0x28b   : > { %v505_v39 = vpop.f32.mrf.mxu1  ;;  %564 = vmax.xlane.f32.xlu0 %v563_v38  ;;  %v459_v40 = vpop.f32.mrf.mxu0 }
 0x28c   : > { %v506_v41 = vadd.f32 %v505_v39, %v362_v28  ;;  %v1106_v39 = vld [vmem:[%s1325_s3 + $0x8] sm:$0xff]   ;;  %v1107_v40 = vld [vmem:[%s1325_s3] sm:$0xff]  }
 0x28d   : > { %v1041_v42 = vpop.f32.mrf.mxu0  ;;  %v1046_v43 = vpop.f32.mrf.mxu1 }
 0x28e   : > { %v566_v44 = vsel %vm366_vm2, %v506_v41, -inf }
 0x28f   : > { %v508_v45 = vpop.f32.mrf.mxu1  ;;  %567 = vmax.xlane.f32.xlu0 %v566_v44  ;;  %v554_v46 = vpop.f32.mrf.mxu0 }
 0x290   : > { %v555_v47 = vadd.f32 %v554_v46, %v362_v28 }
 0x291   : > { %v1047_v48 = vpop.f32.mrf.mxu1  ;;  %v1052_v49 = vpop.f32.mrf.mxu0 }
 0x292   : > { %v569_v50 = vsel %vm366_vm2, %v555_v47, -inf }
 0x293   : > { %570 = vmax.xlane.f32.xlu1 %v569_v50  ;;  %v557_v51 = vpop.f32.mrf.mxu0 }
 0x295   : > { %v1053_v52 = vpop.f32.mrf.mxu0 }
 0x2a3   : > { %v562_v53 = vpop.xlane.xlu1 %561 }
 0x2a4   : > { %657 = vrot.lane.b32.xlu1 %v1226_v13, %s1140_s17  ;;  %v572_v54 = vsub.f32 %v408_v30, %v562_v53 }
 0x2a5   : > { %608 = vrot.lane.b32.xlu0 %v1223_v9, %s1140_s17 }
 0x2a6   : > { %v576_v55 = vmul.f32 1.442695, %v572_v54 }
 0x2a8   : > { %1108 = vpow2.f32 %v576_v55 }
 0x2b5   : > { %v1109_v56 = vpop.eup %1108 }
 0x2b6   : > { %v584_v57 = vsel %vm366_vm2, %v1109_v56, 0.0 }
 0x2c4   : > { %585 = vadd.xlane.f32.xlu0 %v584_v57 }
 0x314   : > { %v565_v58 = vpop.xlane.xlu0 %564 }
 0x315   : > { %v573_v59 = vsub.f32 %v457_v36, %v565_v58 }
 0x317   : > { %v578_v60 = vmul.f32 1.442695, %v573_v59  ;;  %v992_v59 = vld [vmem:[%s1326_s4] ss:$0 sm:$0xff] }
 0x318   : > { %v568_v61 = vpop.xlane.xlu0 %567 }
 0x319   : > { %1110 = vpow2.f32 %v578_v60  ;;  %v574_v62 = vsub.f32 %v506_v41, %v568_v61  ;;  %v885_v60 = vunpack.c.l.bf16 %v1214_v3 }
 0x31b   : > { %v580_v63 = vmul.f32 1.442695, %v574_v62 }
 0x31c   : > { %v609_v0 = vpop.permute.xlu0 %608  ;;  %v571_v2 = vpop.xlane.xlu1 %570 }
 0x31d   : > { %1112 = vpow2.f32 %v580_v63  ;;  %v615_v4 = vsel %vm613_vm4, %v609_v0, 0  ;;  %v575_v5 = vsub.f32 %v555_v47, %v571_v2 }
 0x31e   : > { %1055 = vmatpush3.bf16.msra.mxu1 %v615_v4 }
 0x31f   : > { %v582_v6 = vmul.f32 1.442695, %v575_v5  ;;  %1066 = vmatprep.subr.bf16.mxu1 %v1134_v1 }
 0x320   : > { %v658_v7 = vpop.permute.xlu1 %657 }
 0x321   : > { %1114 = vpow2.f32 %v582_v6  ;;  %v663_v8 = vsel %vm613_vm4, %v658_v7, 0 }
 0x322   : > { %1061 = vmatpush3.bf16.msra.mxu0 %v663_v8 }
 0x323   : > { %1072 = vmatprep.subr.bf16.mxu0 %v1134_v1 }
 0x326   : > { %v1111_v9 = vpop.eup %1110 }
 0x327   : > { %v587_v10 = vsel %vm366_vm2, %v1111_v9, 0.0 }
 0x328   : > { %588 = vadd.xlane.f32.xlu1 %v587_v10 }
 0x32a   : > { %v1113_v11 = vpop.eup %1112 }
 0x32b   : > { %v590_v12 = vsel %vm366_vm2, %v1113_v11, 0.0 }
 0x32c   : > { %591 = vadd.xlane.f32.xlu0 %v590_v12 }
 0x32e   : > { %v1115_v13 = vpop.eup %1114 }
 0x32f   : > { %v593_v14 = vsel %vm366_vm2, %v1115_v13, 0.0 }
 0x330   : > { %594 = vadd.xlane.f32.xlu1 %v593_v14  ;;  %v996_v14 = vld [vmem:[%s1327_s5] ss:$0 sm:$0xff] }
 0x341   : > { %705 = vrot.lane.b32.xlu1 %v1231_v17, %s1140_s17 }
 0x342   : > { %753 = vrot.lane.b32.xlu0 %v1229_v16, %s1140_s17 }
 0x34d   : > { %v586_v15 = vpop.xlane.xlu0 %585 }
 0x34e   : > { %1116 = vrcp.f32 %v586_v15 }
 0x35b   : > { %v1117_v18 = vpop.eup %1116 }
 0x35c   : > { %v600_v19 = vmul.f32 %v1117_v18, %v1109_v56  ;;  %v997_v18 = vld [vmem:[%s1328_s6] ss:$0 sm:$0xff] }
 0x35e   : > { %v604_v20 = vpack.c.bf16 %v600_v19, %v600_v19 }
 0x360   : > { %1057 = vmatmul.mubr.msk.bf16.vlgmr.msra.gmra.mxu1 %vm366_vm2, %v604_v20 }
 0x361   : > { %1068 = vmatprep.mubr.msk.bf16.mxu1 %vm1135_vm0, %v1134_v1 }
 0x3b1   : > { %v589_v21 = vpop.xlane.xlu1 %588 }
 0x3b2   : > { %1118 = vrcp.f32 %v589_v21 }
 0x3b5   : > { %v592_v22 = vpop.xlane.xlu0 %591 }
 0x3b6   : > { %1120 = vrcp.f32 %v592_v22 }
 0x3b9   : > { %v595_v23 = vpop.xlane.xlu1 %594  ;;  %v754_v26 = vpop.permute.xlu0 %753 }
 0x3ba   : > { %1122 = vrcp.f32 %v595_v23  ;;  %v759_v29 = vsel %vm613_vm4, %v754_v26, 0 }
 0x3bd   : > { %v706_v17 = vpop.permute.xlu1 %705 }
 0x3be   : > { %v711_v24 = vsel %vm613_vm4, %v706_v17, 0 }
 0x3bf   : > { %v1119_v16 = vpop.eup %1118  ;;  %1067 = vmatpush3.bf16.msra.mxu1 %v711_v24 }
 0x3c0   : > { %v601_v25 = vmul.f32 %v1119_v16, %v1111_v9  ;;  %1078 = vmatprep.subr.bf16.mxu1 %v1134_v1 }
 0x3c2   : > { %v605_v27 = vpack.c.bf16 %v601_v25, %v601_v25 }
 0x3c3   : > { %v1121_v28 = vpop.eup %1120 }
 0x3c4   : > { %1063 = vmatmul.mubr.msk.bf16.vlgmr.msra.gmra.mxu0 %vm366_vm2, %v605_v27  ;;  %v602_v30 = vmul.f32 %v1121_v28, %v1113_v11 }
 0x3c5   : > { %1073 = vmatpush3.bf16.msra.mxu0 %v759_v29  ;;  %1074 = vmatprep.mubr.msk.bf16.mxu0 %vm1135_vm0, %v1134_v1 }
 0x3c6   : > { %v606_v31 = vpack.c.bf16 %v602_v30, %v602_v30 }
 0x3c7   : > { %v1123_v32 = vpop.eup %1122 }
 0x3c8   : > { %1069 = vmatmul.mubr.msk.bf16.vlgmr.msra.gmra.mxu1 %vm366_vm2, %v606_v31  ;;  %v603_v33 = vmul.f32 %v1123_v32, %v1115_v13 }
 0x3c9   : > { %1082 = vmatprep.mubr.msk.bf16.mxu1 %vm1135_vm0, %v1134_v1  ;;  %1079 = vmatpush3.bf16.msra.mxu1 %v1106_v39 }
 0x3ca   : > { %v607_v34 = vpack.c.bf16 %v603_v33, %v603_v33  ;;  %1080 = vmatprep.subr.bf16.mxu1 %v1134_v1 }
 0x3cc   : > { %1075 = vmatmul.mubr.msk.bf16.vlgmr.msra.gmra.mxu0 %vm366_vm2, %v607_v34 }
 0x3cd   : > { %1081 = vmatpush3.bf16.msra.mxu1 %v1107_v40 }
 0x420   : > { %v651_v35 = vpop.f32.mrf.mxu1 }
 0x422   : > { %v1058_v36 = vpop.f32.mrf.mxu1 }
 0x424   : > { %v654_v37 = vpop.f32.mrf.mxu1 }
 0x426   : > { %v1059_v38 = vpop.f32.mrf.mxu1 }
 0x484   : > { %v699_v41 = vpop.f32.mrf.mxu0 }
 0x485   : > { %802 = vrot.lane.b32.xlu1 %v699_v41, %s1141_s22 }
 0x486   : > { %v1064_v42 = vpop.f32.mrf.mxu0 }
 0x488   : > { %v702_v43 = vpop.f32.mrf.mxu0  ;;  %v747_v44 = vpop.f32.mrf.mxu1 }
 0x489   : > { %806 = vrot.lane.b32.xlu0 %v747_v44, %s1142_s23 }
 0x48a   : > { %v1065_v45 = vpop.f32.mrf.mxu0  ;;  %v1070_v46 = vpop.f32.mrf.mxu1 }
 0x48c   : > { %v750_v47 = vpop.f32.mrf.mxu1  ;;  %v795_v48 = vpop.f32.mrf.mxu0 }
 0x48d   : > { %810 = vrot.lane.b32.xlu1 %v795_v48, %s1143_s26 }
 0x48e   : > { %v1071_v1 = vpop.f32.mrf.mxu1  ;;  %v1076_v49 = vpop.f32.mrf.mxu0 }
 0x490   : > { %v798_v50 = vpop.f32.mrf.mxu0 }
 0x492   : > { %v1077_v51 = vpop.f32.mrf.mxu0 }
 0x4f7   : > { %v803_v52 = vpop.permute.xlu1 %802 }
 0x4f8   : > { %v813_v54 = vsel %vm366_vm2, %v651_v35, %v803_v52 }
 0x4fb   : > { %v807_v53 = vpop.permute.xlu0 %806 }
 0x4fc   : > { %v815_v55 = vsel %vm814_vm5, %v813_v54, %v807_v53 }
 0x4ff   : > { %v811_v56 = vpop.permute.xlu1 %810 }
 0x500   : > { %v817_v57 = vsel %vm816_vm6, %v815_v55, %v811_v56 }
 0x501   : > { %v818_v58 = vpack.c.bf16 %v817_v57, %v817_v57 }
 0x503   : > { %1083 = vmatmul.mubr.msk.bf16.vlgmr.msra.gmra.mxu1 %vm299_vm1, %v818_v58 }
 0x5c3   : > { %v879_v61 = vpop.f32.mrf.mxu1 }
 0x5c4   : > { %v880_v62 = vadd.f32 %v992_v59, %v879_v61 }
 0x5c5   : > { %v1084_v63 = vpop.f32.mrf.mxu1 }
 0x5c6   : > { %v886_v0 = vadd.f32 %v885_v60, %v880_v62 }
 0x5c7   : > { %v882_v2 = vpop.f32.mrf.mxu1 }
 0x5c8   : > { %v889_v4 = vsel %vm299_vm1, %v886_v0, 0.0 }
 0x5c9   : > { %890 = vadd.xlane.f32.xlu0 %v889_v4  ;;  %v1085_v5 = vpop.f32.mrf.mxu1 }
 0x652   : > { %v891_v6 = vpop.xlane.xlu0 %890 }
 0x653   : > { %v893_v7 = vmul.f32 0.03125, %v891_v6 }
 0x655   : > { %v894_v8 = vsub.f32 %v886_v0, %v893_v7 }
 0x657   : > { %v895_v9 = vmul.f32 %v894_v8, %v894_v8 }
 0x659   : > { %v896_v10 = vsel %vm299_vm1, %v895_v9, 0.0 }
 0x65a   : > { %897 = vadd.xlane.f32.xlu1 %v896_v10 }
 0x6e3   : > { %v898_v11 = vpop.xlane.xlu1 %897 }
 0x6e4   : > { %v899_v12 = vmul.f32 0.03125, %v898_v11 }
 0x6e6   : > { %v900_v3 = vadd.f32 1e-05, %v899_v12 }
 0x6e8   : > { %1124 = vrsqrt.f32 %v900_v3 }
 0x6f5   : > { %v1125_v13 = vpop.eup %1124 }
 0x6f6   : > { %v902_v15 = vmul.f32 %v1125_v13, %v894_v8 }
 0x6f8   : > { %v909_v19 = vmul.f32 %v996_v14, %v902_v15 }
 0x6fa   : > { %v916_v20 = vadd.f32 %v997_v18, %v909_v19 }
 0x6fc   : > { %v917_v21 = vpack.c.bf16 %v916_v20, %v916_v20 }
 0x6fe   : > { %919 = vst.msk [vmem:[%s273_s13] sm:$0xf] %vm918_vm7, %v917_v21 }
 0x6ff PF: > { %s17_s24 = sadd.s32 1, %s1132_s24  }
 0x700   : > { %p14_p4 = scmp.ge.s32.totalorder %s17_s24, 4  }
 0x702   :  { %16 = sbr.rel (!%p14_p4) target bundleno = 1 (0x1), region = 78 }

// kernel: seq2seq_transformer_forward.21
= control target key start
LH: loop header
LB: loop body
LE: loop exit
PB: predicated region body
PF: predicated region fallthrough
CT: control target
= control target key end

     0   :  { %v117_v0 = vmov 0.0   ;;  %vm118_vm0 = vmmov 0   ;;  %vm45_vm1 = vcmask 261120   ;;  %s157_s1 = inlined_call_operand.vmem [shape: bf16[32,128], index: 1, kind: input, shape index: {}]   ;;  %s158_s0 = inlined_call_operand.vmem [shape: bf16[16,32], index: 0, kind: input, shape index: {}]   ;;  %s159_s2 = inlined_call_operand.vmem [shape: f32[1,128], index: 2, kind: input, shape index: {}]   ;;  %s160_s3 = inlined_call_operand.vmem [shape: f32[16,128], index: 3, kind: output, shape index: {}]  }
   0x1   :  { %104 = vmatprep.subr.bf16.mxu0 %v117_v0  ;;  %v114_v1 = vld [vmem:[%s157_s1 + $0x8] sm:$0xff]   ;;  %108 = vmatprep.mubr.msk.bf16.mxu0 %vm118_vm0, %v117_v0  ;;  %v115_v2 = vld [vmem:[%s157_s1] sm:$0xff]  }
   0x2   :  { %105 = vmatpush3.bf16.msra.mxu0 %v114_v1  ;;  %v116_v3 = vld [vmem:[%s158_s0] sm:$0xff]  }
   0x3   :  { %106 = vmatprep.subr.bf16.mxu0 %v117_v0  ;;  %v96_v4 = vld [vmem:[%s159_s2] ss:$0 sm:$0xff] }
   0x6   :  { %107 = vmatpush3.bf16.msra.mxu0 %v115_v2 }
   0x9   :  { %109 = vmatmul.mubr.msk.bf16.vlgmr.msra.gmra.mxu0 %vm45_vm1, %v116_v3 }
  0xc9   :  { %v83_v5 = vpop.f32.mrf.mxu0 }
  0xca   :  { %v84_v6 = vadd.f32 %v96_v4, %v83_v5 }
  0xcb   :  { %v110_v7 = vpop.f32.mrf.mxu0 }
  0xcc   :  { %90 = vst [vmem:[%s160_s3] sm:$0xff] %v84_v6 }
  0xcd   :  { %v86_v8 = vpop.f32.mrf.mxu0 }
  0xce   :  { %v87_v9 = vadd.f32 %v96_v4, %v86_v8 }
  0xcf   :  { %v111_v10 = vpop.f32.mrf.mxu0 }
  0xd0   :  { %91 = vst [vmem:[%s160_s3 + $0x8] sm:$0xff] %v87_v9 }

// kernel: seq2seq_transformer_forward.16
= control target key start
LH: loop header
LB: loop body
LE: loop exit
PB: predicated region body
PF: predicated region fallthrough
CT: control target
= control target key end

     0   :  { %s1392_s13 = smov 0   ;;  %s1540_s0 = inlined_call_operand.vmem [shape: bf16[2,8,32], index: 0, kind: input, shape index: {}]   ;;  %s1541_s1 = inlined_call_operand.vmem [shape: bf16[2,8,32], index: 1, kind: input, shape index: {}]   ;;  %s1542_s2 = inlined_call_operand.vmem [shape: bf16[32,32], index: 2, kind: input, shape index: {}]   ;;  %s1543_s3 = inlined_call_operand.vmem [shape: f32[1,32], index: 3, kind: input, shape index: {}]   ;;  %s1544_s4 = inlined_call_operand.vmem [shape: bf16[32,64], index: 4, kind: input, shape index: {}]   ;;  %s1545_s5 = inlined_call_operand.vmem [shape: f32[1,64], index: 5, kind: input, shape index: {}]   ;;  %s1546_s6 = inlined_call_operand.vmem [shape: bf16[32,32], index: 6, kind: input, shape index: {}]   ;;  %s1547_s7 = inlined_call_operand.vmem [shape: f32[1,32], index: 7, kind: input, shape index: {}]   ;;  %s1548_s8 = inlined_call_operand.vmem [shape: f32[1,32], index: 8, kind: input, shape index: {}]   ;;  %s1549_s9 = inlined_call_operand.vmem [shape: f32[1,32], index: 9, kind: input, shape index: {}]   ;;  %s1550_s10 = inlined_call_operand.vmem [shape: bf16[2,8,32], index: 10, kind: output, shape index: {}]  }
   0x1 LB: > { %s1150_s14 = sadd.s32 4294967295, %s1326_s13   ;;  %p1154_p0 = scmp.ge.s32.totalorder %s1326_s13, 1  ;;  %s1326_s13 = sphi %s1392_s13, %s20_s13  }
   0x2   : > { %p320_p1 = scmp.lt.s32.totalorder %s1326_s13, 3 }
   0x4   : > { %p321_p2 = pnand %p1154_p0, %p320_p1 }
   0x5   : > { %p360_p3 = scmp.lt.s32.totalorder (!%p321_p2), %s1150_s14, 1  ;;  %s1330_s15 = smov (!%p321_p2), 120  }
   0x6   : > { %324 = sbr.rel (%p321_p2) target bundleno = 1675 (0x68b), region = 60  ;;  %s1331_s16 = smov (!%p321_p2), 104  }
   0x7   : > { %s1332_s17 = smov (!%p321_p2), 112   ;;  %s1333_s18 = smov (!%p321_p2), 96  }
   0x8   : > { %s1334_s24 = smov (!%p321_p2), 8   ;;  %s1335_s25 = smov (!%p321_p2), 16  }
   0xb   : > { %v1296_v0 = vld [vmem:[%s1542_s2 + $0x8] sm:$0xff]   ;;  %v1328_v1 = vmov 0.0   ;;  %v1298_v3 = vld [vmem:[%s1542_s2] sm:$0xff]   ;;  %vm1329_vm0 = vmmov 0   ;;  %s1552_s14 = smov (!%p360_p3, %s1150_s14), 1  ;;  %vm398_vm1 = vcmask 261120  }
   0xc   : > { %1207 = vmatprep.subr.bf16.mxu0 %v1328_v1  ;;  %1215 = vmatprep.subr.bf16.mxu1 %v1328_v1  ;;  %v1297_v2 = vld [vmem:[%s1544_s4 + $0x8] sm:$0xff]   ;;  %v1299_v4 = vld [vmem:[%s1544_s4] sm:$0xff]   ;;  %s1420_s23 = sshll.u32 %s1552_s14, 2  ;;  %vm536_vm2 = vcmask 64512   ;;  %vm775_vm3 = vcmask 1043456   ;;  %vm979_vm4 = vcmask 130048  }
   0xd   : > { %1208 = vmatpush3.bf16.msra.mxu0 %v1296_v0  ;;  %1211 = vmatprep.mubr.msk.bf16.mxu0 %vm1329_vm0, %v1328_v1  ;;  %s363_s26 = scalar_lea.vmem %s1540_s0, %s1420_s23  ;;  %s367_s29 = scalar_lea.vmem %s1541_s1, %s1420_s23  ;;  %v1158_v7 = vld [vmem:[%s1543_s3] ss:$0 sm:$0xff]  ;;  %vm981_vm5 = vcmask 195584   ;;  %vm1083_vm6 = vcmask 257024  }
   0xe   : > { %1216 = vmatpush3.bf16.msra.mxu1 %v1297_v2  ;;  %1209 = vmatprep.subr.bf16.mxu0 %v1328_v1  ;;  %v1427_v5 = vld [vmem:[%s363_s26] sm:$0xf]  ;;  %s1336_s26 = smov 24  }
   0xf   : > { %1217 = vmatprep.subr.bf16.mxu1 %v1328_v1  ;;  %1219 = vmatprep.mubr.msk.bf16.mxu1 %vm1329_vm0, %v1328_v1  ;;  %v374_v6 = vld [vmem:[%s367_s29] sm:$0xf] }
  0x10   : > { %v1162_v8 = vld [vmem:[%s1545_s5] ss:$0 sm:$0xff] }
  0x11   : > { %1210 = vmatpush3.bf16.msra.mxu0 %v1298_v3 }
  0x12   : > { %1218 = vmatpush3.bf16.msra.mxu1 %v1299_v4  ;;  %1223 = vmatprep.subr.bf16.mxu0 %v1328_v1 }
  0x13   : > { %1229 = vmatprep.subr.bf16.mxu1 %v1328_v1 }
  0x14   : > { %1212 = vmatmul.mubr.msk.bf16.vlgmr.msra.gmra.mxu0 %vm398_vm1, %v1427_v5 }
  0x15   : > { %1220 = vmatmul.mubr.msk.bf16.vlgmr.msra.gmra.mxu1 %vm398_vm1, %v374_v6  ;;  %1225 = vmatprep.mubr.msk.bf16.mxu0 %vm1329_vm0, %v1328_v1 }
  0x16   : > { %1231 = vmatprep.mubr.msk.bf16.mxu1 %vm1329_vm0, %v1328_v1 }
  0xd4   : > { %v436_v9 = vpop.f32.mrf.mxu0 }
  0xd5   : > { %v437_v10 = vadd.f32 %v1158_v7, %v436_v9  ;;  %v502_v11 = vpop.f32.mrf.mxu1 }
  0xd6   : > { %v503_v12 = vadd.f32 %v1162_v8, %v502_v11  ;;  %v1213_v13 = vpop.f32.mrf.mxu0 }
  0xd7   : > { %v1221_v14 = vpop.f32.mrf.mxu1  ;;  %509 = vrot.lane.b32.xlu1 %v437_v10, %s1330_s15  ;;  %v518_v21 = vpack.c.bf16 %v437_v10, %v437_v10 }
  0xd8   : > { %523 = vrot.lane.b32.xlu0 %v503_v12, %s1330_s15  ;;  %v439_v15 = vpop.f32.mrf.mxu0  ;;  %v1447_v16 = vpack.c.bf16 %v503_v12, %v503_v12 }
  0xd9   : > { %v505_v17 = vpop.f32.mrf.mxu1 }
  0xda   : > { %v1214_v18 = vpop.f32.mrf.mxu0  ;;  %v541_v19 = vsel %vm536_vm2, %v1447_v16, 0 }
  0xdb   : > { %v1222_v20 = vpop.f32.mrf.mxu1  ;;  %1224 = vmatpush3.bf16.xpose.msra.mxu0 %v541_v19  ;;  %529 = vrot.lane.b32.xlu1 %v503_v12, %s1331_s16 }
  0xdc   : > { %526 = vrot.lane.b32.xlu0 %v503_v12, %s1332_s17  ;;  %1235 = vmatprep.subr.bf16.mxu0 %v1328_v1 }
  0xdf   : > { %515 = vrot.lane.b32.xlu1 %v437_v10, %s1331_s16  ;;  %s371_s16 = scalar_lea.vmem %s1550_s10, %s1420_s23 }
  0xe0   : > { %512 = vrot.lane.b32.xlu0 %v437_v10, %s1332_s17 }
  0xe2   : > { %1226 = vmatmul.mubr.msk.bf16.vlgmr.msra.gmra.mxu0 %vm536_vm2, %v518_v21 }
  0xe3   : > { %1237 = vmatprep.mubr.msk.bf16.mxu0 %vm1329_vm0, %v1328_v1 }
 0x149   : > { %v510_v22 = vpop.permute.xlu1 %509 }
 0x14a   : > { %v524_v23 = vpop.permute.xlu0 %523  ;;  %v519_v31 = vpack.c.bf16 %v510_v22, %v510_v22 }
 0x14b   : > { %v1455_v24 = vpack.c.bf16 %v524_v23, %v524_v23 }
 0x14d   : > { %v587_v25 = vsel %vm536_vm2, %v1455_v24, 0  ;;  %v530_v27 = vpop.permute.xlu1 %529 }
 0x14e   : > { %1230 = vmatpush3.bf16.xpose.msra.mxu1 %v587_v25  ;;  %v527_v26 = vpop.permute.xlu0 %526  ;;  %v1464_v30 = vpack.c.bf16 %v530_v27, %v530_v27 }
 0x14f   : > { %v1459_v28 = vpack.c.bf16 %v527_v26, %v527_v26  ;;  %1241 = vmatprep.subr.bf16.mxu1 %v1328_v1 }
 0x150   : > { %v679_v33 = vsel %vm536_vm2, %v1464_v30, 0 }
 0x151   : > { %v633_v29 = vsel %vm536_vm2, %v1459_v28, 0  ;;  %v516_v35 = vpop.permute.xlu1 %515 }
 0x152   : > { %1236 = vmatpush3.bf16.xpose.msra.mxu0 %v633_v29  ;;  %v513_v32 = vpop.permute.xlu0 %512  ;;  %v521_v36 = vpack.c.bf16 %v516_v35, %v516_v35 }
 0x153   : > { %1247 = vmatprep.subr.bf16.mxu0 %v1328_v1  ;;  %v520_v34 = vpack.c.bf16 %v513_v32, %v513_v32 }
 0x155   : > { %1232 = vmatmul.mubr.msk.bf16.vlgmr.msra.gmra.mxu1 %vm536_vm2, %v519_v31 }
 0x156   : > { %1242 = vmatpush3.bf16.xpose.msra.mxu1 %v679_v33  ;;  %1243 = vmatprep.mubr.msk.bf16.mxu1 %vm1329_vm0, %v1328_v1 }
 0x157   : > { %1253 = vmatprep.subr.bf16.mxu1 %v1328_v1 }
 0x159   : > { %1238 = vmatmul.mubr.msk.bf16.vlgmr.msra.gmra.mxu0 %vm536_vm2, %v520_v34 }
 0x15a   : > { %1249 = vmatprep.mubr.msk.bf16.mxu0 %vm1329_vm0, %v1328_v1 }
 0x15d   : > { %1244 = vmatmul.mubr.msk.bf16.vlgmr.msra.gmra.mxu1 %vm536_vm2, %v521_v36 }
 0x15e   : > { %1255 = vmatprep.mubr.msk.bf16.mxu1 %vm1329_vm0, %v1328_v1 }
 0x1a2   : > { %v577_v37 = vpop.f32.mrf.mxu0 }
 0x1a3   : > { %v721_v38 = vsel %vm536_vm2, %v577_v37, -inf }
 0x1a4   : > { %722 = vmax.xlane.f32.xlu0 %v721_v38  ;;  %v1227_v39 = vpop.f32.mrf.mxu0 }
 0x1a6   : > { %v580_v40 = vpop.f32.mrf.mxu0 }
 0x1a8   : > { %v1228_v41 = vpop.f32.mrf.mxu0 }
 0x215   : > { %v623_v42 = vpop.f32.mrf.mxu1 }
 0x216   : > { %v724_v43 = vsel %vm536_vm2, %v623_v42, -inf }
 0x217   : > { %725 = vmax.xlane.f32.xlu1 %v724_v43  ;;  %v1233_v44 = vpop.f32.mrf.mxu1  ;;  %v1300_v43 = vld [vmem:[%s1546_s6 + $0x8] sm:$0xff]  }
 0x218   : > { %v1301_v44 = vld [vmem:[%s1546_s6] sm:$0xff]  }
 0x219   : > { %v626_v45 = vpop.f32.mrf.mxu1  ;;  %v669_v46 = vpop.f32.mrf.mxu0 }
 0x21a   : > { %v727_v47 = vsel %vm536_vm2, %v669_v46, -inf }
 0x21b   : > { %v1234_v48 = vpop.f32.mrf.mxu1  ;;  %728 = vmax.xlane.f32.xlu0 %v727_v47  ;;  %v1239_v49 = vpop.f32.mrf.mxu0 }
 0x21d   : > { %v672_v50 = vpop.f32.mrf.mxu0  ;;  %v715_v51 = vpop.f32.mrf.mxu1 }
 0x21e   : > { %v730_v52 = vsel %vm536_vm2, %v715_v51, -inf }
 0x21f   : > { %v1245_v53 = vpop.f32.mrf.mxu1  ;;  %731 = vmax.xlane.f32.xlu0 %v730_v52  ;;  %v1240_v54 = vpop.f32.mrf.mxu0 }
 0x221   : > { %v718_v55 = vpop.f32.mrf.mxu1 }
 0x223   : > { %v1246_v56 = vpop.f32.mrf.mxu1 }
 0x228   : > { %770 = vrot.lane.b32.xlu1 %v1447_v16, %s1333_s18 }
 0x22d   : > { %v723_v57 = vpop.xlane.xlu0 %722 }
 0x22e   : > { %v733_v58 = vsub.f32 %v577_v37, %v723_v57 }
 0x230   : > { %v737_v59 = vmul.f32 1.442695, %v733_v58 }
 0x232   : > { %1302 = vpow2.f32 %v737_v59 }
 0x23f   : > { %v1303_v60 = vpop.eup %1302 }
 0x240   : > { %v745_v61 = vsel %vm536_vm2, %v1303_v60, 0.0 }
 0x24c   : > { %746 = vadd.xlane.f32.xlu1 %v745_v61 }
 0x2a0   : > { %v726_v62 = vpop.xlane.xlu1 %725 }
 0x2a1   : > { %v734_v63 = vsub.f32 %v623_v42, %v726_v62 }
 0x2a3   : > { %v739_v0 = vmul.f32 1.442695, %v734_v63  ;;  %v1174_v63 = vld [vmem:[%s1547_s7] ss:$0 sm:$0xff] }
 0x2a4   : > { %v771_v2 = vpop.permute.xlu1 %770  ;;  %v729_v3 = vpop.xlane.xlu0 %728 }
 0x2a5   : > { %1304 = vpow2.f32 %v739_v0  ;;  %v777_v4 = vsel %vm775_vm3, %v771_v2, 0  ;;  %v735_v6 = vsub.f32 %v669_v46, %v729_v3  ;;  %v1050_v0 = vunpack.c.l.bf16 %v1427_v5 }
 0x2a6   : > { %1248 = vmatpush3.bf16.msra.mxu0 %v777_v4 }
 0x2a7   : > { %v741_v7 = vmul.f32 1.442695, %v735_v6  ;;  %1259 = vmatprep.subr.bf16.mxu0 %v1328_v1 }
 0x2a8   : > { %v732_v8 = vpop.xlane.xlu0 %731 }
 0x2a9   : > { %1306 = vpow2.f32 %v741_v7  ;;  %v736_v9 = vsub.f32 %v715_v51, %v732_v8 }
 0x2ab   : > { %v743_v10 = vmul.f32 1.442695, %v736_v9 }
 0x2ad   : > { %1308 = vpow2.f32 %v743_v10 }
 0x2b2   : > { %v1305_v11 = vpop.eup %1304 }
 0x2b3   : > { %v748_v12 = vsel %vm536_vm2, %v1305_v11, 0.0 }
 0x2b4   : > { %749 = vadd.xlane.f32.xlu0 %v748_v12 }
 0x2b6   : > { %v1307_v13 = vpop.eup %1306 }
 0x2b7   : > { %v751_v14 = vsel %vm536_vm2, %v1307_v13, 0.0 }
 0x2b8   : > { %752 = vadd.xlane.f32.xlu1 %v751_v14 }
 0x2ba   : > { %v1309_v15 = vpop.eup %1308 }
 0x2bb   : > { %v754_v16 = vsel %vm536_vm2, %v1309_v15, 0.0 }
 0x2bc   : > { %755 = vadd.xlane.f32.xlu0 %v754_v16 }
 0x2c9   : > { %869 = vrot.lane.b32.xlu1 %v1459_v28, %s1333_s18 }
 0x2cd   : > { %918 = vrot.lane.b32.xlu1 %v1464_v30, %s1333_s18 }
 0x2d2   : > { %820 = vrot.lane.b32.xlu0 %v1455_v24, %s1333_s18 }
 0x2d5   : > { %v747_v17 = vpop.xlane.xlu1 %746 }
 0x2d6   : > { %1310 = vrcp.f32 %v747_v17 }
 0x2e3   : > { %v1311_v18 = vpop.eup %1310 }
 0x2e4   : > { %v761_v19 = vmul.f32 %v1311_v18, %v1303_v60  ;;  %v1178_v18 = vld [vmem:[%s1548_s8] ss:$0 sm:$0xff] }
 0x2e6   : > { %v765_v20 = vpack.c.bf16 %v761_v19, %v761_v19 }
 0x2e8   : > { %1250 = vmatmul.mubr.msk.bf16.vlgmr.msra.gmra.mxu0 %vm536_vm2, %v765_v20  ;;  %v1179_v20 = vld [vmem:[%s1549_s9] ss:$0 sm:$0xff] }
 0x2e9   : > { %1261 = vmatprep.mubr.msk.bf16.mxu0 %vm1329_vm0, %v1328_v1 }
 0x33d   : > { %v750_v21 = vpop.xlane.xlu0 %749 }
 0x33e   : > { %1312 = vrcp.f32 %v750_v21 }
 0x341   : > { %v753_v22 = vpop.xlane.xlu1 %752 }
 0x342   : > { %1314 = vrcp.f32 %v753_v22 }
 0x345   : > { %v870_v23 = vpop.permute.xlu1 %869  ;;  %v756_v25 = vpop.xlane.xlu0 %755 }
 0x346   : > { %v875_v26 = vsel %vm775_vm3, %v870_v23, 0  ;;  %1316 = vrcp.f32 %v756_v25 }
 0x347   : > { %1260 = vmatpush3.bf16.msra.mxu0 %v875_v26 }
 0x348   : > { %1271 = vmatprep.subr.bf16.mxu0 %v1328_v1 }
 0x349   : > { %v821_v24 = vpop.permute.xlu0 %820  ;;  %v919_v30 = vpop.permute.xlu1 %918 }
 0x34a   : > { %v826_v27 = vsel %vm775_vm3, %v821_v24, 0  ;;  %v924_v33 = vsel %vm775_vm3, %v919_v30, 0 }
 0x34b   : > { %v1313_v28 = vpop.eup %1312  ;;  %1254 = vmatpush3.bf16.msra.mxu1 %v826_v27 }
 0x34c   : > { %1265 = vmatprep.subr.bf16.mxu1 %v1328_v1  ;;  %v762_v29 = vmul.f32 %v1313_v28, %v1305_v11 }
 0x34e   : > { %v766_v31 = vpack.c.bf16 %v762_v29, %v762_v29 }
 0x34f   : > { %v1315_v32 = vpop.eup %1314 }
 0x350   : > { %1256 = vmatmul.mubr.msk.bf16.vlgmr.msra.gmra.mxu1 %vm536_vm2, %v766_v31  ;;  %v763_v34 = vmul.f32 %v1315_v32, %v1307_v13 }
 0x351   : > { %1266 = vmatpush3.bf16.msra.mxu1 %v924_v33  ;;  %1267 = vmatprep.mubr.msk.bf16.mxu1 %vm1329_vm0, %v1328_v1 }
 0x352   : > { %v767_v35 = vpack.c.bf16 %v763_v34, %v763_v34 }
 0x353   : > { %v1317_v36 = vpop.eup %1316 }
 0x354   : > { %1262 = vmatmul.mubr.msk.bf16.vlgmr.msra.gmra.mxu0 %vm536_vm2, %v767_v35  ;;  %v764_v37 = vmul.f32 %v1317_v36, %v1309_v15 }
 0x355   : > { %1275 = vmatprep.mubr.msk.bf16.mxu0 %vm1329_vm0, %v1328_v1  ;;  %1272 = vmatpush3.bf16.msra.mxu0 %v1300_v43 }
 0x356   : > { %v768_v38 = vpack.c.bf16 %v764_v37, %v764_v37  ;;  %1273 = vmatprep.subr.bf16.mxu0 %v1328_v1 }
 0x358   : > { %1268 = vmatmul.mubr.msk.bf16.vlgmr.msra.gmra.mxu1 %vm536_vm2, %v768_v38 }
 0x359   : > { %1274 = vmatpush3.bf16.msra.mxu0 %v1301_v44 }
 0x3a8   : > { %v813_v39 = vpop.f32.mrf.mxu0 }
 0x3aa   : > { %v1251_v40 = vpop.f32.mrf.mxu0 }
 0x3ac   : > { %v816_v41 = vpop.f32.mrf.mxu0 }
 0x3ae   : > { %v1252_v42 = vpop.f32.mrf.mxu0 }
 0x410   : > { %v862_v45 = vpop.f32.mrf.mxu1 }
 0x411   : > { %967 = vrot.lane.b32.xlu0 %v862_v45, %s1334_s24 }
 0x412   : > { %v1257_v46 = vpop.f32.mrf.mxu1 }
 0x414   : > { %v865_v47 = vpop.f32.mrf.mxu1  ;;  %v911_v48 = vpop.f32.mrf.mxu0 }
 0x415   : > { %971 = vrot.lane.b32.xlu1 %v911_v48, %s1335_s25 }
 0x416   : > { %v1258_v49 = vpop.f32.mrf.mxu1  ;;  %v1263_v50 = vpop.f32.mrf.mxu0 }
 0x418   : > { %v914_v51 = vpop.f32.mrf.mxu0  ;;  %v960_v52 = vpop.f32.mrf.mxu1 }
 0x419   : > { %975 = vrot.lane.b32.xlu0 %v960_v52, %s1336_s26 }
 0x41a   : > { %v1264_v1 = vpop.f32.mrf.mxu0  ;;  %v1269_v53 = vpop.f32.mrf.mxu1 }
 0x41c   : > { %v963_v54 = vpop.f32.mrf.mxu1 }
 0x41e   : > { %v1270_v55 = vpop.f32.mrf.mxu1 }
 0x483   : > { %v968_v56 = vpop.permute.xlu0 %967 }
 0x484   : > { %v978_v58 = vsel %vm536_vm2, %v813_v39, %v968_v56 }
 0x487   : > { %v972_v57 = vpop.permute.xlu1 %971 }
 0x488   : > { %v980_v59 = vsel %vm979_vm4, %v978_v58, %v972_v57 }
 0x48b   : > { %v976_v60 = vpop.permute.xlu0 %975 }
 0x48c   : > { %v982_v61 = vsel %vm981_vm5, %v980_v59, %v976_v60 }
 0x48d   : > { %v983_v62 = vpack.c.bf16 %v982_v61, %v982_v61 }
 0x48f   : > { %1276 = vmatmul.mubr.msk.bf16.vlgmr.msra.gmra.mxu0 %vm398_vm1, %v983_v62 }
 0x54f   : > { %v1044_v2 = vpop.f32.mrf.mxu0 }
 0x550   : > { %v1045_v3 = vadd.f32 %v1174_v63, %v1044_v2 }
 0x551   : > { %v1277_v4 = vpop.f32.mrf.mxu0 }
 0x552   : > { %v1051_v6 = vadd.f32 %v1050_v0, %v1045_v3 }
 0x553   : > { %v1047_v7 = vpop.f32.mrf.mxu0 }
 0x554   : > { %v1054_v8 = vsel %vm398_vm1, %v1051_v6, 0.0 }
 0x555   : > { %1055 = vadd.xlane.f32.xlu1 %v1054_v8  ;;  %v1278_v9 = vpop.f32.mrf.mxu0 }
 0x5de   : > { %v1056_v10 = vpop.xlane.xlu1 %1055 }
 0x5df   : > { %v1058_v11 = vmul.f32 0.03125, %v1056_v10 }
 0x5e1   : > { %v1059_v12 = vsub.f32 %v1051_v6, %v1058_v11 }
 0x5e3   : > { %v1060_v13 = vmul.f32 %v1059_v12, %v1059_v12 }
 0x5e5   : > { %v1061_v14 = vsel %vm398_vm1, %v1060_v13, 0.0 }
 0x5e6   : > { %1062 = vadd.xlane.f32.xlu0 %v1061_v14 }
 0x66f   : > { %v1063_v15 = vpop.xlane.xlu0 %1062 }
 0x670   : > { %v1064_v16 = vmul.f32 0.03125, %v1063_v15 }
 0x672   : > { %v1065_v5 = vadd.f32 1e-05, %v1064_v16 }
 0x674   : > { %1318 = vrsqrt.f32 %v1065_v5 }
 0x681   : > { %v1319_v17 = vpop.eup %1318 }
 0x682   : > { %v1067_v19 = vmul.f32 %v1319_v17, %v1059_v12 }
 0x684   : > { %v1074_v21 = vmul.f32 %v1178_v18, %v1067_v19 }
 0x686   : > { %v1081_v22 = vadd.f32 %v1179_v20, %v1074_v21 }
 0x688   : > { %v1082_v23 = vpack.c.bf16 %v1081_v22, %v1081_v22 }
 0x68a   : > { %1084 = vst.msk [vmem:[%s371_s16] sm:$0xf] %vm1083_vm6, %v1082_v23 }
 0x68b PF: > { %s20_s13 = sadd.s32 1, %s1326_s13  }
 0x68c   : > { %p17_p4 = scmp.ge.s32.totalorder %s20_s13, 4  }
 0x68e   :  { %19 = sbr.rel (!%p17_p4) target bundleno = 1 (0x1), region = 93 }

</bundles_post_ra>
